<compile_context>
chip_gen: v6e
topology: v6e:2x2x1
jax: 0.10.0
libtpu: 0.0.40
codegen_flags: <defaults>
</compile_context>

<pallas_src>
import functools

import jax
import jax.numpy as jnp
from jax.experimental import pallas as pl
from jax.experimental.pallas import tpu as pltpu


# ----------------------------- small helpers -------------------------------

_VMEM_LIMIT = 32 * 1024 * 1024   # modest scoped-VMEM limit (v7x has 64 MiB/TC)


def _round_up(x, m):
    return ((x + m - 1) // m) * m


def _row_tile(n, preferred=256):
    """Row tile: multiple of 8 sublanes, prefer a divisor of n (no padding)."""
    if n < preferred:
        return max(8, _round_up(n, 8))
    for t in (preferred, 192, 128, 64):
        if n % t == 0:
            return t
    return preferred


def _pad_rows(x2d, tm):
    """Zero-pad the row (token) dimension to a multiple of the row tile.
    Only triggers when no clean divisor tile exists (not in the demo)."""
    n = x2d.shape[0]
    n_pad = _round_up(n, tm)
    if n_pad == n:
        return x2d, n
    pad = jnp.zeros((n_pad - n, x2d.shape[1]), x2d.dtype)
    return jnp.concatenate([x2d, pad], axis=0), n


def _causal_mask(t):
    """Additive causal mask: 0 on/below diagonal, -1e30 above (NaN-safe)."""
    row = jax.lax.broadcasted_iota(jnp.int32, (t, t), 0)
    col = jax.lax.broadcasted_iota(jnp.int32, (t, t), 1)
    return jnp.where(row >= col, 0.0, -1e30).astype(jnp.float32)


# --------- Fused LN1 + multi-head causal attention + proj + residual --------

def _attn_block_kernel(x_ref, g_ref, b_ref, mask_ref, wqkv_ref, wproj_ref,
                       bproj_ref, o_ref, acc_ref, xln_ref, *, scale, head_size):
    h = pl.program_id(1)

    @pl.when(h == 0)
    def _():
        # LayerNorm(x) computed once per batch step, f32 stats, cached in bf16.
        xf = x_ref[...].astype(jnp.float32)
        mu = jnp.mean(xf, axis=-1, keepdims=True)
        var = jnp.mean(jnp.square(xf - mu), axis=-1, keepdims=True)
        xn = (xf - mu) * jax.lax.rsqrt(var + 1e-5)
        xln_ref[...] = (xn * g_ref[...] + b_ref[...]).astype(xln_ref.dtype)
        acc_ref[...] = jnp.zeros_like(acc_ref)

    xln = xln_ref[...]                                               # (T, C) bf16
    # Fused q/k/v projection: one MXU matmul with N = 3*hs.
    qkv = jnp.dot(xln, wqkv_ref[...], preferred_element_type=jnp.float32)
    q = qkv[:, :head_size]
    k = qkv[:, head_size:2 * head_size]
    v = qkv[:, 2 * head_size:3 * head_size]
    # scores = q @ k^T * n_embed**-0.5 (reference module scales by C, not hs).
    s = jax.lax.dot_general(
        q.astype(jnp.bfloat16), k.astype(jnp.bfloat16),
        (((1,), (1,)), ((), ())),
        preferred_element_type=jnp.float32) * scale                  # (T, T)
    s = s + mask_ref[...]                                            # causal mask
    m = jnp.max(s, axis=-1, keepdims=True)
    e = jnp.exp(s - m)
    denom = jnp.sum(e, axis=-1, keepdims=True)
    att = e * pl.reciprocal(denom, approx=True)                      # EUP recip
    # TODO(synk): attention-weight dropout skipped (eval-mode identity).
    head_out = jnp.dot(att.astype(jnp.bfloat16), v.astype(jnp.bfloat16),
                       preferred_element_type=jnp.float32)           # (T, hs)
    # Accumulate this head's slice of the output projection (lane-dense C).
    acc_ref[...] += jnp.dot(head_out.astype(jnp.bfloat16), wproj_ref[...],
                            preferred_element_type=jnp.float32)      # (T, C)

    @pl.when(h == pl.num_programs(1) - 1)
    def _():
        # Projection dropout is eval-mode identity; residual + bias fused here.
        o_ref[...] = (x_ref[...].astype(jnp.float32) + acc_ref[...]
                      + bproj_ref[...]).astype(o_ref.dtype)


def attention_block(x, gamma, beta, mask, w_qkv, w_proj, b_proj, *, scale):
    """x: (B, T, C) bf16. w_qkv: (nh, C, 3*hs). w_proj: (nh, hs, C). Out bf16."""
    B, T, C = x.shape
    nh, _, hs3 = w_qkv.shape
    hs = hs3 // 3
    return pl.pallas_call(
        functools.partial(_attn_block_kernel, scale=scale, head_size=hs),
        out_shape=jax.ShapeDtypeStruct((B, T, C), x.dtype),
        grid_spec=pltpu.PrefetchScalarGridSpec(
            num_scalar_prefetch=0,
            grid=(B, nh),                                   # head axis = reduction
            in_specs=[
                pl.BlockSpec((None, T, C), lambda b, h: (b, 0, 0)),      # x
                pl.BlockSpec((1, C), lambda b, h: (0, 0)),               # ln1 gamma
                pl.BlockSpec((1, C), lambda b, h: (0, 0)),               # ln1 beta
                pl.BlockSpec((T, T), lambda b, h: (0, 0)),               # causal mask
                pl.BlockSpec((None, C, 3 * hs), lambda b, h: (h, 0, 0)), # qkv weights
                pl.BlockSpec((None, hs, C), lambda b, h: (h, 0, 0)),     # proj slice
                pl.BlockSpec((1, C), lambda b, h: (0, 0)),               # proj bias
            ],
            out_specs=pl.BlockSpec((None, T, C), lambda b, h: (b, 0, 0)),
            scratch_shapes=[
                pltpu.VMEM((T, C), jnp.float32),    # f32 projection accumulator
                pltpu.VMEM((T, C), jnp.bfloat16),   # cached LayerNorm(x)
            ],
        ),
        compiler_params=pltpu.CompilerParams(
            dimension_semantics=("parallel", "arbitrary"),
            vmem_limit_bytes=_VMEM_LIMIT,
        ),
        cost_estimate=pl.CostEstimate(
            flops=B * nh * (8 * T * C * hs + 4 * T * T * hs),
            transcendentals=B * nh * T * T,
            bytes_accessed=(2 * B * T * C * 2 + nh * C * 3 * hs * 2
                            + nh * hs * C * 2 + T * T * 4 + 3 * C * 4)),
    )(x, gamma.reshape(1, C), beta.reshape(1, C), mask,
      w_qkv, w_proj, b_proj.reshape(1, C))


# --------------- Fused residual + LayerNorm + FeedForward -------------------

def _ffn_block_kernel(x_ref, g_ref, b_ref, w1_ref, b1_ref, w2_ref, b2_ref, o_ref):
    xf = x_ref[...].astype(jnp.float32)
    mu = jnp.mean(xf, axis=-1, keepdims=True)
    var = jnp.mean(jnp.square(xf - mu), axis=-1, keepdims=True)
    xln = ((xf - mu) * jax.lax.rsqrt(var + 1e-5) * g_ref[...]
           + b_ref[...]).astype(jnp.bfloat16)
    h = jnp.dot(xln, w1_ref[...], preferred_element_type=jnp.float32) + b1_ref[...]
    h = jnp.maximum(h, 0.0).astype(jnp.bfloat16)
    y = jnp.dot(h, w2_ref[...], preferred_element_type=jnp.float32)
    # FFN dropout is eval-mode identity; residual add fused here.
    o_ref[...] = (xf + y + b2_ref[...]).astype(o_ref.dtype)


def ffn_block(x2d, gamma, beta, w1, b1, w2, b2, *, row_tile=256):
    """out = x + Linear(relu(Linear(LayerNorm(x)))); single hidden step."""
    n, c = x2d.shape
    h_dim = w1.shape[1]
    tm = _row_tile(n, row_tile)
    xp, n0 = _pad_rows(x2d, tm)
    np_ = xp.shape[0]
    out = pl.pallas_call(
        _ffn_block_kernel,
        out_shape=jax.ShapeDtypeStruct((np_, c), x2d.dtype),
        grid_spec=pltpu.PrefetchScalarGridSpec(
            num_scalar_prefetch=0,
            grid=(np_ // tm,),
            in_specs=[
                pl.BlockSpec((tm, c), lambda i: (i, 0)),       # x (residual + LN src)
                pl.BlockSpec((1, c), lambda i: (0, 0)),        # LN gamma
                pl.BlockSpec((1, c), lambda i: (0, 0)),        # LN beta
                pl.BlockSpec((c, h_dim), lambda i: (0, 0)),    # W1 (resident)
                pl.BlockSpec((1, h_dim), lambda i: (0, 0)),    # b1
                pl.BlockSpec((h_dim, c), lambda i: (0, 0)),    # W2 (resident)
                pl.BlockSpec((1, c), lambda i: (0, 0)),        # b2
            ],
            out_specs=pl.BlockSpec((tm, c), lambda i: (i, 0)),
        ),
        compiler_params=pltpu.CompilerParams(
            dimension_semantics=("parallel",),
            vmem_limit_bytes=_VMEM_LIMIT,
        ),
        cost_estimate=pl.CostEstimate(
            flops=4 * np_ * c * h_dim, transcendentals=np_,
            bytes_accessed=2 * np_ * c * 2 + (w1.size + w2.size) * 2
                           + (h_dim + 3 * c) * 4),
    )(xp, gamma.reshape(1, c), beta.reshape(1, c), w1,
      b1.reshape(1, h_dim), w2, b2.reshape(1, c))
    return out[:n0]


# ----------------- Fused final LayerNorm + lm_head (vocab padded) -----------

def _lm_head_kernel(x_ref, g_ref, b_ref, w_ref, bias_ref, o_ref):
    xf = x_ref[...].astype(jnp.float32)
    mu = jnp.mean(xf, axis=-1, keepdims=True)
    var = jnp.mean(jnp.square(xf - mu), axis=-1, keepdims=True)
    xln = ((xf - mu) * jax.lax.rsqrt(var + 1e-5) * g_ref[...]
           + b_ref[...]).astype(jnp.bfloat16)
    y = jnp.dot(xln, w_ref[...], preferred_element_type=jnp.float32) + bias_ref[...]
    o_ref[...] = y.astype(o_ref.dtype)


def lm_head(x2d, gamma, beta, w, bias, *, row_tile=256):
    """logits = LayerNorm(x) @ W + b, vocab padded to a 128-lane multiple."""
    n, c = x2d.shape
    vp = w.shape[1]
    tm = _row_tile(n, row_tile)
    xp, n0 = _pad_rows(x2d, tm)
    np_ = xp.shape[0]
    out = pl.pallas_call(
        _lm_head_kernel,
        out_shape=jax.ShapeDtypeStruct((np_, vp), jnp.float32),
        grid_spec=pltpu.PrefetchScalarGridSpec(
            num_scalar_prefetch=0,
            grid=(np_ // tm,),
            in_specs=[
                pl.BlockSpec((tm, c), lambda i: (i, 0)),
                pl.BlockSpec((1, c), lambda i: (0, 0)),
                pl.BlockSpec((1, c), lambda i: (0, 0)),
                pl.BlockSpec((c, vp), lambda i: (0, 0)),       # weights resident
                pl.BlockSpec((1, vp), lambda i: (0, 0)),
            ],
            out_specs=pl.BlockSpec((tm, vp), lambda i: (i, 0)),
        ),
        compiler_params=pltpu.CompilerParams(
            dimension_semantics=("parallel",),
            vmem_limit_bytes=_VMEM_LIMIT,
        ),
        cost_estimate=pl.CostEstimate(
            flops=2 * np_ * c * vp, transcendentals=np_,
            bytes_accessed=np_ * c * 2 + w.size * 2 + np_ * vp * 4
                           + (vp + 2 * c) * 4),
    )(xp, gamma.reshape(1, c), beta.reshape(1, c), w, bias.reshape(1, vp))
    return out[:n0]


# ------------------------------ model forward -------------------------------

def bigram_lm_forward(params, idx, targets=None, *, vocab_size):
    B, T = idx.shape
    C = params["tok_emb"].shape[1]
    # TODO(synk): embedding gathers left to XLA (single-row lookups).
    tok = jnp.take(params["tok_emb"], idx, axis=0)                # (B, T, C)
    pos = params["pos_emb"][:T]
    x = (tok + pos[None, :, :]).astype(jnp.bfloat16)              # bf16 residual stream
    mask = _causal_mask(T)
    scale = float(C) ** -0.5                                      # C, not hs (module quirk)
    for p in params["blocks"]:
        x = attention_block(x, p["ln1_g"], p["ln1_b"], mask,
                            p["w_qkv"], p["w_proj"], p["b_proj"], scale=scale)
        x = ffn_block(x.reshape(B * T, C), p["ln2_g"], p["ln2_b"],
                      p["w1"], p["b1"], p["w2"], p["b2"]).reshape(B, T, C)
    logits_p = lm_head(x.reshape(B * T, C), params["lnf_g"], params["lnf_b"],
                       params["w_lm"], params["b_lm"])
    logits = logits_p[:, :vocab_size].reshape(B, T, vocab_size)
    loss = None
    if targets is not None:
        # TODO(synk): cross-entropy computed in plain JAX (not a Pallas kernel).
        l2d = logits.reshape(B * T, vocab_size).astype(jnp.float32)
        lse = jax.nn.logsumexp(l2d, axis=-1)
        picked = jnp.take_along_axis(l2d, targets.reshape(-1, 1), axis=-1)[:, 0]
        loss = jnp.mean(lse - picked)
    return logits, loss


# ------------------------------- init & reference ---------------------------

def init_params(key, *, vocab_size, n_embed, block_size, n_heads,
                w_dtype=jnp.bfloat16):
    """PyTorch-default-style init; Linear weights stored (in, out) in bf16.
    QKV weights concatenated per head; proj weight stored as per-head slices;
    lm_head padded to a 128-lane vocab."""
    keys = jax.random.split(key, 3 + len(n_heads))

    def lin(k, fan_in, shape, dtype):
        s = 1.0 / (fan_in ** 0.5)
        return jax.random.uniform(k, shape, jnp.float32, -s, s).astype(dtype)

    vp = _round_up(vocab_size, 128)
    params = {
        "tok_emb": jax.random.normal(keys[0], (vocab_size, n_embed), jnp.float32),
        "pos_emb": jax.random.normal(keys[1], (block_size, n_embed), jnp.float32),
        "lnf_g": jnp.ones((n_embed,), jnp.float32),
        "lnf_b": jnp.zeros((n_embed,), jnp.float32),
    }
    k_lm_w, k_lm_b = jax.random.split(keys[2])
    w_lm = lin(k_lm_w, n_embed, (n_embed, vocab_size), jnp.float32)
    b_lm = lin(k_lm_b, n_embed, (vocab_size,), jnp.float32)
    params["w_lm"] = jnp.pad(w_lm, ((0, 0), (0, vp - vocab_size))).astype(w_dtype)
    params["b_lm"] = jnp.pad(b_lm, (0, vp - vocab_size)).astype(jnp.float32)

    blocks = []
    for bi, nh in enumerate(n_heads):
        hs = n_embed // nh
        kk = jax.random.split(keys[3 + bi], 9)
        wq = lin(kk[0], n_embed, (nh, n_embed, hs), jnp.float32)     # bias=False
        wk = lin(kk[1], n_embed, (nh, n_embed, hs), jnp.float32)
        wv = lin(kk[2], n_embed, (nh, n_embed, hs), jnp.float32)
        w_proj = lin(kk[3], n_embed, (n_embed, n_embed), jnp.float32)
        blocks.append({
            "ln1_g": jnp.ones((n_embed,), jnp.float32),
            "ln1_b": jnp.zeros((n_embed,), jnp.float32),
            "ln2_g": jnp.ones((n_embed,), jnp.float32),
            "ln2_b": jnp.zeros((n_embed,), jnp.float32),
            "w_qkv": jnp.concatenate([wq, wk, wv], axis=-1).astype(w_dtype),
            "w_proj": w_proj.reshape(nh, hs, n_embed).astype(w_dtype),
            "b_proj": lin(kk[4], n_embed, (n_embed,), jnp.float32),
            "w1": lin(kk[5], n_embed, (n_embed, 4 * n_embed), w_dtype),
            "b1": lin(kk[6], n_embed, (4 * n_embed,), jnp.float32),
            "w2": lin(kk[7], 4 * n_embed, (4 * n_embed, n_embed), w_dtype),
            "b2": lin(kk[8], 4 * n_embed, (n_embed,), jnp.float32),
        })
    params["blocks"] = blocks
    return params


def _ref_mm(a, b):
    # Mirrors the kernels: bf16 MXU inputs, f32 accumulation.
    return jnp.dot(a.astype(jnp.bfloat16), b.astype(jnp.bfloat16),
                   preferred_element_type=jnp.float32)


def _ref_ln(x, g, b):
    xf = x.astype(jnp.float32)
    mu = jnp.mean(xf, axis=-1, keepdims=True)
    var = jnp.mean(jnp.square(xf - mu), axis=-1, keepdims=True)
    return ((xf - mu) * jax.lax.rsqrt(var + 1e-5) * g + b).astype(jnp.bfloat16)


def ref_forward(params, idx, *, vocab_size):
    """Pure-JAX reference mirroring kernel numerics (bf16 activations,
    bf16 MXU inputs with f32 accumulation, eval-mode dropout == identity)."""
    B, T = idx.shape
    C = params["tok_emb"].shape[1]
    x = (jnp.take(params["tok_emb"], idx, axis=0)
         + params["pos_emb"][:T][None]).astype(jnp.bfloat16)
    mask = _causal_mask(T)
    scale = float(C) ** -0.5
    for p in params["blocks"]:
        xln = _ref_ln(x, p["ln1_g"], p["ln1_b"])
        nh, _, hs3 = p["w_qkv"].shape
        hs = hs3 // 3
        acc = jnp.zeros((B, T, C), jnp.float32)
        for h in range(nh):
            q = _ref_mm(xln, p["w_qkv"][h][:, :hs])
            k = _ref_mm(xln, p["w_qkv"][h][:, hs:2 * hs])
            v = _ref_mm(xln, p["w_qkv"][h][:, 2 * hs:3 * hs])
            s = jnp.einsum("btd,bsd->bts", q.astype(jnp.bfloat16),
                           k.astype(jnp.bfloat16),
                           preferred_element_type=jnp.float32) * scale
            s = s + mask[None]
            m = jnp.max(s, axis=-1, keepdims=True)
            e = jnp.exp(s - m)
            att = (e / jnp.sum(e, axis=-1, keepdims=True)).astype(jnp.bfloat16)
            ho = jnp.einsum("bts,bsd->btd", att, v.astype(jnp.bfloat16),
                            preferred_element_type=jnp.float32)
            acc = acc + _ref_mm(ho, p["w_proj"][h])
        x = (x.astype(jnp.float32) + acc + p["b_proj"]).astype(jnp.bfloat16)
        xln2 = _ref_ln(x, p["ln2_g"], p["ln2_b"])
        hdn = jnp.maximum(_ref_mm(xln2, p["w1"]) + p["b1"], 0.0)
        y = _ref_mm(hdn, p["w2"])
        x = (x.astype(jnp.float32) + y + p["b2"]).astype(jnp.bfloat16)
    xf = _ref_ln(x, params["lnf_g"], params["lnf_b"])
    logits = _ref_mm(xf, params["w_lm"]) + params["b_lm"]
    return logits[..., :vocab_size]


# ----------------------------------- demo -----------------------------------

if __name__ == "__main__":
    # Small shapes consistent with the module (the real gpt.py uses
    # n_embed=256, block_size=256, 6 blocks); B*T=512 so row grids have >=2
    # steps and the attention grid is (B=2, nh).
    vocab_size = 65
    n_embed = 128
    block_size = 256
    n_heads = [8, 4]          # two transformer blocks, head sizes 16 and 32
    B, T = 2, 256

    key = jax.random.PRNGKey(0)
    k_param, k_idx = jax.random.split(key)
    params = init_params(k_param, vocab_size=vocab_size, n_embed=n_embed,
                         block_size=block_size, n_heads=n_heads)
    idx = jax.random.randint(k_idx, (B, T), 0, vocab_size, dtype=jnp.int32)

    logits, loss = bigram_lm_forward(params, idx, targets=None,
                                     vocab_size=vocab_size)
    logits = jax.block_until_ready(logits)
    assert logits.shape == (B, T, vocab_size)
    assert loss is None

    ref = jax.block_until_ready(ref_forward(params, idx, vocab_size=vocab_size))
    max_err = float(jnp.max(jnp.abs(logits - ref)))
    assert jnp.allclose(logits, ref, atol=2e-2, rtol=2e-2), f"max_err={max_err}"

    print("KERNEL_OK")
</pallas_src>

<mosaic_0001>
module attributes {stable_mosaic.version = 11 : i64} {
  func.func @_attn_block_kernel(%arg0: i32, %arg1: i32, %arg2: memref<1x256x128xbf16, #tpu.memory_space<vmem>>, %arg3: memref<1x128xf32, #tpu.memory_space<vmem>>, %arg4: memref<1x128xf32, #tpu.memory_space<vmem>>, %arg5: memref<256x256xf32, #tpu.memory_space<vmem>>, %arg6: memref<1x128x48xbf16, #tpu.memory_space<vmem>>, %arg7: memref<1x16x128xbf16, #tpu.memory_space<vmem>>, %arg8: memref<1x128xf32, #tpu.memory_space<vmem>>, %arg9: memref<1x256x128xbf16, #tpu.memory_space<vmem>>, %arg10: memref<256x128xf32, #tpu.memory_space<vmem>>, %arg11: memref<256x128xbf16, #tpu.memory_space<vmem>>) attributes {dimension_semantics = [#tpu.dimension_semantics<parallel>, #tpu.dimension_semantics<arbitrary>], iteration_bounds = array<i64: 2, 8>, scalar_prefetch = 0 : i64, scratch_operands = 2 : i64, tpu.core_type = #tpu.core_type<tc>, window_params = [{transform_indices = @transform_0, window_bounds = array<i64: 1, 256, 128>}, {pipeline_mode = #tpu.pipeline_mode<synchronous>, transform_indices = @transform_1, window_bounds = array<i64: 1, 128>}, {pipeline_mode = #tpu.pipeline_mode<synchronous>, transform_indices = @transform_2, window_bounds = array<i64: 1, 128>}, {pipeline_mode = #tpu.pipeline_mode<synchronous>, transform_indices = @transform_3, window_bounds = array<i64: 256, 256>}, {transform_indices = @transform_4, window_bounds = array<i64: 1, 128, 48>}, {transform_indices = @transform_5, window_bounds = array<i64: 1, 16, 128>}, {pipeline_mode = #tpu.pipeline_mode<synchronous>, transform_indices = @transform_6, window_bounds = array<i64: 1, 128>}, {transform_indices = @transform_7, window_bounds = array<i64: 1, 256, 128>}]} {
    %c0_i32 = arith.constant 0 : i32
    %0 = arith.cmpi eq, %arg1, %c0_i32 : i32
    %1 = arith.extui %0 : i1 to i32
    %c0_i32_0 = arith.constant 0 : i32
    %2 = arith.cmpi ne, %1, %c0_i32_0 : i32
    scf.if %2 {
      %c0_21 = arith.constant 0 : index
      %c0_22 = arith.constant 0 : index
      %c0_23 = arith.constant 0 : index
      %40 = vector.load %arg2[%c0_21, %c0_22, %c0_23] : memref<1x256x128xbf16, #tpu.memory_space<vmem>>, vector<1x256x128xbf16>
      %41 = vector.shape_cast %40 : vector<1x256x128xbf16> to vector<256x128xbf16>
      %42 = arith.extf %41 : vector<256x128xbf16> to vector<256x128xf32>
      %cst_24 = arith.constant dense<0.000000e+00> : vector<256xf32>
      %43 = vector.multi_reduction <add>, %42, %cst_24 [1] : vector<256x128xf32> to vector<256xf32>
      %44 = vector.shape_cast %43 : vector<256xf32> to vector<256x1xf32>
      %cst_25 = arith.constant 1.280000e+02 : f32
      %45 = vector.broadcast %cst_25 : f32 to vector<256x1xf32>
      %46 = arith.divf %44, %45 : vector<256x1xf32>
      %47 = vector.broadcast %46 : vector<256x1xf32> to vector<256x128xf32>
      %48 = arith.subf %42, %47 : vector<256x128xf32>
      %49 = arith.mulf %48, %48 : vector<256x128xf32>
      %cst_26 = arith.constant dense<0.000000e+00> : vector<256xf32>
      %50 = vector.multi_reduction <add>, %49, %cst_26 [1] : vector<256x128xf32> to vector<256xf32>
      %51 = vector.shape_cast %50 : vector<256xf32> to vector<256x1xf32>
      %cst_27 = arith.constant 1.280000e+02 : f32
      %52 = vector.broadcast %cst_27 : f32 to vector<256x1xf32>
      %53 = arith.divf %51, %52 : vector<256x1xf32>
      %54 = vector.broadcast %46 : vector<256x1xf32> to vector<256x128xf32>
      %55 = arith.subf %42, %54 : vector<256x128xf32>
      %cst_28 = arith.constant 9.99999974E-6 : f32
      %56 = vector.broadcast %cst_28 : f32 to vector<256x1xf32>
      %57 = arith.addf %53, %56 : vector<256x1xf32>
      %58 = math.rsqrt %57 : vector<256x1xf32>
      %59 = vector.broadcast %58 : vector<256x1xf32> to vector<256x128xf32>
      %60 = arith.mulf %55, %59 : vector<256x128xf32>
      %c0_29 = arith.constant 0 : index
      %c0_30 = arith.constant 0 : index
      %61 = vector.load %arg3[%c0_29, %c0_30] : memref<1x128xf32, #tpu.memory_space<vmem>>, vector<1x128xf32>
      %62 = vector.broadcast %61 : vector<1x128xf32> to vector<256x128xf32>
      %63 = arith.mulf %60, %62 : vector<256x128xf32>
      %c0_31 = arith.constant 0 : index
      %c0_32 = arith.constant 0 : index
      %64 = vector.load %arg4[%c0_31, %c0_32] : memref<1x128xf32, #tpu.memory_space<vmem>>, vector<1x128xf32>
      %65 = vector.broadcast %64 : vector<1x128xf32> to vector<256x128xf32>
      %66 = arith.addf %63, %65 : vector<256x128xf32>
      %67 = arith.truncf %66 : vector<256x128xf32> to vector<256x128xbf16>
      %c0_33 = arith.constant 0 : index
      %c0_34 = arith.constant 0 : index
      %68 = vector.load %arg11[%c0_33, %c0_34] : memref<256x128xbf16, #tpu.memory_space<vmem>>, vector<256x128xbf16>
      tpu.vector_store %arg11[%c0_33, %c0_34], %67 {strides = array<i32>} : memref<256x128xbf16, #tpu.memory_space<vmem>>, vector<256x128xbf16>,
      %cst_35 = arith.constant 0.000000e+00 : f32
      %69 = vector.broadcast %cst_35 : f32 to vector<256x128xf32>
      %c0_36 = arith.constant 0 : index
      %c0_37 = arith.constant 0 : index
      %70 = vector.load %arg10[%c0_36, %c0_37] : memref<256x128xf32, #tpu.memory_space<vmem>>, vector<256x128xf32>
      tpu.vector_store %arg10[%c0_36, %c0_37], %69 {strides = array<i32>} : memref<256x128xf32, #tpu.memory_space<vmem>>, vector<256x128xf32>,
    } else {
    }
    %c0 = arith.constant 0 : index
    %c0_1 = arith.constant 0 : index
    %3 = vector.load %arg11[%c0, %c0_1] : memref<256x128xbf16, #tpu.memory_space<vmem>>, vector<256x128xbf16>
    %c0_2 = arith.constant 0 : index
    %c0_3 = arith.constant 0 : index
    %c0_4 = arith.constant 0 : index
    %4 = vector.load %arg6[%c0_2, %c0_3, %c0_4] : memref<1x128x48xbf16, #tpu.memory_space<vmem>>, vector<1x128x48xbf16>
    %5 = vector.shape_cast %4 : vector<1x128x48xbf16> to vector<128x48xbf16>
    %cst = arith.constant dense<0.000000e+00> : vector<256x48xf32>
    %6 = tpu.matmul %3, %5, %cst {dimension_numbers = #tpu.dot_dimension_numbers<[1], [0], [0], [1], [0, 0, 1, 1], [], []>} : vector<256x128xbf16>, vector<128x48xbf16>, vector<256x48xf32> -> vector<256x48xf32>
    %7 = vector.extract_strided_slice %6 {offsets = [0, 0], sizes = [256, 16], strides = [1, 1]} : vector<256x48xf32> to vector<256x16xf32>
    %8 = vector.extract_strided_slice %6 {offsets = [0, 16], sizes = [256, 16], strides = [1, 1]} : vector<256x48xf32> to vector<256x16xf32>
    %9 = vector.extract_strided_slice %6 {offsets = [0, 32], sizes = [256, 16], strides = [1, 1]} : vector<256x48xf32> to vector<256x16xf32>
    %10 = arith.truncf %7 : vector<256x16xf32> to vector<256x16xbf16>
    %11 = arith.truncf %8 : vector<256x16xf32> to vector<256x16xbf16>
    %cst_5 = arith.constant dense<0.000000e+00> : vector<256x256xf32>
    %12 = tpu.matmul %10, %11, %cst_5 {dimension_numbers = #tpu.dot_dimension_numbers<[1], [1], [0], [0], [0, 0, 1, 0], [], []>} : vector<256x16xbf16>, vector<256x16xbf16>, vector<256x256xf32> -> vector<256x256xf32>
    %cst_6 = arith.constant 0.0883883461 : f32
    %13 = vector.broadcast %cst_6 : f32 to vector<256x256xf32>
    %14 = arith.mulf %12, %13 : vector<256x256xf32>
    %c0_7 = arith.constant 0 : index
    %c0_8 = arith.constant 0 : index
    %15 = vector.load %arg5[%c0_7, %c0_8] : memref<256x256xf32, #tpu.memory_space<vmem>>, vector<256x256xf32>
    %16 = arith.addf %14, %15 : vector<256x256xf32>
    %cst_9 = arith.constant dense<0xFF800000> : vector<256xf32>
    %17 = vector.multi_reduction <maximumf>, %16, %cst_9 [1] : vector<256x256xf32> to vector<256xf32>
    %18 = vector.shape_cast %17 : vector<256xf32> to vector<256x1xf32>
    %19 = vector.broadcast %18 : vector<256x1xf32> to vector<256x256xf32>
    %20 = arith.subf %16, %19 : vector<256x256xf32>
    %21 = math.exp %20 : vector<256x256xf32>
    %cst_10 = arith.constant dense<0.000000e+00> : vector<256xf32>
    %22 = vector.multi_reduction <add>, %21, %cst_10 [1] : vector<256x256xf32> to vector<256xf32>
    %23 = vector.shape_cast %22 : vector<256xf32> to vector<256x1xf32>
    %24 = tpu.reciprocal %23 {approx = true} : vector<256x1xf32> -> vector<256x1xf32>
    %25 = vector.broadcast %24 : vector<256x1xf32> to vector<256x256xf32>
    %26 = arith.mulf %21, %25 : vector<256x256xf32>
    %27 = arith.truncf %26 : vector<256x256xf32> to vector<256x256xbf16>
    %28 = arith.truncf %9 : vector<256x16xf32> to vector<256x16xbf16>
    %cst_11 = arith.constant dense<0.000000e+00> : vector<256x16xf32>
    %29 = tpu.matmul %27, %28, %cst_11 {dimension_numbers = #tpu.dot_dimension_numbers<[1], [0], [0], [1], [0, 0, 1, 1], [], []>} : vector<256x256xbf16>, vector<256x16xbf16>, vector<256x16xf32> -> vector<256x16xf32>
    %c0_12 = arith.constant 0 : index
    %c0_13 = arith.constant 0 : index
    %30 = vector.load %arg10[%c0_12, %c0_13] : memref<256x128xf32, #tpu.memory_space<vmem>>, vector<256x128xf32>
    %31 = arith.truncf %29 : vector<256x16xf32> to vector<256x16xbf16>
    %c0_14 = arith.constant 0 : index
    %c0_15 = arith.constant 0 : index
    %c0_16 = arith.constant 0 : index
    %32 = vector.load %arg7[%c0_14, %c0_15, %c0_16] : memref<1x16x128xbf16, #tpu.memory_space<vmem>>, vector<1x16x128xbf16>
    %33 = vector.shape_cast %32 : vector<1x16x128xbf16> to vector<16x128xbf16>
    %cst_17 = arith.constant dense<0.000000e+00> : vector<256x128xf32>
    %34 = tpu.matmul %31, %33, %cst_17 {dimension_numbers = #tpu.dot_dimension_numbers<[1], [0], [0], [1], [0, 0, 1, 1], [], []>} : vector<256x16xbf16>, vector<16x128xbf16>, vector<256x128xf32> -> vector<256x128xf32>
    %35 = arith.addf %30, %34 : vector<256x128xf32>
    %c0_18 = arith.constant 0 : index
    %c0_19 = arith.constant 0 : index
    %36 = vector.load %arg10[%c0_18, %c0_19] : memref<256x128xf32, #tpu.memory_space<vmem>>, vector<256x128xf32>
    tpu.vector_store %arg10[%c0_18, %c0_19], %35 {strides = array<i32>} : memref<256x128xf32, #tpu.memory_space<vmem>>, vector<256x128xf32>,
    %c7_i32 = arith.constant 7 : i32
    %37 = arith.cmpi eq, %arg1, %c7_i32 : i32
    %38 = arith.extui %37 : i1 to i32
    %c0_i32_20 = arith.constant 0 : i32
    %39 = arith.cmpi ne, %38, %c0_i32_20 : i32
    scf.if %39 {
      %c0_21 = arith.constant 0 : index
      %c0_22 = arith.constant 0 : index
      %c0_23 = arith.constant 0 : index
      %40 = vector.load %arg2[%c0_21, %c0_22, %c0_23] : memref<1x256x128xbf16, #tpu.memory_space<vmem>>, vector<1x256x128xbf16>
      %41 = vector.shape_cast %40 : vector<1x256x128xbf16> to vector<256x128xbf16>
      %42 = arith.extf %41 : vector<256x128xbf16> to vector<256x128xf32>
      %c0_24 = arith.constant 0 : index
      %c0_25 = arith.constant 0 : index
      %43 = vector.load %arg10[%c0_24, %c0_25] : memref<256x128xf32, #tpu.memory_space<vmem>>, vector<256x128xf32>
      %44 = arith.addf %42, %43 : vector<256x128xf32>
      %c0_26 = arith.constant 0 : index
      %c0_27 = arith.constant 0 : index
      %45 = vector.load %arg8[%c0_26, %c0_27] : memref<1x128xf32, #tpu.memory_space<vmem>>, vector<1x128xf32>
      %46 = vector.broadcast %45 : vector<1x128xf32> to vector<256x128xf32>
      %47 = arith.addf %44, %46 : vector<256x128xf32>
      %48 = arith.truncf %47 : vector<256x128xf32> to vector<256x128xbf16>
      %c0_28 = arith.constant 0 : index
      %c0_29 = arith.constant 0 : index
      %c0_30 = arith.constant 0 : index
      %49 = vector.load %arg9[%c0_28, %c0_29, %c0_30] : memref<1x256x128xbf16, #tpu.memory_space<vmem>>, vector<1x256x128xbf16>
      %50 = vector.shape_cast %49 : vector<1x256x128xbf16> to vector<256x128xbf16>
      %51 = vector.shape_cast %48 : vector<256x128xbf16> to vector<1x256x128xbf16>
      tpu.vector_store %arg9[%c0_28, %c0_29, %c0_30], %51 {strides = array<i32>} : memref<1x256x128xbf16, #tpu.memory_space<vmem>>, vector<1x256x128xbf16>,
    } else {
    }
    return
  }
  func.func @transform_0(%arg0: i32, %arg1: i32) -> (i32, i32, i32) {
    %c0_i32 = arith.constant 0 : i32
    %c0_i32_0 = arith.constant 0 : i32
    %c0_i32_1 = arith.constant 0 : i32
    return %arg0, %c0_i32, %c0_i32_0 : i32, i32, i32
  }
  func.func @transform_1(%arg0: i32, %arg1: i32) -> (i32, i32) {
    %c0_i32 = arith.constant 0 : i32
    %c0_i32_0 = arith.constant 0 : i32
    %c0_i32_1 = arith.constant 0 : i32
    return %c0_i32, %c0_i32_0 : i32, i32
  }
  func.func @transform_2(%arg0: i32, %arg1: i32) -> (i32, i32) {
    %c0_i32 = arith.constant 0 : i32
    %c0_i32_0 = arith.constant 0 : i32
    %c0_i32_1 = arith.constant 0 : i32
    return %c0_i32, %c0_i32_0 : i32, i32
  }
  func.func @transform_3(%arg0: i32, %arg1: i32) -> (i32, i32) {
    %c0_i32 = arith.constant 0 : i32
    %c0_i32_0 = arith.constant 0 : i32
    %c0_i32_1 = arith.constant 0 : i32
    return %c0_i32, %c0_i32_0 : i32, i32
  }
  func.func @transform_4(%arg0: i32, %arg1: i32) -> (i32, i32, i32) {
    %c0_i32 = arith.constant 0 : i32
    %c0_i32_0 = arith.constant 0 : i32
    %c0_i32_1 = arith.constant 0 : i32
    return %arg1, %c0_i32, %c0_i32_0 : i32, i32, i32
  }
  func.func @transform_5(%arg0: i32, %arg1: i32) -> (i32, i32, i32) {
    %c0_i32 = arith.constant 0 : i32
    %c0_i32_0 = arith.constant 0 : i32
    %c0_i32_1 = arith.constant 0 : i32
    return %arg1, %c0_i32, %c0_i32_0 : i32, i32, i32
  }
  func.func @transform_6(%arg0: i32, %arg1: i32) -> (i32, i32) {
    %c0_i32 = arith.constant 0 : i32
    %c0_i32_0 = arith.constant 0 : i32
    %c0_i32_1 = arith.constant 0 : i32
    return %c0_i32, %c0_i32_0 : i32, i32
  }
  func.func @transform_7(%arg0: i32, %arg1: i32) -> (i32, i32, i32) {
    %c0_i32 = arith.constant 0 : i32
    %c0_i32_0 = arith.constant 0 : i32
    %c0_i32_1 = arith.constant 0 : i32
    return %arg0, %c0_i32, %c0_i32_0 : i32, i32, i32
  }
}

</mosaic_0001>

<bundles_post_ra>
// kernel: tpu_custom_call.1
= control target key start
LH: loop header
LB: loop body
LE: loop exit
PB: predicated region body
PF: predicated region fallthrough
CT: control target
= control target key end

     0   :  { %s6470_s0 = inlined_call_operand.hbm [shape: bf16[2,256,128], index: 0, kind: input, shape index: {}]   ;;  %s6471_s1 = inlined_call_operand.vmem [shape: f32[1,128], index: 1, kind: input, shape index: {}]   ;;  %s6472_s2 = inlined_call_operand.vmem [shape: f32[1,128], index: 2, kind: input, shape index: {}]   ;;  %s6473_s3 = inlined_call_operand.vmem [shape: f32[256,256], index: 3, kind: input, shape index: {}]   ;;  %s6474_s4 = inlined_call_operand.vmem [shape: bf16[8,128,48], index: 4, kind: input, shape index: {}]   ;;  %s6475_s5 = inlined_call_operand.vmem [shape: bf16[8,16,128], index: 5, kind: input, shape index: {}]   ;;  %s6476_s6 = inlined_call_operand.vmem [shape: f32[1,128], index: 6, kind: input, shape index: {}]   ;;  %s6477_s7 = inlined_call_operand.hbm [shape: bf16[2,256,128], index: 7, kind: output, shape index: {}]  }
   0x1   :  { %6506 = sst [smem:[#allocation32_spill]] %s6470_s0 }
   0x2   :  { %12 = vsyncpa [#allocation5], 0 }
   0x3   :  { %14 = vsyncpa [#allocation5 + $0x1], 0 }
   0x4   :  { %15 = vsyncpa [#allocation6], 0 }
   0x5   :  { %17 = vsyncpa [#allocation6 + $0x1], 0  ;;  %s4838_s24 = smov 0   ;;  %s4840_s25 = smov 0  }
   0x6   :  { %s4842_s26 = smov 0   ;;  %s4844_s27 = smov 0  }
   0x7   :  { %s4846_s28 = smov 0   ;;  %s4848_s29 = smov 0  }
   0x8   :  { %s4850_s30 = smov 0   ;;  %s4852_s8 = smov 0  }
   0x9 LB: > { %6507 = sst [smem:[#allocation10_spill]] %s4779_s29  ;;  %s3443_s9 = sadd.s32 4294967295, %s4787_s8   ;;  %s4787_s8 = sphi %s4852_s8, %s23_s8   ;;  %s4783_s30 = sphi %s4850_s30, %s6570_s30   ;;  %s4779_s29 = sphi %s4848_s29, %s6569_s29   ;;  %s4775_s28 = sphi %s4846_s28, %s6568_s28   ;;  %s4771_s27 = sphi %s4844_s27, %s6567_s27   ;;  %s4767_s26 = sphi %s4842_s26, %s6573_s26   ;;  %s4763_s25 = sphi %s4840_s25, %s6572_s25   ;;  %s4759_s24 = sphi %s4838_s24, %s6571_s24  }
   0xa   : > { %6508 = sst [smem:[#allocation11_spill]] %s4783_s30  ;;  %s3444_s10 = sadd.s32 4294967294, %s4787_s8  }
   0xb   : > { %s32_s11 = sadd.s32 1, %s4779_s29  ;;  %s35_s12 = sadd.s32 1, %s4783_s30 }
   0xc   : > { %p33_p0 = scmp.ge.s32.totalorder %s32_s11, 8  ;;  %s42_s13 = sadd.s32 1, %s4767_s26 }
   0xd   : > { %p49_p1 = scmp.ne.s32.totalorder %s4767_s26, %s4763_s25  ;;  %p50_p2 = scmp.eq.s32.totalorder %s4787_s8, 0 }
   0xe   : > { %s6575_s11 = smov (%p33_p0, %s32_s11), 0  ;;  %s6577_s12 = smov (!%p33_p0, %s35_s12), %s4783_s30 }
   0xf   : > { %6509 = sst [smem:[#allocation12_spill]] %s6575_s11  ;;  %p4889_p3 = por %p50_p2, %p49_p1 }
  0x10   : > { %p55_p4 = scmp.ne.s32.totalorder %s4763_s25, %s4759_s24  ;;  %p37_p5 = scmp.ge.s32.totalorder %s6577_s12, 2 }
  0x11   : > { %p56_p6 = scmp.eq.s32.totalorder %s3443_s9, 0  ;;  %p215_p7 = scmp.eq.s32.totalorder %s3443_s9, 15 }
  0x12   : > { %p221_p8 = scmp.eq.s32.totalorder %s3444_s10, 15  ;;  %s6579_s12 = smov (%p37_p5, %s6577_s12), 0 }
  0x13   : > { %6511 = sst [smem:[#allocation13_spill]] %s6579_s12  ;;  %p4897_p9 = por %p56_p6, %p55_p4 }
  0x14   : > { %p4901_p10 = por %p215_p7, %p49_p1  ;;  %s39_s17 = ssub.s32 %s4783_s30, %s6579_s12 }
  0x15   : > { %p4907_p11 = por %p221_p8, %p55_p4  ;;  %p40_p12 = scmp.eq.s32.totalorder %s39_s17, 0 }
  0x16   : > { %p4309_p13 = scmp.lt.s32.totalorder %s4787_s8, 16  ;;  %s253_s19 = sand.u32 1, %s4767_s26  }
  0x17   : > { %s4914_s20 = scalar_select %p40_p12, %s4767_s26, %s42_s13  }
  0x18   : > { %s3447_s21 = sshll.u32 %s253_s19, 7  ;;  %s3588_s22 = sshll.u32 %s4783_s30, 11 }
  0x19   : > { %s6515_s0 = sld [smem:[#allocation32_spill]]  ;;  %s257_s11 = scalar_lea.vmem [#allocation4], %s3447_s21 }
  0x1a   : > { %s264_s29 = sshll.u32 %s257_s11, 4  ;;  %p4922_p0 = pnand %p4309_p13, %p4889_p3  ;;  %s265_s29 = int_to_ptr.vmem [resolvable:$true] %s264_s29 }
  0x1b   : > { %p3450_p1 = scmp.ge.s32.totalorder %s4787_s8, 1  ;;  %s254_s17 = scalar_lea.sflag [#allocation5], %s253_s19 }
  0x1c   : > { %p4665_p2 = pneg %p4922_p0  ;;  %s4676_s13 = scalar_lea.vmem %s265_s29, 2048 }
  0x1d   : > { %p4677_p4 = scmp.ne.s32.totalorder %s265_s29, %s4676_s13  ;;  %s4789_s30 = smov [#allocation4]  }
  0x1e   : > { %s4681_s23 = sshll.u32 %s4789_s30, 4  ;;  %s4682_s23 = int_to_ptr.vmem [resolvable:$false] %s4681_s23 }
  0x1f   : > { %s263_s10 = scalar_lea.hbm %s6515_s0, %s3588_s22  ;;  %p4679_p5 = pnand %p4677_p4, %p4665_p2 }
  0x20   : > { %s4683_s21 = scalar_lea.vmem %s4682_s23, 4096  ;;  %p4684_p7 = scmp.lt.s32.totalorder %s265_s29, %s4682_s23 }
  0x21   : > { %p4680_p6 = pneg %p4679_p5  ;;  %p4685_p8 = scmp.lt.s32.totalorder %s4683_s21, %s4676_s13 }
  0x23   : > { %p4686_p12 = por %p4685_p8, %p4684_p7 }
  0x25   : > { %p4687_p3 = pnand %p4686_p12, %p4680_p6 }
  0x27   : > { %4690 = shalt.err (!%p4687_p3)
}
  0x28   : > { %s4790_s11 = smov 64   ;;  %s4791_s14 = smov 4  }
  0x29   : > { %4304 = dma.hbm_to_vmem [thread:$0]  (!%p4922_p0), %s263_s10, 2048, %s265_s29, %s254_s17, %s4790_s11, %s4790_s11, %s4791_s14  }
  0x2a   : > { %p288_p13 = scmp.lt.s32.totalorder %s4787_s8, 17 }
  0x2c   : > { %p289_p2 = pnand %p3450_p1, %p288_p13 }
  0x2e   : > { %292 = sbr.rel (%p289_p2) target bundleno = 2078 (0x81e), region = 48 }
  0x33   : > { %s4935_s30 = sand.u32 1, %s4763_s25  }
  0x34   : > { %s3451_s19 = sshll.u32 %s4935_s30, 7  ;;  %s295_s22 = scalar_lea.sflag [#allocation5], %s4935_s30 }
  0x35   : > { %s4939_s9 = scalar_lea.vmem [#allocation4], %s3451_s19 }
  0x36   : > { %4750 = dma.done.wait (%p4897_p9), %s295_s22, 2048  }
  0x37   : > { %4752 = vsyncadd (%p4897_p9), %s295_s22, 4294965248  ;;  %p339_p0 = scmp.lt.s32.totalorder %s4771_s27, 7  ;;  %s4957_s0 = scalar_lea.vmem [#allocation7], %s3451_s19 }
  0x38   : > { %p3457_p9 = scmp.ne.s32.totalorder %s4771_s27, 0 }
  0x39   : > { %s340_s29 = scalar_select %p339_p0, %s4771_s27, 7 }
  0x3a   : > { %353 = sbr.rel (%p3457_p9) target bundleno = 439 (0x1b7), region = 56 }
  0x3b   : > { %s3589_s12 = sshll.u32 %s340_s29, 6  ;;  %s3590_s10 = sshll.u32 %s340_s29, 3 }
  0x3c   : > { %s4950_s23 = scalar_lea.vmem %s6474_s4, %s3589_s12  ;;  %s4955_s14 = scalar_lea.vmem %s6475_s5, %s3590_s10 }
  0x3f   : > { %v4961_v0 = vld [vmem:[%s4939_s9] sm:$0xff]   ;;  %v4964_v1 = vld [vmem:[%s4939_s9 + $0x8] sm:$0xff]   ;;  %v4975_v6 = vld [vmem:[%s4939_s9 + $0x10] sm:$0xff]  }
  0x40   : > { %v3658_v2 = vunpack.c.l.bf16 %v4961_v0  ;;  %v3662_v3 = vunpack.c.l.bf16 %v4964_v1  ;;  %v3659_v4 = vunpack.c.h.bf16 %v4961_v0  ;;  %v3663_v5 = vunpack.c.h.bf16 %v4964_v1  ;;  %v4984_v9 = vld [vmem:[%s4939_s9 + $0x18] sm:$0xff]   ;;  %v4993_v12 = vld [vmem:[%s4939_s9 + $0x20] sm:$0xff]   ;;  %v5002_v15 = vld [vmem:[%s4939_s9 + $0x28] sm:$0xff]  }
  0x41   : > { %v3666_v7 = vunpack.c.l.bf16 %v4975_v6  ;;  %v3667_v8 = vunpack.c.h.bf16 %v4975_v6  ;;  %v3670_v10 = vunpack.c.l.bf16 %v4984_v9  ;;  %v3671_v11 = vunpack.c.h.bf16 %v4984_v9  ;;  %v5011_v18 = vld [vmem:[%s4939_s9 + $0x30] sm:$0xff]   ;;  %v5020_v21 = vld [vmem:[%s4939_s9 + $0x38] sm:$0xff]   ;;  %v5029_v24 = vld [vmem:[%s4939_s9 + $0x40] sm:$0xff]  }
  0x42   : > { %418 = vadd.xlane.f32.xlu0 %v3658_v2  ;;  %422 = vadd.xlane.f32.xlu1 %v3662_v3  ;;  %v3674_v13 = vunpack.c.l.bf16 %v4993_v12  ;;  %v3675_v14 = vunpack.c.h.bf16 %v4993_v12  ;;  %v3678_v16 = vunpack.c.l.bf16 %v5002_v15  ;;  %v3679_v17 = vunpack.c.h.bf16 %v5002_v15  ;;  %v5038_v27 = vld [vmem:[%s4939_s9 + $0x48] sm:$0xff]   ;;  %v5047_v30 = vld [vmem:[%s4939_s9 + $0x50] sm:$0xff]   ;;  %v5056_v33 = vld [vmem:[%s4939_s9 + $0x58] sm:$0xff]  }
  0x43   : > { %v3682_v19 = vunpack.c.l.bf16 %v5011_v18  ;;  %v3683_v20 = vunpack.c.h.bf16 %v5011_v18  ;;  %v3686_v22 = vunpack.c.l.bf16 %v5020_v21  ;;  %v3687_v23 = vunpack.c.h.bf16 %v5020_v21  ;;  %v5065_v36 = vld [vmem:[%s4939_s9 + $0x60] sm:$0xff]   ;;  %v5074_v39 = vld [vmem:[%s4939_s9 + $0x68] sm:$0xff]   ;;  %v5083_v42 = vld [vmem:[%s4939_s9 + $0x70] sm:$0xff]  }
  0x44   : > { %v3690_v25 = vunpack.c.l.bf16 %v5029_v24  ;;  %v3691_v26 = vunpack.c.h.bf16 %v5029_v24  ;;  %v3694_v28 = vunpack.c.l.bf16 %v5038_v27  ;;  %v3695_v29 = vunpack.c.h.bf16 %v5038_v27  ;;  %v5092_v45 = vld [vmem:[%s4939_s9 + $0x78] sm:$0xff]  }
  0x45   : > { %v3698_v31 = vunpack.c.l.bf16 %v5047_v30  ;;  %v3699_v32 = vunpack.c.h.bf16 %v5047_v30  ;;  %v3702_v34 = vunpack.c.l.bf16 %v5056_v33  ;;  %v3703_v35 = vunpack.c.h.bf16 %v5056_v33 }
  0x46   : > { %420 = vadd.xlane.f32.xlu0 %v3659_v4  ;;  %424 = vadd.xlane.f32.xlu1 %v3663_v5  ;;  %v3706_v37 = vunpack.c.l.bf16 %v5065_v36  ;;  %v3707_v38 = vunpack.c.h.bf16 %v5065_v36  ;;  %v3710_v40 = vunpack.c.l.bf16 %v5074_v39  ;;  %v3711_v41 = vunpack.c.h.bf16 %v5074_v39 }
  0x47   : > { %v3714_v43 = vunpack.c.l.bf16 %v5083_v42  ;;  %v3715_v44 = vunpack.c.h.bf16 %v5083_v42  ;;  %v3718_v46 = vunpack.c.l.bf16 %v5092_v45  ;;  %v3719_v47 = vunpack.c.h.bf16 %v5092_v45 }
  0x4a   : > { %426 = vadd.xlane.f32.xlu0 %v3666_v7  ;;  %428 = vadd.xlane.f32.xlu1 %v3667_v8 }
  0x4e   : > { %430 = vadd.xlane.f32.xlu0 %v3670_v10  ;;  %432 = vadd.xlane.f32.xlu1 %v3671_v11 }
  0x52   : > { %434 = vadd.xlane.f32.xlu0 %v3674_v13  ;;  %436 = vadd.xlane.f32.xlu1 %v3675_v14 }
  0x56   : > { %438 = vadd.xlane.f32.xlu0 %v3678_v16  ;;  %440 = vadd.xlane.f32.xlu1 %v3679_v17 }
  0x5a   : > { %442 = vadd.xlane.f32.xlu0 %v3682_v19  ;;  %444 = vadd.xlane.f32.xlu1 %v3683_v20 }
  0x5e   : > { %446 = vadd.xlane.f32.xlu0 %v3686_v22  ;;  %448 = vadd.xlane.f32.xlu1 %v3687_v23 }
  0x62   : > { %450 = vadd.xlane.f32.xlu0 %v3690_v25  ;;  %452 = vadd.xlane.f32.xlu1 %v3691_v26 }
  0x66   : > { %454 = vadd.xlane.f32.xlu0 %v3694_v28  ;;  %456 = vadd.xlane.f32.xlu1 %v3695_v29 }
  0x6a   : > { %458 = vadd.xlane.f32.xlu0 %v3698_v31  ;;  %460 = vadd.xlane.f32.xlu1 %v3699_v32 }
  0x6e   : > { %462 = vadd.xlane.f32.xlu0 %v3702_v34  ;;  %464 = vadd.xlane.f32.xlu1 %v3703_v35 }
  0x72   : > { %466 = vadd.xlane.f32.xlu0 %v3706_v37  ;;  %468 = vadd.xlane.f32.xlu1 %v3707_v38 }
  0x76   : > { %470 = vadd.xlane.f32.xlu0 %v3710_v40  ;;  %472 = vadd.xlane.f32.xlu1 %v3711_v41 }
  0x7a   : > { %474 = vadd.xlane.f32.xlu0 %v3714_v43  ;;  %476 = vadd.xlane.f32.xlu1 %v3715_v44 }
  0x7e   : > { %478 = vadd.xlane.f32.xlu0 %v3718_v46  ;;  %480 = vadd.xlane.f32.xlu1 %v3719_v47 }
  0xcb   : > { %v419_v48 = vpop.xlane.xlu0 %418  ;;  %v423_v49 = vpop.xlane.xlu1 %422 }
  0xcc   : > { %v483_v50 = vmul.f32 0.0078125, %v419_v48  ;;  %v485_v51 = vmul.f32 0.0078125, %v423_v49 }
  0xce   : > { %v5106_v52 = vsub.f32 %v3658_v2, %v483_v50  ;;  %v5110_v53 = vsub.f32 %v3662_v3, %v485_v51 }
  0xcf   : > { %v421_v54 = vpop.xlane.xlu0 %420  ;;  %v425_v55 = vpop.xlane.xlu1 %424 }
  0xd0   : > { %v484_v56 = vmul.f32 0.0078125, %v421_v54  ;;  %v547_v57 = vmul.f32 %v5106_v52, %v5106_v52  ;;  %v486_v58 = vmul.f32 0.0078125, %v425_v55  ;;  %v549_v61 = vmul.f32 %v5110_v53, %v5110_v53 }
  0xd2   : > { %v5116_v59 = vsub.f32 %v3659_v4, %v484_v56  ;;  %579 = vadd.xlane.f32.xlu0 %v547_v57  ;;  %v5120_v60 = vsub.f32 %v3663_v5, %v486_v58 }
  0xd3   : > { %v427_v62 = vpop.xlane.xlu0 %426  ;;  %v429_v63 = vpop.xlane.xlu1 %428 }
  0xd4   : > { %v487_v2 = vmul.f32 0.0078125, %v427_v62  ;;  %v548_v3 = vmul.f32 %v5116_v59, %v5116_v59  ;;  %v488_v48 = vmul.f32 0.0078125, %v429_v63  ;;  %v550_v4 = vmul.f32 %v5120_v60, %v5120_v60 }
  0xd6   : > { %v5128_v0 = vsub.f32 %v3666_v7, %v487_v2  ;;  %583 = vadd.xlane.f32.xlu0 %v549_v61  ;;  %581 = vadd.xlane.f32.xlu1 %v548_v3  ;;  %v5132_v1 = vsub.f32 %v3667_v8, %v488_v48 }
  0xd7   : > { %v431_v5 = vpop.xlane.xlu0 %430  ;;  %v433_v49 = vpop.xlane.xlu1 %432 }
  0xd8   : > { %v489_v50 = vmul.f32 0.0078125, %v431_v5  ;;  %v551_v51 = vmul.f32 %v5128_v0, %v5128_v0  ;;  %v490_v54 = vmul.f32 0.0078125, %v433_v49  ;;  %v552_v8 = vmul.f32 %v5132_v1, %v5132_v1 }
  0xda   : > { %v5140_v7 = vsub.f32 %v3670_v10, %v489_v50  ;;  %585 = vadd.xlane.f32.xlu1 %v550_v4  ;;  %587 = vadd.xlane.f32.xlu0 %v551_v51  ;;  %v5144_v6 = vsub.f32 %v3671_v11, %v490_v54 }
  0xdb   : > { %v435_v55 = vpop.xlane.xlu0 %434  ;;  %v437_v56 = vpop.xlane.xlu1 %436 }
  0xdc   : > { %v491_v57 = vmul.f32 0.0078125, %v435_v55  ;;  %v553_v58 = vmul.f32 %v5140_v7, %v5140_v7  ;;  %v492_v61 = vmul.f32 0.0078125, %v437_v56  ;;  %v554_v11 = vmul.f32 %v5144_v6, %v5144_v6 }
  0xde   : > { %v5152_v10 = vsub.f32 %v3674_v13, %v491_v57  ;;  %589 = vadd.xlane.f32.xlu1 %v552_v8  ;;  %591 = vadd.xlane.f32.xlu0 %v553_v58  ;;  %v5156_v9 = vsub.f32 %v3675_v14, %v492_v61 }
  0xdf   : > { %v439_v62 = vpop.xlane.xlu0 %438  ;;  %v441_v63 = vpop.xlane.xlu1 %440 }
  0xe0   : > { %v493_v2 = vmul.f32 0.0078125, %v439_v62  ;;  %v555_v3 = vmul.f32 %v5152_v10, %v5152_v10  ;;  %v494_v48 = vmul.f32 0.0078125, %v441_v63  ;;  %v556_v14 = vmul.f32 %v5156_v9, %v5156_v9 }
  0xe2   : > { %v5164_v13 = vsub.f32 %v3678_v16, %v493_v2  ;;  %593 = vadd.xlane.f32.xlu1 %v554_v11  ;;  %595 = vadd.xlane.f32.xlu0 %v555_v3  ;;  %v5168_v12 = vsub.f32 %v3679_v17, %v494_v48 }
  0xe3   : > { %v443_v4 = vpop.xlane.xlu0 %442  ;;  %v445_v5 = vpop.xlane.xlu1 %444 }
  0xe4   : > { %v495_v49 = vmul.f32 0.0078125, %v443_v4  ;;  %v557_v50 = vmul.f32 %v5164_v13, %v5164_v13  ;;  %v496_v51 = vmul.f32 0.0078125, %v445_v5  ;;  %v558_v17 = vmul.f32 %v5168_v12, %v5168_v12 }
  0xe6   : > { %v5176_v16 = vsub.f32 %v3682_v19, %v495_v49  ;;  %597 = vadd.xlane.f32.xlu1 %v556_v14  ;;  %599 = vadd.xlane.f32.xlu0 %v557_v50  ;;  %v5180_v15 = vsub.f32 %v3683_v20, %v496_v51 }
  0xe7   : > { %v447_v54 = vpop.xlane.xlu0 %446  ;;  %v449_v8 = vpop.xlane.xlu1 %448 }
  0xe8   : > { %v497_v55 = vmul.f32 0.0078125, %v447_v54  ;;  %v559_v56 = vmul.f32 %v5176_v16, %v5176_v16  ;;  %v498_v57 = vmul.f32 0.0078125, %v449_v8  ;;  %v560_v20 = vmul.f32 %v5180_v15, %v5180_v15 }
  0xea   : > { %v5188_v19 = vsub.f32 %v3686_v22, %v497_v55  ;;  %601 = vadd.xlane.f32.xlu1 %v558_v17  ;;  %603 = vadd.xlane.f32.xlu0 %v559_v56  ;;  %v5192_v18 = vsub.f32 %v3687_v23, %v498_v57 }
  0xeb   : > { %v451_v58 = vpop.xlane.xlu0 %450  ;;  %v453_v61 = vpop.xlane.xlu1 %452 }
  0xec   : > { %v499_v11 = vmul.f32 0.0078125, %v451_v58  ;;  %v561_v62 = vmul.f32 %v5188_v19, %v5188_v19  ;;  %v500_v63 = vmul.f32 0.0078125, %v453_v61  ;;  %v562_v23 = vmul.f32 %v5192_v18, %v5192_v18 }
  0xee   : > { %v5200_v22 = vsub.f32 %v3690_v25, %v499_v11  ;;  %605 = vadd.xlane.f32.xlu1 %v560_v20  ;;  %607 = vadd.xlane.f32.xlu0 %v561_v62  ;;  %v5204_v21 = vsub.f32 %v3691_v26, %v500_v63 }
  0xef   : > { %v455_v2 = vpop.xlane.xlu0 %454  ;;  %v457_v3 = vpop.xlane.xlu1 %456 }
  0xf0   : > { %v501_v48 = vmul.f32 0.0078125, %v455_v2  ;;  %v563_v14 = vmul.f32 %v5200_v22, %v5200_v22  ;;  %v502_v4 = vmul.f32 0.0078125, %v457_v3  ;;  %v564_v26 = vmul.f32 %v5204_v21, %v5204_v21 }
  0xf2   : > { %v5212_v25 = vsub.f32 %v3694_v28, %v501_v48  ;;  %609 = vadd.xlane.f32.xlu1 %v562_v23  ;;  %611 = vadd.xlane.f32.xlu0 %v563_v14  ;;  %v5216_v24 = vsub.f32 %v3695_v29, %v502_v4 }
  0xf3   : > { %v459_v5 = vpop.xlane.xlu0 %458  ;;  %v461_v49 = vpop.xlane.xlu1 %460 }
  0xf4   : > { %v503_v50 = vmul.f32 0.0078125, %v459_v5  ;;  %v565_v51 = vmul.f32 %v5212_v25, %v5212_v25  ;;  %v504_v17 = vmul.f32 0.0078125, %v461_v49  ;;  %v566_v29 = vmul.f32 %v5216_v24, %v5216_v24 }
  0xf6   : > { %v5224_v28 = vsub.f32 %v3698_v31, %v503_v50  ;;  %613 = vadd.xlane.f32.xlu1 %v564_v26  ;;  %615 = vadd.xlane.f32.xlu0 %v565_v51  ;;  %v5228_v27 = vsub.f32 %v3699_v32, %v504_v17 }
  0xf7   : > { %v463_v54 = vpop.xlane.xlu0 %462  ;;  %v465_v8 = vpop.xlane.xlu1 %464 }
  0xf8   : > { %v505_v55 = vmul.f32 0.0078125, %v463_v54  ;;  %v567_v56 = vmul.f32 %v5224_v28, %v5224_v28  ;;  %v506_v57 = vmul.f32 0.0078125, %v465_v8  ;;  %v568_v32 = vmul.f32 %v5228_v27, %v5228_v27 }
  0xfa   : > { %v5236_v31 = vsub.f32 %v3702_v34, %v505_v55  ;;  %617 = vadd.xlane.f32.xlu1 %v566_v29  ;;  %619 = vadd.xlane.f32.xlu0 %v567_v56  ;;  %v5240_v30 = vsub.f32 %v3703_v35, %v506_v57 }
  0xfb   : > { %v467_v20 = vpop.xlane.xlu0 %466  ;;  %v469_v58 = vpop.xlane.xlu1 %468 }
  0xfc   : > { %v507_v61 = vmul.f32 0.0078125, %v467_v20  ;;  %v569_v11 = vmul.f32 %v5236_v31, %v5236_v31  ;;  %v508_v62 = vmul.f32 0.0078125, %v469_v58  ;;  %v570_v35 = vmul.f32 %v5240_v30, %v5240_v30 }
  0xfe   : > { %v5248_v34 = vsub.f32 %v3706_v37, %v507_v61  ;;  %621 = vadd.xlane.f32.xlu1 %v568_v32  ;;  %623 = vadd.xlane.f32.xlu0 %v569_v11  ;;  %v5252_v33 = vsub.f32 %v3707_v38, %v508_v62 }
  0xff   : > { %v471_v63 = vpop.xlane.xlu0 %470  ;;  %v473_v23 = vpop.xlane.xlu1 %472 }
 0x100   : > { %v509_v2 = vmul.f32 0.0078125, %v471_v63  ;;  %v571_v3 = vmul.f32 %v5248_v34, %v5248_v34  ;;  %v510_v48 = vmul.f32 0.0078125, %v473_v23  ;;  %v572_v38 = vmul.f32 %v5252_v33, %v5252_v33 }
 0x102   : > { %v5260_v37 = vsub.f32 %v3710_v40, %v509_v2  ;;  %625 = vadd.xlane.f32.xlu1 %v570_v35  ;;  %627 = vadd.xlane.f32.xlu0 %v571_v3  ;;  %v5264_v36 = vsub.f32 %v3711_v41, %v510_v48 }
 0x103   : > { %v475_v14 = vpop.xlane.xlu0 %474  ;;  %v477_v4 = vpop.xlane.xlu1 %476 }
 0x104   : > { %v511_v26 = vmul.f32 0.0078125, %v475_v14  ;;  %v573_v5 = vmul.f32 %v5260_v37, %v5260_v37  ;;  %v512_v49 = vmul.f32 0.0078125, %v477_v4  ;;  %v574_v41 = vmul.f32 %v5264_v36, %v5264_v36 }
 0x106   : > { %v5272_v40 = vsub.f32 %v3714_v43, %v511_v26  ;;  %629 = vadd.xlane.f32.xlu1 %v572_v38  ;;  %631 = vadd.xlane.f32.xlu0 %v573_v5  ;;  %v5276_v39 = vsub.f32 %v3715_v44, %v512_v49 }
 0x107   : > { %v479_v50 = vpop.xlane.xlu0 %478  ;;  %v481_v51 = vpop.xlane.xlu1 %480 }
 0x108   : > { %v513_v17 = vmul.f32 0.0078125, %v479_v50  ;;  %v575_v29 = vmul.f32 %v5272_v40, %v5272_v40  ;;  %v514_v54 = vmul.f32 0.0078125, %v481_v51  ;;  %v576_v44 = vmul.f32 %v5276_v39, %v5276_v39 }
 0x10a   : > { %v5284_v43 = vsub.f32 %v3718_v46, %v513_v17  ;;  %633 = vadd.xlane.f32.xlu1 %v574_v41  ;;  %635 = vadd.xlane.f32.xlu0 %v575_v29  ;;  %v5288_v42 = vsub.f32 %v3719_v47, %v514_v54  ;;  %v4792_v46 = vmov 0.0   ;;  %v5299_v29 = vld [vmem:[%s6471_s1] ss:$0 sm:$0xff] }
 0x10b   : > { %1009 = vst [vmem:[#allocation2 + $0xb0] sm:$0xff] %v4792_v46  ;;  %1010 = vst [vmem:[#allocation2] sm:$0xff] %v4792_v46 }
 0x10c   : > { %v577_v8 = vmul.f32 %v5284_v43, %v5284_v43  ;;  %v578_v55 = vmul.f32 %v5288_v42, %v5288_v42  ;;  %1011 = vst [vmem:[#allocation2 + $0xd8] sm:$0xff] %v4792_v46  ;;  %1012 = vst [vmem:[#allocation2 + $0x18] sm:$0xff] %v4792_v46 }
 0x10d   : > { %1013 = vst [vmem:[#allocation2 + $0x50] sm:$0xff] %v4792_v46  ;;  %1014 = vst [vmem:[#allocation2 + $0x68] sm:$0xff] %v4792_v46 }
 0x10e   : > { %637 = vadd.xlane.f32.xlu1 %v576_v44  ;;  %639 = vadd.xlane.f32.xlu0 %v577_v8  ;;  %1015 = vst [vmem:[#allocation2 + $0x30] sm:$0xff] %v4792_v46  ;;  %1016 = vst [vmem:[#allocation2 + $0x48] sm:$0xff] %v4792_v46 }
 0x10f   : > { %1017 = vst [vmem:[#allocation2 + $0x80] sm:$0xff] %v4792_v46  ;;  %1018 = vst [vmem:[#allocation2 + $0x88] sm:$0xff] %v4792_v46 }
 0x110   : > { %1019 = vst [vmem:[#allocation2 + $0xe8] sm:$0xff] %v4792_v46  ;;  %1020 = vst [vmem:[#allocation2 + $0xb8] sm:$0xff] %v4792_v46 }
 0x111   : > { %1021 = vst [vmem:[#allocation2 + $0x60] sm:$0xff] %v4792_v46  ;;  %1022 = vst [vmem:[#allocation2 + $0xf0] sm:$0xff] %v4792_v46 }
 0x112   : > { %641 = vadd.xlane.f32.xlu1 %v578_v55  ;;  %1023 = vst [vmem:[#allocation2 + $0x8] sm:$0xff] %v4792_v46  ;;  %1024 = vst [vmem:[#allocation2 + $0x78] sm:$0xff] %v4792_v46 }
 0x113   : > { %1025 = vst [vmem:[#allocation2 + $0x38] sm:$0xff] %v4792_v46  ;;  %1026 = vst [vmem:[#allocation2 + $0x58] sm:$0xff] %v4792_v46 }
 0x114   : > { %1027 = vst [vmem:[#allocation2 + $0x40] sm:$0xff] %v4792_v46  ;;  %1028 = vst [vmem:[#allocation2 + $0xc8] sm:$0xff] %v4792_v46 }
 0x115   : > { %1029 = vst [vmem:[#allocation2 + $0xe0] sm:$0xff] %v4792_v46  ;;  %1030 = vst [vmem:[#allocation2 + $0x90] sm:$0xff] %v4792_v46 }
 0x116   : > { %1031 = vst [vmem:[#allocation2 + $0x70] sm:$0xff] %v4792_v46  ;;  %1032 = vst [vmem:[#allocation2 + $0xc0] sm:$0xff] %v4792_v46 }
 0x117   : > { %1033 = vst [vmem:[#allocation2 + $0xa8] sm:$0xff] %v4792_v46  ;;  %1034 = vst [vmem:[#allocation2 + $0xd0] sm:$0xff] %v4792_v46 }
 0x118   : > { %1035 = vst [vmem:[#allocation2 + $0x10] sm:$0xff] %v4792_v46  ;;  %1036 = vst [vmem:[#allocation2 + $0x28] sm:$0xff] %v4792_v46 }
 0x119   : > { %1037 = vst [vmem:[#allocation2 + $0xa0] sm:$0xff] %v4792_v46  ;;  %1038 = vst [vmem:[#allocation2 + $0xf8] sm:$0xff] %v4792_v46 }
 0x11a   : > { %1039 = vst [vmem:[#allocation2 + $0x20] sm:$0xff] %v4792_v46  ;;  %1040 = vst [vmem:[#allocation2 + $0x98] sm:$0xff] %v4792_v46 }
 0x15b   : > { %v580_v45 = vpop.xlane.xlu0 %579 }
 0x15c   : > { %v643_v47 = vmul.f32 0.0078125, %v580_v45 }
 0x15e   : > { %v675_v56 = vadd.f32 1e-05, %v643_v47 }
 0x15f   : > { %v582_v57 = vpop.xlane.xlu1 %581  ;;  %v584_v32 = vpop.xlane.xlu0 %583 }
 0x160   : > { %4382 = vrsqrt.f32 %v675_v56  ;;  %v644_v20 = vmul.f32 0.0078125, %v582_v57  ;;  %v645_v58 = vmul.f32 0.0078125, %v584_v32 }
 0x162   : > { %v676_v61 = vadd.f32 1e-05, %v644_v20  ;;  %v677_v11 = vadd.f32 1e-05, %v645_v58  ;;  %v5306_v20 = vld [vmem:[%s6472_s2] ss:$0 sm:$0xff] }
 0x163   : > { %v586_v62 = vpop.xlane.xlu1 %585  ;;  %v588_v35 = vpop.xlane.xlu0 %587 }
 0x164   : > { %4384 = vrsqrt.f32 %v676_v61  ;;  %v646_v63 = vmul.f32 0.0078125, %v586_v62  ;;  %v647_v23 = vmul.f32 0.0078125, %v588_v35 }
 0x165   : > { %4386 = vrsqrt.f32 %v677_v11 }
 0x166   : > { %v678_v2 = vadd.f32 1e-05, %v646_v63  ;;  %v679_v3 = vadd.f32 1e-05, %v647_v23 }
 0x167   : > { %v590_v48 = vpop.xlane.xlu1 %589  ;;  %v592_v38 = vpop.xlane.xlu0 %591 }
 0x168   : > { %4388 = vrsqrt.f32 %v678_v2  ;;  %v648_v14 = vmul.f32 0.0078125, %v590_v48  ;;  %v649_v4 = vmul.f32 0.0078125, %v592_v38 }
 0x169   : > { %4390 = vrsqrt.f32 %v679_v3 }
 0x16a   : > { %v680_v26 = vadd.f32 1e-05, %v648_v14  ;;  %v681_v5 = vadd.f32 1e-05, %v649_v4 }
 0x16b   : > { %v594_v49 = vpop.xlane.xlu1 %593  ;;  %v596_v41 = vpop.xlane.xlu0 %595 }
 0x16c   : > { %4392 = vrsqrt.f32 %v680_v26  ;;  %v650_v50 = vmul.f32 0.0078125, %v594_v49  ;;  %v651_v51 = vmul.f32 0.0078125, %v596_v41 }
 0x16d   : > { %v4383_v17 = vpop.eup %4382  ;;  %4394 = vrsqrt.f32 %v681_v5 }
 0x16e   : > { %v739_v54 = vmul.f32 %v4383_v17, %v5106_v52  ;;  %v682_v44 = vadd.f32 1e-05, %v650_v50  ;;  %v683_v8 = vadd.f32 1e-05, %v651_v51 }
 0x16f   : > { %v598_v55 = vpop.xlane.xlu1 %597  ;;  %v600_v46 = vpop.xlane.xlu0 %599 }
 0x170   : > { %4396 = vrsqrt.f32 %v682_v44  ;;  %v652_v45 = vmul.f32 0.0078125, %v598_v55  ;;  %v653_v47 = vmul.f32 0.0078125, %v600_v46  ;;  %v778_v57 = vmul.f32 %v5299_v29, %v739_v54 }
 0x171   : > { %v4385_v56 = vpop.eup %4384  ;;  %4398 = vrsqrt.f32 %v683_v8 }
 0x172   : > { %v4387_v32 = vpop.eup %4386  ;;  %v740_v58 = vmul.f32 %v4385_v56, %v5116_v59  ;;  %v684_v52 = vadd.f32 1e-05, %v652_v45  ;;  %v685_v61 = vadd.f32 1e-05, %v653_v47  ;;  %v817_v48 = vadd.f32 %v5306_v20, %v778_v57 }
 0x173   : > { %v741_v11 = vmul.f32 %v4387_v32, %v5110_v53  ;;  %v602_v62 = vpop.xlane.xlu1 %601  ;;  %v604_v35 = vpop.xlane.xlu0 %603 }
 0x174   : > { %v779_v63 = vmul.f32 %v5299_v29, %v740_v58  ;;  %4400 = vrsqrt.f32 %v684_v52  ;;  %v654_v23 = vmul.f32 0.0078125, %v602_v62  ;;  %v655_v2 = vmul.f32 0.0078125, %v604_v35 }
 0x175   : > { %v4389_v3 = vpop.eup %4388  ;;  %v780_v38 = vmul.f32 %v5299_v29, %v741_v11  ;;  %4402 = vrsqrt.f32 %v685_v61 }
 0x176   : > { %v4391_v14 = vpop.eup %4390  ;;  %v818_v59 = vadd.f32 %v5306_v20, %v779_v63  ;;  %v742_v4 = vmul.f32 %v4389_v3, %v5120_v60  ;;  %v686_v26 = vadd.f32 1e-05, %v654_v23  ;;  %v687_v53 = vadd.f32 1e-05, %v655_v2 }
 0x177   : > { %v743_v5 = vmul.f32 %v4391_v14, %v5128_v0  ;;  %v606_v49 = vpop.xlane.xlu1 %605  ;;  %v608_v41 = vpop.xlane.xlu0 %607  ;;  %v819_v60 = vadd.f32 %v5306_v20, %v780_v38 }
 0x178   : > { %v3723_v50 = vpack.c.bf16 %v818_v59, %v817_v48  ;;  %v781_v51 = vmul.f32 %v5299_v29, %v742_v4  ;;  %4404 = vrsqrt.f32 %v686_v26  ;;  %v656_v17 = vmul.f32 0.0078125, %v606_v49 }
 0x179   : > { %v4393_v54 = vpop.eup %4392  ;;  %v782_v44 = vmul.f32 %v5299_v29, %v743_v5  ;;  %4406 = vrsqrt.f32 %v687_v53  ;;  %v657_v8 = vmul.f32 0.0078125, %v608_v41 }
 0x17a   : > { %v4395_v55 = vpop.eup %4394  ;;  %3724 = vst [vmem:[#allocation3] sm:$0xff] %v3723_v50   ;;  %v820_v46 = vadd.f32 %v5306_v20, %v781_v51  ;;  %v744_v0 = vmul.f32 %v4393_v54, %v5132_v1  ;;  %v688_v45 = vadd.f32 1e-05, %v656_v17 }
 0x17b   : > { %v745_v47 = vmul.f32 %v4395_v55, %v5140_v7  ;;  %v689_v56 = vadd.f32 1e-05, %v657_v8  ;;  %v610_v57 = vpop.xlane.xlu1 %609  ;;  %v612_v32 = vpop.xlane.xlu0 %611  ;;  %v821_v62 = vadd.f32 %v5306_v20, %v782_v44 }
 0x17c   : > { %v3728_v58 = vpack.c.bf16 %v820_v46, %v819_v60  ;;  %v783_v52 = vmul.f32 %v5299_v29, %v744_v0  ;;  %4408 = vrsqrt.f32 %v688_v45  ;;  %v658_v61 = vmul.f32 0.0078125, %v610_v57 }
 0x17d   : > { %v4397_v11 = vpop.eup %4396  ;;  %4410 = vrsqrt.f32 %v689_v56  ;;  %v659_v35 = vmul.f32 0.0078125, %v612_v32  ;;  %v784_v23 = vmul.f32 %v5299_v29, %v745_v47 }
 0x17e   : > { %v4399_v63 = vpop.eup %4398  ;;  %3959 = vst [vmem:[#allocation3 + $0x8] sm:$0xff] %v3728_v58   ;;  %v822_v1 = vadd.f32 %v5306_v20, %v783_v52  ;;  %v746_v7 = vmul.f32 %v4397_v11, %v5144_v6  ;;  %v690_v2 = vadd.f32 1e-05, %v658_v61 }
 0x17f   : > { %v747_v3 = vmul.f32 %v4399_v63, %v5152_v10  ;;  %v691_v48 = vadd.f32 1e-05, %v659_v35  ;;  %v614_v38 = vpop.xlane.xlu1 %613  ;;  %v616_v14 = vpop.xlane.xlu0 %615  ;;  %v823_v6 = vadd.f32 %v5306_v20, %v784_v23 }
 0x180   : > { %v3733_v59 = vpack.c.bf16 %v822_v1, %v821_v62  ;;  %v785_v4 = vmul.f32 %v5299_v29, %v746_v7  ;;  %4412 = vrsqrt.f32 %v690_v2  ;;  %v660_v26 = vmul.f32 0.0078125, %v614_v38 }
 0x181   : > { %v4401_v53 = vpop.eup %4400  ;;  %v786_v5 = vmul.f32 %v5299_v29, %v747_v3  ;;  %4414 = vrsqrt.f32 %v691_v48  ;;  %v661_v49 = vmul.f32 0.0078125, %v616_v14 }
 0x182   : > { %v4403_v41 = vpop.eup %4402  ;;  %3960 = vst [vmem:[#allocation3 + $0x10] sm:$0xff] %v3733_v59   ;;  %v824_v50 = vadd.f32 %v5306_v20, %v785_v4  ;;  %v748_v10 = vmul.f32 %v4401_v53, %v5156_v9  ;;  %v692_v51 = vadd.f32 1e-05, %v660_v26 }
 0x183   : > { %v749_v17 = vmul.f32 %v4403_v41, %v5164_v13  ;;  %v693_v54 = vadd.f32 1e-05, %v661_v49  ;;  %v618_v44 = vpop.xlane.xlu1 %617  ;;  %v620_v8 = vpop.xlane.xlu0 %619  ;;  %v825_v45 = vadd.f32 %v5306_v20, %v786_v5 }
 0x184   : > { %v3738_v55 = vpack.c.bf16 %v824_v50, %v823_v6  ;;  %v787_v60 = vmul.f32 %v5299_v29, %v748_v10  ;;  %4416 = vrsqrt.f32 %v692_v51  ;;  %v662_v46 = vmul.f32 0.0078125, %v618_v44 }
 0x185   : > { %v4405_v0 = vpop.eup %4404  ;;  %4418 = vrsqrt.f32 %v693_v54  ;;  %v663_v47 = vmul.f32 0.0078125, %v620_v8  ;;  %v788_v57 = vmul.f32 %v5299_v29, %v749_v17 }
 0x186   : > { %v4407_v56 = vpop.eup %4406  ;;  %3961 = vst [vmem:[#allocation3 + $0x18] sm:$0xff] %v3738_v55   ;;  %v826_v9 = vadd.f32 %v5306_v20, %v787_v60  ;;  %v750_v13 = vmul.f32 %v4405_v0, %v5168_v12  ;;  %v694_v32 = vadd.f32 1e-05, %v662_v46 }
 0x187   : > { %v751_v58 = vmul.f32 %v4407_v56, %v5176_v16  ;;  %v695_v52 = vadd.f32 1e-05, %v663_v47  ;;  %v622_v61 = vpop.xlane.xlu1 %621  ;;  %v624_v11 = vpop.xlane.xlu0 %623  ;;  %v827_v12 = vadd.f32 %v5306_v20, %v788_v57 }
 0x188   : > { %v3743_v62 = vpack.c.bf16 %v826_v9, %v825_v45  ;;  %v789_v35 = vmul.f32 %v5299_v29, %v750_v13  ;;  %4420 = vrsqrt.f32 %v694_v32  ;;  %v664_v63 = vmul.f32 0.0078125, %v622_v61 }
 0x189   : > { %v4409_v1 = vpop.eup %4408  ;;  %v790_v23 = vmul.f32 %v5299_v29, %v751_v58  ;;  %4422 = vrsqrt.f32 %v695_v52  ;;  %v665_v7 = vmul.f32 0.0078125, %v624_v11 }
 0x18a   : > { %v4411_v2 = vpop.eup %4410  ;;  %3962 = vst [vmem:[#allocation3 + $0x20] sm:$0xff] %v3743_v62   ;;  %v828_v3 = vadd.f32 %v5306_v20, %v789_v35  ;;  %v752_v16 = vmul.f32 %v4409_v1, %v5180_v15  ;;  %v696_v48 = vadd.f32 1e-05, %v664_v63 }
 0x18b   : > { %v753_v38 = vmul.f32 %v4411_v2, %v5188_v19  ;;  %v697_v14 = vadd.f32 1e-05, %v665_v7  ;;  %v626_v59 = vpop.xlane.xlu1 %625  ;;  %v628_v4 = vpop.xlane.xlu0 %627  ;;  %v829_v41 = vadd.f32 %v5306_v20, %v790_v23 }
 0x18c   : > { %v3748_v26 = vpack.c.bf16 %v828_v3, %v827_v12  ;;  %v791_v53 = vmul.f32 %v5299_v29, %v752_v16  ;;  %4424 = vrsqrt.f32 %v696_v48  ;;  %v666_v5 = vmul.f32 0.0078125, %v626_v59 }
 0x18d   : > { %v4413_v49 = vpop.eup %4412  ;;  %4426 = vrsqrt.f32 %v697_v14  ;;  %v667_v6 = vmul.f32 0.0078125, %v628_v4  ;;  %v792_v10 = vmul.f32 %v5299_v29, %v753_v38 }
 0x18e   : > { %v4415_v50 = vpop.eup %4414  ;;  %3963 = vst [vmem:[#allocation3 + $0x28] sm:$0xff] %v3748_v26   ;;  %v830_v15 = vadd.f32 %v5306_v20, %v791_v53  ;;  %v754_v19 = vmul.f32 %v4413_v49, %v5192_v18  ;;  %v698_v51 = vadd.f32 1e-05, %v666_v5 }
 0x18f   : > { %v755_v17 = vmul.f32 %v4415_v50, %v5200_v22  ;;  %v699_v54 = vadd.f32 1e-05, %v667_v6  ;;  %v630_v44 = vpop.xlane.xlu1 %629  ;;  %v632_v8 = vpop.xlane.xlu0 %631  ;;  %v831_v18 = vadd.f32 %v5306_v20, %v792_v10 }
 0x190   : > { %v3753_v55 = vpack.c.bf16 %v830_v15, %v829_v41  ;;  %v793_v60 = vmul.f32 %v5299_v29, %v754_v19  ;;  %4428 = vrsqrt.f32 %v698_v51  ;;  %v668_v46 = vmul.f32 0.0078125, %v630_v44 }
 0x191   : > { %v4417_v0 = vpop.eup %4416  ;;  %v794_v45 = vmul.f32 %v5299_v29, %v755_v17  ;;  %4430 = vrsqrt.f32 %v699_v54  ;;  %v669_v47 = vmul.f32 0.0078125, %v632_v8 }
 0x192   : > { %v4419_v56 = vpop.eup %4418  ;;  %3964 = vst [vmem:[#allocation3 + $0x30] sm:$0xff] %v3753_v55   ;;  %v832_v9 = vadd.f32 %v5306_v20, %v793_v60  ;;  %v756_v22 = vmul.f32 %v4417_v0, %v5204_v21  ;;  %v700_v57 = vadd.f32 1e-05, %v668_v46 }
 0x193   : > { %v757_v13 = vmul.f32 %v4419_v56, %v5212_v25  ;;  %v701_v32 = vadd.f32 1e-05, %v669_v47  ;;  %v634_v58 = vpop.xlane.xlu1 %633  ;;  %v636_v52 = vpop.xlane.xlu0 %635  ;;  %v833_v63 = vadd.f32 %v5306_v20, %v794_v45 }
 0x194   : > { %v3758_v61 = vpack.c.bf16 %v832_v9, %v831_v18  ;;  %v795_v11 = vmul.f32 %v5299_v29, %v756_v22  ;;  %4432 = vrsqrt.f32 %v700_v57  ;;  %v670_v62 = vmul.f32 0.0078125, %v634_v58 }
 0x195   : > { %v4421_v35 = vpop.eup %4420  ;;  %4434 = vrsqrt.f32 %v701_v32  ;;  %v671_v1 = vmul.f32 0.0078125, %v636_v52  ;;  %v796_v7 = vmul.f32 %v5299_v29, %v757_v13 }
 0x196   : > { %v4423_v23 = vpop.eup %4422  ;;  %3965 = vst [vmem:[#allocation3 + $0x38] sm:$0xff] %v3758_v61   ;;  %v834_v21 = vadd.f32 %v5306_v20, %v795_v11  ;;  %v758_v25 = vmul.f32 %v4421_v35, %v5216_v24  ;;  %v702_v2 = vadd.f32 1e-05, %v670_v62 }
 0x197   : > { %v759_v12 = vmul.f32 %v4423_v23, %v5224_v28  ;;  %v703_v3 = vadd.f32 1e-05, %v671_v1  ;;  %v638_v16 = vpop.xlane.xlu1 %637  ;;  %v640_v48 = vpop.xlane.xlu0 %639  ;;  %v835_v24 = vadd.f32 %v5306_v20, %v796_v7 }
 0x198   : > { %v3763_v38 = vpack.c.bf16 %v834_v21, %v833_v63  ;;  %v797_v14 = vmul.f32 %v5299_v29, %v758_v25  ;;  %4436 = vrsqrt.f32 %v702_v2  ;;  %v672_v59 = vmul.f32 0.0078125, %v638_v16 }
 0x199   : > { %v4425_v4 = vpop.eup %4424  ;;  %v798_v26 = vmul.f32 %v5299_v29, %v759_v12  ;;  %4438 = vrsqrt.f32 %v703_v3  ;;  %v673_v53 = vmul.f32 0.0078125, %v640_v48 }
 0x19a   : > { %v4427_v5 = vpop.eup %4426  ;;  %3966 = vst [vmem:[#allocation3 + $0x40] sm:$0xff] %v3763_v38   ;;  %v836_v49 = vadd.f32 %v5306_v20, %v797_v14  ;;  %v760_v28 = vmul.f32 %v4425_v4, %v5228_v27  ;;  %v704_v41 = vadd.f32 1e-05, %v672_v59 }
 0x19b   : > { %v761_v6 = vmul.f32 %v4427_v5, %v5236_v31  ;;  %v705_v50 = vadd.f32 1e-05, %v673_v53  ;;  %v642_v15 = vpop.xlane.xlu1 %641  ;;  %v837_v54 = vadd.f32 %v5306_v20, %v798_v26 }
 0x19c   : > { %v3768_v10 = vpack.c.bf16 %v836_v49, %v835_v24  ;;  %v799_v19 = vmul.f32 %v5299_v29, %v760_v28  ;;  %4440 = vrsqrt.f32 %v704_v41  ;;  %v674_v51 = vmul.f32 0.0078125, %v642_v15 }
 0x19d   : > { %v4429_v17 = vpop.eup %4428  ;;  %4442 = vrsqrt.f32 %v705_v50  ;;  %v800_v27 = vmul.f32 %v5299_v29, %v761_v6 }
 0x19e   : > { %v4431_v44 = vpop.eup %4430  ;;  %3967 = vst [vmem:[#allocation3 + $0x48] sm:$0xff] %v3768_v10   ;;  %v838_v8 = vadd.f32 %v5306_v20, %v799_v19  ;;  %v762_v55 = vmul.f32 %v4429_v17, %v5240_v30  ;;  %v706_v31 = vadd.f32 1e-05, %v674_v51 }
 0x19f   : > { %v763_v60 = vmul.f32 %v4431_v44, %v5248_v34  ;;  %v839_v56 = vadd.f32 %v5306_v20, %v800_v27 }
 0x1a0   : > { %v3773_v46 = vpack.c.bf16 %v838_v8, %v837_v54  ;;  %v801_v0 = vmul.f32 %v5299_v29, %v762_v55  ;;  %4444 = vrsqrt.f32 %v706_v31 }
 0x1a1   : > { %v4433_v45 = vpop.eup %4432  ;;  %v802_v9 = vmul.f32 %v5299_v29, %v763_v60 }
 0x1a2   : > { %v4435_v47 = vpop.eup %4434  ;;  %3968 = vst [vmem:[#allocation3 + $0x50] sm:$0xff] %v3773_v46   ;;  %v840_v18 = vadd.f32 %v5306_v20, %v801_v0  ;;  %v764_v22 = vmul.f32 %v4433_v45, %v5252_v33 }
 0x1a3   : > { %v765_v30 = vmul.f32 %v4435_v47, %v5260_v37  ;;  %v841_v58 = vadd.f32 %v5306_v20, %v802_v9 }
 0x1a4   : > { %v3778_v57 = vpack.c.bf16 %v840_v18, %v839_v56  ;;  %v803_v34 = vmul.f32 %v5299_v29, %v764_v22 }
 0x1a5   : > { %v4437_v13 = vpop.eup %4436  ;;  %v804_v61 = vmul.f32 %v5299_v29, %v765_v30 }
 0x1a6   : > { %v4439_v32 = vpop.eup %4438  ;;  %3969 = vst [vmem:[#allocation3 + $0x58] sm:$0xff] %v3778_v57   ;;  %v842_v52 = vadd.f32 %v5306_v20, %v803_v34  ;;  %v766_v11 = vmul.f32 %v4437_v13, %v5264_v36 }
 0x1a7   : > { %v767_v62 = vmul.f32 %v4439_v32, %v5272_v40  ;;  %v843_v1 = vadd.f32 %v5306_v20, %v804_v61 }
 0x1a8   : > { %v3783_v35 = vpack.c.bf16 %v842_v52, %v841_v58  ;;  %v805_v33 = vmul.f32 %v5299_v29, %v766_v11 }
 0x1a9   : > { %v4441_v37 = vpop.eup %4440  ;;  %v806_v21 = vmul.f32 %v5299_v29, %v767_v62 }
 0x1aa   : > { %v4443_v63 = vpop.eup %4442  ;;  %3970 = vst [vmem:[#allocation3 + $0x60] sm:$0xff] %v3783_v35   ;;  %v844_v23 = vadd.f32 %v5306_v20, %v805_v33  ;;  %v768_v7 = vmul.f32 %v4441_v37, %v5276_v39 }
 0x1ab   : > { %v769_v25 = vmul.f32 %v4443_v63, %v5284_v43  ;;  %v845_v12 = vadd.f32 %v5306_v20, %v806_v21 }
 0x1ac   : > { %v3788_v2 = vpack.c.bf16 %v844_v23, %v843_v1  ;;  %v807_v36 = vmul.f32 %v5299_v29, %v768_v7 }
 0x1ad   : > { %v4445_v40 = vpop.eup %4444  ;;  %v808_v16 = vmul.f32 %v5299_v29, %v769_v25 }
 0x1ae   : > { %3971 = vst [vmem:[#allocation3 + $0x68] sm:$0xff] %v3788_v2   ;;  %v846_v3 = vadd.f32 %v5306_v20, %v807_v36  ;;  %v770_v48 = vmul.f32 %v4445_v40, %v5288_v42 }
 0x1af   : > { %v847_v39 = vadd.f32 %v5306_v20, %v808_v16 }
 0x1b0   : > { %v3793_v38 = vpack.c.bf16 %v846_v3, %v845_v12  ;;  %v809_v14 = vmul.f32 %v5299_v29, %v770_v48 }
 0x1b2   : > { %3972 = vst [vmem:[#allocation3 + $0x70] sm:$0xff] %v3793_v38   ;;  %v848_v43 = vadd.f32 %v5306_v20, %v809_v14 }
 0x1b4   : > { %v3798_v59 = vpack.c.bf16 %v848_v43, %v847_v39 }
 0x1b6   : > { %3973 = vst [vmem:[#allocation3 + $0x78] sm:$0xff] %v3798_v59  }
 0x1b7 PF: > { %v4446_v4 = vld [vmem:[%s4950_s23 + $0x38] sm:$0xff]   ;;  %v4447_v26 = vld [vmem:[%s4950_s23 + $0x30] sm:$0xff]   ;;  %v4448_v42 = vld [vmem:[%s4950_s23 + $0x28] sm:$0xff]   ;;  %vm1458_vm0 = vcmask 130048   ;;  %s4793_s12 = smov 112   ;;  %s4794_s10 = smov 96  }
 0x1b8   : > { %4205 = vmatprep.subr.bf16.mxu0 %v4446_v4  ;;  %v4449_v29 = vld [vmem:[%s4950_s23 + $0x20] sm:$0xff]   ;;  %v4450_v53 = vld [vmem:[%s4950_s23 + $0x18] sm:$0xff]   ;;  %v4451_v5 = vld [vmem:[%s4950_s23 + $0x10] sm:$0xff]   ;;  %p3549_p1 = scmp.ne.s32.totalorder %s4771_s27, 7 }
 0x1b9   : > { %4206 = vmatpush3.bf16.msra.mxu0 %v4446_v4  ;;  %v4454_v20 = vld [vmem:[#allocation3] sm:$0xff]   ;;  %v4452_v24 = vld [vmem:[%s4950_s23 + $0x8] sm:$0xff]   ;;  %v4456_v41 = vld [vmem:[#allocation3 + $0x10] sm:$0xff]  }
 0x1ba   : > { %4207 = vmatprep.subr.bf16.mxu0 %v4447_v26  ;;  %4221 = vmatprep.mubr.bf16.mxu0 %v4454_v20  ;;  %v4453_v49 = vld [vmem:[%s4950_s23] sm:$0xff]   ;;  %v4455_v28 = vld [vmem:[#allocation3 + $0x8] sm:$0xff]   ;;  %v4457_v6 = vld [vmem:[#allocation3 + $0x18] sm:$0xff]  }
 0x1bb   : > { %v4458_v50 = vld [vmem:[#allocation3 + $0x20] sm:$0xff]   ;;  %v4459_v15 = vld [vmem:[#allocation3 + $0x28] sm:$0xff]   ;;  %v4460_v10 = vld [vmem:[#allocation3 + $0x30] sm:$0xff]  }
 0x1bc   : > { %v4461_v19 = vld [vmem:[#allocation3 + $0x38] sm:$0xff]   ;;  %v4462_v51 = vld [vmem:[#allocation3 + $0x40] sm:$0xff]   ;;  %v4463_v17 = vld [vmem:[#allocation3 + $0x48] sm:$0xff]  }
 0x1bd   : > { %4208 = vmatpush3.bf16.msra.mxu0 %v4447_v26  ;;  %v4464_v54 = vld [vmem:[#allocation3 + $0x50] sm:$0xff]   ;;  %v4465_v44 = vld [vmem:[#allocation3 + $0x58] sm:$0xff]   ;;  %v4466_v8 = vld [vmem:[#allocation3 + $0x60] sm:$0xff]  }
 0x1be   : > { %4209 = vmatprep.subr.bf16.mxu0 %v4448_v42  ;;  %v4467_v27 = vld [vmem:[#allocation3 + $0x68] sm:$0xff]   ;;  %v4468_v55 = vld [vmem:[#allocation3 + $0x70] sm:$0xff]   ;;  %v4469_v31 = vld [vmem:[#allocation3 + $0x78] sm:$0xff]  }
 0x1c1   : > { %4210 = vmatpush3.bf16.msra.mxu0 %v4448_v42 }
 0x1c2   : > { %4211 = vmatprep.subr.bf16.mxu0 %v4449_v29 }
 0x1c5   : > { %4212 = vmatpush3.bf16.msra.mxu0 %v4449_v29 }
 0x1c6   : > { %4213 = vmatprep.subr.bf16.mxu0 %v4450_v53 }
 0x1c9   : > { %4214 = vmatpush3.bf16.msra.mxu0 %v4450_v53 }
 0x1ca   : > { %4215 = vmatprep.subr.bf16.mxu0 %v4451_v5 }
 0x1cd   : > { %4216 = vmatpush3.bf16.msra.mxu0 %v4451_v5 }
 0x1ce   : > { %4217 = vmatprep.subr.bf16.mxu0 %v4452_v24 }
 0x1d1   : > { %4218 = vmatpush3.bf16.msra.mxu0 %v4452_v24 }
 0x1d2   : > { %4219 = vmatprep.subr.bf16.mxu0 %v4453_v49 }
 0x1d5   : > { %4220 = vmatpush3.bf16.msra.mxu0 %v4453_v49 }
 0x1d8   : > { %4222 = vmatmul.mubr.bf16.vlgmr.msra.gmra.mxu0 %v4455_v28 }
 0x1d9   : > { %4225 = vmatprep.mubr.bf16.mxu0 %v4456_v41 }
 0x1e0   : > { %4226 = vmatmul.mubr.bf16.gmra.mxu0 %v4457_v6 }
 0x1e1   : > { %4229 = vmatprep.mubr.bf16.mxu0 %v4458_v50 }
 0x1e8   : > { %4230 = vmatmul.mubr.bf16.gmra.mxu0 %v4459_v15 }
 0x1e9   : > { %4233 = vmatprep.mubr.bf16.mxu0 %v4460_v10 }
 0x1f0   : > { %4234 = vmatmul.mubr.bf16.gmra.mxu0 %v4461_v19 }
 0x1f1   : > { %4237 = vmatprep.mubr.bf16.mxu0 %v4462_v51 }
 0x1f8   : > { %4238 = vmatmul.mubr.bf16.gmra.mxu0 %v4463_v17 }
 0x1f9   : > { %4241 = vmatprep.mubr.bf16.mxu0 %v4464_v54 }
 0x200   : > { %4242 = vmatmul.mubr.bf16.gmra.mxu0 %v4465_v44 }
 0x201   : > { %4245 = vmatprep.mubr.bf16.mxu0 %v4466_v8 }
 0x208   : > { %4246 = vmatmul.mubr.bf16.gmra.mxu0 %v4467_v27 }
 0x209   : > { %4249 = vmatprep.mubr.bf16.mxu0 %v4468_v55 }
 0x210   : > { %4250 = vmatmul.mubr.bf16.gmra.mxu0 %v4469_v31 }
 0x298   : > { %v4223_v60 = vpop.f32.mrf.mxu0 }
 0x29a   : > { %v1267_v46 = vpop.f32.mrf.mxu0 }
 0x29c   : > { %v4224_v0 = vpop.f32.mrf.mxu0 }
 0x29d   : > { %v5410_v45 = vpack.c.bf16 %v4224_v0, %v4223_v60 }
 0x29e   : > { %v1270_v47 = vpop.f32.mrf.mxu0 }
 0x29f   : > { %v5412_v56 = vpack.c.bf16 %v1270_v47, %v1267_v46 }
 0x2a0   : > { %v4227_v18 = vpop.f32.mrf.mxu0 }
 0x2a1   : > { %4044 = vmatprep.mubr.msk.bf16.mxu1 %vm1458_vm0, %v5412_v56 }
 0x2a2   : > { %v1283_v9 = vpop.f32.mrf.mxu0 }
 0x2a4   : > { %v4228_v22 = vpop.f32.mrf.mxu0 }
 0x2a5   : > { %v5446_v42 = vpack.c.bf16 %v4228_v22, %v4227_v18 }
 0x2a6   : > { %v1286_v30 = vpop.f32.mrf.mxu0 }
 0x2a7   : > { %v5454_v20 = vpack.c.bf16 %v1286_v30, %v1283_v9 }
 0x2a8   : > { %v4231_v57 = vpop.f32.mrf.mxu0 }
 0x2aa   : > { %v1299_v34 = vpop.f32.mrf.mxu0 }
 0x2ac   : > { %v4232_v13 = vpop.f32.mrf.mxu0 }
 0x2ad   : > { %v5430_v43 = vpack.c.bf16 %v4232_v13, %v4231_v57 }
 0x2ae   : > { %v1302_v32 = vpop.f32.mrf.mxu0 }
 0x2af   : > { %v5438_v4 = vpack.c.bf16 %v1302_v32, %v1299_v34 }
 0x2b0   : > { %v4235_v58 = vpop.f32.mrf.mxu0 }
 0x2b2   : > { %v1315_v52 = vpop.f32.mrf.mxu0 }
 0x2b4   : > { %v4236_v61 = vpop.f32.mrf.mxu0 }
 0x2b5   : > { %v5416_v11 = vpack.c.bf16 %v4236_v61, %v4235_v58 }
 0x2b6   : > { %v1318_v62 = vpop.f32.mrf.mxu0 }
 0x2b7   : > { %v5418_v35 = vpack.c.bf16 %v1318_v62, %v1315_v52  ;;  %1440 = vrot.lane.b32.xlu0 %v5416_v11, %s4793_s12 }
 0x2b8   : > { %v4239_v33 = vpop.f32.mrf.mxu0 }
 0x2b9   : > { %1438 = vrot.lane.b32.xlu1 %v5418_v35, %s4793_s12 }
 0x2ba   : > { %v1331_v37 = vpop.f32.mrf.mxu0 }
 0x2bc   : > { %v4240_v63 = vpop.f32.mrf.mxu0 }
 0x2bd   : > { %v5464_v5 = vpack.c.bf16 %v4240_v63, %v4239_v33 }
 0x2be   : > { %v1334_v1 = vpop.f32.mrf.mxu0 }
 0x2bf   : > { %v5470_v24 = vpack.c.bf16 %v1334_v1, %v1331_v37 }
 0x2c0   : > { %v4243_v23 = vpop.f32.mrf.mxu0 }
 0x2c2   : > { %v1347_v21 = vpop.f32.mrf.mxu0 }
 0x2c4   : > { %v4244_v7 = vpop.f32.mrf.mxu0 }
 0x2c5   : > { %v5450_v29 = vpack.c.bf16 %v4244_v7, %v4243_v23 }
 0x2c6   : > { %v1350_v25 = vpop.f32.mrf.mxu0 }
 0x2c7   : > { %v5458_v53 = vpack.c.bf16 %v1350_v25, %v1347_v21  ;;  %v1812_v21 = vld [vmem:[%s6473_s3] sm:$0xff]  ;;  %v1813_v25 = vld [vmem:[%s6473_s3 + $0x8] sm:$0xff] }
 0x2c8   : > { %v4247_v2 = vpop.f32.mrf.mxu0 }
 0x2ca   : > { %v1363_v36 = vpop.f32.mrf.mxu0 }
 0x2cc   : > { %v4248_v40 = vpop.f32.mrf.mxu0 }
 0x2cd   : > { %v5434_v59 = vpack.c.bf16 %v4248_v40, %v4247_v2 }
 0x2ce   : > { %v1366_v12 = vpop.f32.mrf.mxu0 }
 0x2cf   : > { %v5442_v26 = vpack.c.bf16 %v1366_v12, %v1363_v36 }
 0x2d0   : > { %v4251_v3 = vpop.f32.mrf.mxu0 }
 0x2d2   : > { %v1379_v16 = vpop.f32.mrf.mxu0 }
 0x2d4   : > { %v4252_v48 = vpop.f32.mrf.mxu0 }
 0x2d5   : > { %v5424_v38 = vpack.c.bf16 %v4252_v48, %v4251_v3 }
 0x2d6   : > { %v1382_v14 = vpop.f32.mrf.mxu0 }
 0x2d7   : > { %v5426_v39 = vpack.c.bf16 %v1382_v14, %v1379_v16  ;;  %1456 = vrot.lane.b32.xlu0 %v5424_v38, %s4793_s12  ;;  %v1814_v16 = vld [vmem:[%s6473_s3 + $0x10] sm:$0xff] }
 0x2d9   : > { %1454 = vrot.lane.b32.xlu1 %v5426_v39, %s4793_s12 }
 0x2db   : > { %1436 = vrot.lane.b32.xlu0 %v5430_v43, %s4793_s12 }
 0x2dd   : > { %1452 = vrot.lane.b32.xlu1 %v5434_v59, %s4793_s12 }
 0x2df   : > { %1434 = vrot.lane.b32.xlu0 %v5438_v4, %s4793_s12 }
 0x2e1   : > { %1450 = vrot.lane.b32.xlu1 %v5442_v26, %s4793_s12 }
 0x2e3   : > { %1432 = vrot.lane.b32.xlu0 %v5446_v42, %s4793_s12 }
 0x2e5   : > { %1448 = vrot.lane.b32.xlu1 %v5450_v29, %s4793_s12 }
 0x2e7   : > { %1430 = vrot.lane.b32.xlu0 %v5454_v20, %s4793_s12 }
 0x2e9   : > { %1446 = vrot.lane.b32.xlu1 %v5458_v53, %s4793_s12 }
 0x2eb   : > { %1428 = vrot.lane.b32.xlu0 %v5410_v45, %s4793_s12 }
 0x2ed   : > { %1444 = vrot.lane.b32.xlu1 %v5464_v5, %s4793_s12 }
 0x2ef   : > { %1426 = vrot.lane.b32.xlu0 %v5412_v56, %s4793_s12 }
 0x2f1   : > { %1442 = vrot.lane.b32.xlu1 %v5470_v24, %s4793_s12 }
 0x2f3   : > { %2466 = vrot.lane.b32.xlu0 %v5416_v11, %s4794_s10 }
 0x2f5   : > { %2482 = vrot.lane.b32.xlu1 %v5424_v38, %s4794_s10 }
 0x2f7   : > { %2462 = vrot.lane.b32.xlu0 %v5430_v43, %s4794_s10 }
 0x2f9   : > { %2464 = vrot.lane.b32.xlu1 %v5418_v35, %s4794_s10 }
 0x2fb   : > { %2458 = vrot.lane.b32.xlu0 %v5446_v42, %s4794_s10 }
 0x2fd   : > { %2478 = vrot.lane.b32.xlu1 %v5434_v59, %s4794_s10 }
 0x301   : > { %2476 = vrot.lane.b32.xlu1 %v5442_v26, %s4794_s10 }
 0x305   : > { %2460 = vrot.lane.b32.xlu1 %v5438_v4, %s4794_s10 }
 0x309   : > { %2474 = vrot.lane.b32.xlu1 %v5450_v29, %s4794_s10 }
 0x30d   : > { %2472 = vrot.lane.b32.xlu1 %v5458_v53, %s4794_s10 }
 0x311   : > { %2456 = vrot.lane.b32.xlu1 %v5454_v20, %s4794_s10 }
 0x315   : > { %2470 = vrot.lane.b32.xlu1 %v5464_v5, %s4794_s10 }
 0x319   : > { %2480 = vrot.lane.b32.xlu1 %v5426_v39, %s4794_s10 }
 0x329   : > { %v1441_v49 = vpop.permute.xlu0 %1440 }
 0x32a   : > { %v1529_v6 = vsel %vm1458_vm0, %v1441_v49, 0 }
 0x32b   : > { %v1439_v28 = vpop.permute.xlu1 %1438 }
 0x32c   : > { %v1526_v51 = vsel %vm1458_vm0, %v1439_v28, 0 }
 0x349   : > { %v1457_v41 = vpop.permute.xlu0 %1456 }
 0x34a   : > { %4289 = vmatprep.subr.msk.bf16.mxu1 %vm1458_vm0, %v1457_v41 }
 0x34b   : > { %4029 = vmatpush3.bf16.xpose.msra.mxu1 %v1529_v6  ;;  %v1455_v50 = vpop.permute.xlu1 %1454 }
 0x34c   : > { %4290 = vmatprep.subr.msk.bf16.mxu1 %vm1458_vm0, %v1455_v50  ;;  %v1818_v50 = vld [vmem:[%s6473_s3 + $0x30] sm:$0xff] }
 0x34d   : > { %v1437_v15 = vpop.permute.xlu0 %1436 }
 0x34e   : > { %v1523_v27 = vsel %vm1458_vm0, %v1437_v15, 0 }
 0x34f   : > { %v1453_v10 = vpop.permute.xlu1 %1452 }
 0x351   : > { %v1435_v19 = vpop.permute.xlu0 %1434 }
 0x352   : > { %v1520_v46 = vsel %vm1458_vm0, %v1435_v19, 0 }
 0x353   : > { %4031 = vmatpush3.bf16.xpose.msra.mxu1 %v1526_v51  ;;  %v1451_v17 = vpop.permute.xlu1 %1450 }
 0x354   : > { %4291 = vmatprep.subr.msk.bf16.mxu1 %vm1458_vm0, %v1453_v10  ;;  %v1819_v10 = vld [vmem:[%s6473_s3 + $0x38] sm:$0xff] }
 0x355   : > { %v1433_v54 = vpop.permute.xlu0 %1432 }
 0x356   : > { %v1517_v22 = vsel %vm1458_vm0, %v1433_v54, 0 }
 0x357   : > { %v1449_v44 = vpop.permute.xlu1 %1448 }
 0x359   : > { %v1431_v8 = vpop.permute.xlu0 %1430 }
 0x35a   : > { %v1514_v34 = vsel %vm1458_vm0, %v1431_v8, 0 }
 0x35b   : > { %4033 = vmatpush3.bf16.xpose.msra.mxu1 %v1523_v27  ;;  %v1447_v55 = vpop.permute.xlu1 %1446  ;;  %v1820_v27 = vld [vmem:[%s6473_s3 + $0x40] sm:$0xff] }
 0x35c   : > { %4292 = vmatprep.subr.msk.bf16.mxu1 %vm1458_vm0, %v1451_v17 }
 0x35d   : > { %v1429_v31 = vpop.permute.xlu0 %1428 }
 0x35e   : > { %v1511_v58 = vsel %vm1458_vm0, %v1429_v31, 0  ;;  %v1821_v31 = vld [vmem:[%s6473_s3 + $0x48] sm:$0xff] }
 0x35f   : > { %v1445_v60 = vpop.permute.xlu1 %1444 }
 0x361   : > { %v1427_v0 = vpop.permute.xlu0 %1426 }
 0x362   : > { %v1508_v62 = vsel %vm1458_vm0, %v1427_v0, 0 }
 0x363   : > { %4035 = vmatpush3.bf16.xpose.msra.mxu1 %v1520_v46  ;;  %v1443_v47 = vpop.permute.xlu1 %1442 }
 0x364   : > { %4293 = vmatprep.subr.msk.bf16.mxu1 %vm1458_vm0, %v1449_v44 }
 0x365   : > { %v2467_v9 = vpop.permute.xlu0 %2466 }
 0x367   : > { %v2483_v18 = vpop.permute.xlu1 %2482 }
 0x368   : > { %4076 = vmatprep.subr.bf16.mxu0 %v2483_v18 }
 0x369   : > { %4077 = vmatpush3.bf16.msra.mxu0 %v2467_v9  ;;  %v2463_v1 = vpop.permute.xlu0 %2462 }
 0x36b   : > { %4037 = vmatpush3.bf16.xpose.msra.mxu1 %v1517_v22  ;;  %v2465_v30 = vpop.permute.xlu1 %2464  ;;  %v1822_v22 = vld [vmem:[%s6473_s3 + $0x50] sm:$0xff] }
 0x36c   : > { %4294 = vmatprep.subr.msk.bf16.mxu1 %vm1458_vm0, %v1447_v55 }
 0x36d   : > { %v2459_v23 = vpop.permute.xlu0 %2458 }
 0x36f   : > { %v2479_v57 = vpop.permute.xlu1 %2478 }
 0x373   : > { %4039 = vmatpush3.bf16.xpose.msra.mxu1 %v1514_v34  ;;  %v2477_v13 = vpop.permute.xlu1 %2476 }
 0x374   : > { %4295 = vmatprep.subr.msk.bf16.mxu1 %vm1458_vm0, %v1445_v60 }
 0x377   : > { %v2461_v32 = vpop.permute.xlu1 %2460 }
 0x37b   : > { %4041 = vmatpush3.bf16.xpose.msra.mxu1 %v1511_v58  ;;  %v2475_v52 = vpop.permute.xlu1 %2474 }
 0x37c   : > { %4296 = vmatprep.subr.msk.bf16.mxu1 %vm1458_vm0, %v1443_v47 }
 0x37f   : > { %v2473_v61 = vpop.permute.xlu1 %2472 }
 0x383   : > { %4043 = vmatpush3.bf16.xpose.msra.mxu1 %v1508_v62  ;;  %v2457_v33 = vpop.permute.xlu1 %2456  ;;  %v1824_v62 = vld [vmem:[%s6473_s3 + $0x60] sm:$0xff] }
 0x387   : > { %v2471_v37 = vpop.permute.xlu1 %2470 }
 0x38a   : > { %4045 = vmatmul.mubr.msk.bf16.vlgmr.msra.gmra.mxu1 %vm1458_vm0, %v5412_v56 }
 0x38b   : > { %4046 = vmatprep.mubr.msk.bf16.mxu1 %vm1458_vm0, %v5410_v45  ;;  %v2481_v63 = vpop.permute.xlu1 %2480 }
 0x38c   : > { %4078 = vmatprep.subr.bf16.mxu0 %v2481_v63 }
 0x38d   : > { %4079 = vmatpush3.bf16.msra.mxu0 %v2465_v30 }
 0x38e   : > { %4080 = vmatprep.subr.bf16.mxu0 %v2479_v57  ;;  %v1823_v57 = vld [vmem:[%s6473_s3 + $0x58] sm:$0xff] }
 0x391   : > { %4081 = vmatpush3.bf16.msra.mxu0 %v2463_v1 }
 0x392   : > { %4047 = vmatmul.mubr.msk.bf16.gmra.mxu1 %vm1458_vm0, %v5410_v45  ;;  %4082 = vmatprep.subr.bf16.mxu0 %v2477_v13 }
 0x393   : > { %4048 = vmatprep.mubr.msk.bf16.mxu1 %vm1458_vm0, %v5454_v20 }
 0x395   : > { %4083 = vmatpush3.bf16.msra.mxu0 %v2461_v32 }
 0x396   : > { %4084 = vmatprep.subr.bf16.mxu0 %v2475_v52 }
 0x399   : > { %4085 = vmatpush3.bf16.msra.mxu0 %v2459_v23 }
 0x39a   : > { %4049 = vmatmul.mubr.msk.bf16.gmra.mxu1 %vm1458_vm0, %v5454_v20  ;;  %4086 = vmatprep.subr.bf16.mxu0 %v2473_v61  ;;  %v1817_v20 = vld [vmem:[%s6473_s3 + $0x28] sm:$0xff] }
 0x39b   : > { %4050 = vmatprep.mubr.msk.bf16.mxu1 %vm1458_vm0, %v5446_v42 }
 0x39d   : > { %4087 = vmatpush3.bf16.msra.mxu0 %v2457_v33 }
 0x39e   : > { %4088 = vmatprep.subr.bf16.mxu0 %v2471_v37  ;;  %v1825_v37 = vld [vmem:[%s6473_s3 + $0x68] sm:$0xff] }
 0x3a2   : > { %4051 = vmatmul.mubr.msk.bf16.gmra.mxu1 %vm1458_vm0, %v5446_v42  ;;  %v1816_v42 = vld [vmem:[%s6473_s3 + $0x20] sm:$0xff] }
 0x3a3   : > { %4052 = vmatprep.mubr.msk.bf16.mxu1 %vm1458_vm0, %v5438_v4 }
 0x3aa   : > { %4053 = vmatmul.mubr.msk.bf16.gmra.mxu1 %vm1458_vm0, %v5438_v4 }
 0x3ab   : > { %4054 = vmatprep.mubr.msk.bf16.mxu1 %vm1458_vm0, %v5430_v43 }
 0x3b2   : > { %4055 = vmatmul.mubr.msk.bf16.gmra.mxu1 %vm1458_vm0, %v5430_v43 }
 0x3b3   : > { %4056 = vmatprep.mubr.msk.bf16.mxu1 %vm1458_vm0, %v5418_v35 }
 0x3ba   : > { %4057 = vmatmul.mubr.msk.bf16.gmra.mxu1 %vm1458_vm0, %v5418_v35 }
 0x3bb   : > { %4058 = vmatprep.mubr.msk.bf16.mxu1 %vm1458_vm0, %v5416_v11 }
 0x3c2   : > { %4059 = vmatmul.mubr.msk.bf16.gmra.mxu1 %vm1458_vm0, %v5416_v11 }
 0x3c3   : > { %4060 = vmatprep.mubr.msk.bf16.mxu1 %vm1458_vm0, %v5470_v24 }
 0x3ca   : > { %4061 = vmatmul.mubr.msk.bf16.gmra.mxu1 %vm1458_vm0, %v5470_v24 }
 0x3cb   : > { %4062 = vmatprep.mubr.msk.bf16.mxu1 %vm1458_vm0, %v5464_v5 }
 0x3d2   : > { %4063 = vmatmul.mubr.msk.bf16.gmra.mxu1 %vm1458_vm0, %v5464_v5 }
 0x3d3   : > { %4064 = vmatprep.mubr.msk.bf16.mxu1 %vm1458_vm0, %v5458_v53 }
 0x3da   : > { %4065 = vmatmul.mubr.msk.bf16.gmra.mxu1 %vm1458_vm0, %v5458_v53 }
 0x3db   : > { %4066 = vmatprep.mubr.msk.bf16.mxu1 %vm1458_vm0, %v5450_v29 }
 0x3e2   : > { %4067 = vmatmul.mubr.msk.bf16.gmra.mxu1 %vm1458_vm0, %v5450_v29 }
 0x3e3   : > { %4068 = vmatprep.mubr.msk.bf16.mxu1 %vm1458_vm0, %v5442_v26 }
 0x3ea   : > { %4069 = vmatmul.mubr.msk.bf16.gmra.mxu1 %vm1458_vm0, %v5442_v26 }
 0x3eb   : > { %4070 = vmatprep.mubr.msk.bf16.mxu1 %vm1458_vm0, %v5434_v59 }
 0x3f2   : > { %4071 = vmatmul.mubr.msk.bf16.gmra.mxu1 %vm1458_vm0, %v5434_v59 }
 0x3f3   : > { %4072 = vmatprep.mubr.msk.bf16.mxu1 %vm1458_vm0, %v5426_v39 }
 0x3fa   : > { %4073 = vmatmul.mubr.msk.bf16.gmra.mxu1 %vm1458_vm0, %v5426_v39 }
 0x3fb   : > { %4074 = vmatprep.mubr.msk.bf16.mxu1 %vm1458_vm0, %v5424_v38 }
 0x402   : > { %4075 = vmatmul.mubr.msk.bf16.gmra.mxu1 %vm1458_vm0, %v5424_v38  ;;  %v1815_v38 = vld [vmem:[%s6473_s3 + $0x18] sm:$0xff] }
 0x44a   : > { %v1589_v11 = vpop.f32.mrf.mxu1 }
 0x44b   : > { %v1748_v35 = vmul.f32 0.088388346, %v1589_v11 }
 0x44c   : > { %v1591_v7 = vpop.f32.mrf.mxu1 }
 0x44d   : > { %v1749_v2 = vmul.f32 0.088388346, %v1591_v7  ;;  %v5586_v40 = vadd.f32 %v1812_v21, %v1748_v35  ;;  %v1826_v7 = vld [vmem:[%s6473_s3 + $0x70] sm:$0xff] }
 0x44e   : > { %v1593_v36 = vpop.f32.mrf.mxu1 }
 0x44f   : > { %v5588_v12 = vadd.f32 %v1813_v25, %v1749_v2  ;;  %v1750_v3 = vmul.f32 0.088388346, %v1593_v36  ;;  %v1827_v2 = vld [vmem:[%s6473_s3 + $0x78] sm:$0xff] }
 0x450   : > { %v1595_v48 = vpop.f32.mrf.mxu1 }
 0x451   : > { %v1751_v14 = vmul.f32 0.088388346, %v1595_v48  ;;  %v1940_v39 = vmax.f32 %v5586_v40, %v5588_v12  ;;  %v5598_v59 = vadd.f32 %v1814_v16, %v1750_v3 }
 0x452   : > { %v1599_v43 = vpop.f32.mrf.mxu1 }
 0x453   : > { %v5600_v4 = vadd.f32 %v1815_v38, %v1751_v14  ;;  %v1752_v26 = vmul.f32 0.088388346, %v1599_v43  ;;  %1941 = vmax.xlane.f32.xlu0 %v1940_v39  ;;  %v1828_v39 = vld [vmem:[%s6473_s3 + $0x80] sm:$0xff] }
 0x454   : > { %v1601_v29 = vpop.f32.mrf.mxu1 }
 0x455   : > { %v1753_v53 = vmul.f32 0.088388346, %v1601_v29  ;;  %v1943_v5 = vmax.f32 %v5598_v59, %v5600_v4  ;;  %v5610_v28 = vadd.f32 %v1816_v42, %v1752_v26  ;;  %v1829_v26 = vld [vmem:[%s6473_s3 + $0x88] sm:$0xff] }
 0x456   : > { %v1603_v49 = vpop.f32.mrf.mxu1 }
 0x457   : > { %v5612_v41 = vadd.f32 %v1817_v20, %v1753_v53  ;;  %v1754_v6 = vmul.f32 0.088388346, %v1603_v49  ;;  %1944 = vmax.xlane.f32.xlu1 %v1943_v5 }
 0x458   : > { %v1605_v15 = vpop.f32.mrf.mxu1 }
 0x459   : > { %v1755_v19 = vmul.f32 0.088388346, %v1605_v15  ;;  %v1946_v51 = vmax.f32 %v5610_v28, %v5612_v41  ;;  %v5622_v54 = vadd.f32 %v1818_v50, %v1754_v6  ;;  %v1830_v6 = vld [vmem:[%s6473_s3 + $0x90] sm:$0xff]  ;;  %v1831_v15 = vld [vmem:[%s6473_s3 + $0x98] sm:$0xff] }
 0x45a   : > { %v1609_v17 = vpop.f32.mrf.mxu1 }
 0x45b   : > { %v5624_v44 = vadd.f32 %v1819_v10, %v1755_v19  ;;  %v1756_v8 = vmul.f32 0.088388346, %v1609_v17  ;;  %1947 = vmax.xlane.f32.xlu0 %v1946_v51 }
 0x45c   : > { %v1611_v55 = vpop.f32.mrf.mxu1 }
 0x45d   : > { %v1757_v60 = vmul.f32 0.088388346, %v1611_v55  ;;  %v1949_v46 = vmax.f32 %v5622_v54, %v5624_v44  ;;  %v5634_v47 = vadd.f32 %v1820_v27, %v1756_v8  ;;  %v1832_v55 = vld [vmem:[%s6473_s3 + $0xa0] sm:$0xff] }
 0x45e   : > { %v1613_v0 = vpop.f32.mrf.mxu1 }
 0x45f   : > { %v5636_v18 = vadd.f32 %v1821_v31, %v1757_v60  ;;  %v1758_v9 = vmul.f32 0.088388346, %v1613_v0  ;;  %1950 = vmax.xlane.f32.xlu0 %v1949_v46  ;;  %v1833_v60 = vld [vmem:[%s6473_s3 + $0xa8] sm:$0xff] }
 0x460   : > { %v1615_v30 = vpop.f32.mrf.mxu1 }
 0x461   : > { %v1759_v34 = vmul.f32 0.088388346, %v1615_v30  ;;  %v1952_v13 = vmax.f32 %v5634_v47, %v5636_v18  ;;  %v5646_v58 = vadd.f32 %v1822_v22, %v1758_v9 }
 0x462   : > { %v1619_v32 = vpop.f32.mrf.mxu1 }
 0x463   : > { %v5648_v52 = vadd.f32 %v1823_v57, %v1759_v34  ;;  %v1760_v61 = vmul.f32 0.088388346, %v1619_v32  ;;  %1953 = vmax.xlane.f32.xlu1 %v1952_v13  ;;  %v1834_v34 = vld [vmem:[%s6473_s3 + $0xb0] sm:$0xff]  ;;  %v1835_v32 = vld [vmem:[%s6473_s3 + $0xb8] sm:$0xff] }
 0x464   : > { %v1621_v33 = vpop.f32.mrf.mxu1 }
 0x465   : > { %v1761_v63 = vmul.f32 0.088388346, %v1621_v33  ;;  %v1955_v1 = vmax.f32 %v5646_v58, %v5648_v52  ;;  %v5658_v11 = vadd.f32 %v1824_v62, %v1760_v61 }
 0x466   : > { %v1623_v23 = vpop.f32.mrf.mxu1 }
 0x467   : > { %v5660_v35 = vadd.f32 %v1825_v37, %v1761_v63  ;;  %v1762_v21 = vmul.f32 0.088388346, %v1623_v23  ;;  %1956 = vmax.xlane.f32.xlu0 %v1955_v1  ;;  %v1836_v23 = vld [vmem:[%s6473_s3 + $0xc0] sm:$0xff] }
 0x468   : > { %v1625_v25 = vpop.f32.mrf.mxu1 }
 0x469   : > { %v1763_v36 = vmul.f32 0.088388346, %v1625_v25  ;;  %v1958_v3 = vmax.f32 %v5658_v11, %v5660_v35  ;;  %v5670_v48 = vadd.f32 %v1826_v7, %v1762_v21  ;;  %v1837_v7 = vld [vmem:[%s6473_s3 + $0xc8] sm:$0xff] }
 0x46a   : > { %v1629_v16 = vpop.f32.mrf.mxu1 }
 0x46b   : > { %v5672_v38 = vadd.f32 %v1827_v2, %v1763_v36  ;;  %v1764_v14 = vmul.f32 0.088388346, %v1629_v16  ;;  %1959 = vmax.xlane.f32.xlu1 %v1958_v3 }
 0x46c   : > { %v1631_v43 = vpop.f32.mrf.mxu1 }
 0x46d   : > { %v1765_v42 = vmul.f32 0.088388346, %v1631_v43  ;;  %v1961_v29 = vmax.f32 %v5670_v48, %v5672_v38  ;;  %v5682_v53 = vadd.f32 %v1828_v39, %v1764_v14  ;;  %v1838_v39 = vld [vmem:[%s6473_s3 + $0xd0] sm:$0xff] }
 0x46e   : > { %v1633_v20 = vpop.f32.mrf.mxu1 }
 0x46f   : > { %v5684_v5 = vadd.f32 %v1829_v26, %v1765_v42  ;;  %v1766_v49 = vmul.f32 0.088388346, %v1633_v20  ;;  %1962 = vmax.xlane.f32.xlu0 %v1961_v29  ;;  %v1839_v26 = vld [vmem:[%s6473_s3 + $0xd8] sm:$0xff] }
 0x470   : > { %v1635_v50 = vpop.f32.mrf.mxu1 }
 0x471   : > { %v1767_v10 = vmul.f32 0.088388346, %v1635_v50  ;;  %v1964_v19 = vmax.f32 %v5682_v53, %v5684_v5  ;;  %v5694_v17 = vadd.f32 %v1830_v6, %v1766_v49 }
 0x472   : > { %v1639_v51 = vpop.f32.mrf.mxu1 }
 0x473   : > { %v5696_v8 = vadd.f32 %v1831_v15, %v1767_v10  ;;  %v1768_v27 = vmul.f32 0.088388346, %v1639_v51  ;;  %1965 = vmax.xlane.f32.xlu1 %v1964_v19 }
 0x474   : > { %v1641_v31 = vpop.f32.mrf.mxu1 }
 0x475   : > { %v1769_v46 = vmul.f32 0.088388346, %v1641_v31  ;;  %v1967_v0 = vmax.f32 %v5694_v17, %v5696_v8  ;;  %v5706_v22 = vadd.f32 %v1832_v55, %v1768_v27 }
 0x476   : > { %v1643_v9 = vpop.f32.mrf.mxu1 }
 0x477   : > { %v5708_v30 = vadd.f32 %v1833_v60, %v1769_v46  ;;  %v1770_v57 = vmul.f32 0.088388346, %v1643_v9  ;;  %1968 = vmax.xlane.f32.xlu0 %v1967_v0 }
 0x478   : > { %v1645_v13 = vpop.f32.mrf.mxu1 }
 0x479   : > { %v1771_v61 = vmul.f32 0.088388346, %v1645_v13  ;;  %v1970_v62 = vmax.f32 %v5706_v22, %v5708_v30  ;;  %v5718_v37 = vadd.f32 %v1834_v34, %v1770_v57 }
 0x47a   : > { %v1649_v33 = vpop.f32.mrf.mxu1 }
 0x47b   : > { %v5720_v63 = vadd.f32 %v1835_v32, %v1771_v61  ;;  %v1772_v1 = vmul.f32 0.088388346, %v1649_v33  ;;  %1971 = vmax.xlane.f32.xlu1 %v1970_v62 }
 0x47c   : > { %v1651_v21 = vpop.f32.mrf.mxu1 }
 0x47d   : > { %v1773_v25 = vmul.f32 0.088388346, %v1651_v21  ;;  %v1973_v2 = vmax.f32 %v5718_v37, %v5720_v63  ;;  %v5730_v3 = vadd.f32 %v1836_v23, %v1772_v1 }
 0x47e   : > { %v1653_v36 = vpop.f32.mrf.mxu1 }
 0x47f   : > { %6517 = vst [vmem:[#allocation14_spill] sm:$0xff] %v5730_v3  ;;  %v5732_v16 = vadd.f32 %v1837_v7, %v1773_v25  ;;  %v1774_v14 = vmul.f32 0.088388346, %v1653_v36  ;;  %1974 = vmax.xlane.f32.xlu0 %v1973_v2  ;;  %v1840_v36 = vld [vmem:[%s6473_s3 + $0xe0] sm:$0xff] }
 0x480   : > { %v1655_v43 = vpop.f32.mrf.mxu1 }
 0x481   : > { %6518 = vst [vmem:[#allocation15_spill] sm:$0xff] %v5732_v16  ;;  %v1775_v42 = vmul.f32 0.088388346, %v1655_v43  ;;  %v1976_v29 = vmax.f32 %v5730_v3, %v5732_v16  ;;  %v5742_v49 = vadd.f32 %v1838_v39, %v1774_v14  ;;  %v1849_v16 = vld [vmem:[%s6473_s3 + $0x128] sm:$0xff] }
 0x482   : > { %v1659_v20 = vpop.f32.mrf.mxu1 }
 0x483   : > { %6519 = vst [vmem:[#allocation16_spill] sm:$0xff] %v5742_v49  ;;  %v5744_v6 = vadd.f32 %v1839_v26, %v1775_v42  ;;  %1977 = vmax.xlane.f32.xlu1 %v1976_v29  ;;  %v1776_v25 = vmul.f32 0.088388346, %v1659_v20  ;;  %v1843_v42 = vld [vmem:[%s6473_s3 + $0xf8] sm:$0xff]  ;;  %v1845_v29 = vld [vmem:[%s6473_s3 + $0x108] sm:$0xff] }
 0x484   : > { %v1661_v50 = vpop.f32.mrf.mxu1 }
 0x485   : > { %6520 = vst [vmem:[#allocation17_spill] sm:$0xff] %v5744_v6  ;;  %v1979_v15 = vmax.f32 %v5742_v49, %v5744_v6  ;;  %v1777_v21 = vmul.f32 0.088388346, %v1661_v50  ;;  %v5784_v20 = vadd.f32 %v1840_v36, %v1776_v25 }
 0x486   : > { %v1663_v10 = vpop.f32.mrf.mxu1 }
 0x487   : > { %1980 = vmax.xlane.f32.xlu0 %v1979_v15  ;;  %v1778_v50 = vmul.f32 0.088388346, %v1663_v10  ;;  %v1847_v10 = vld [vmem:[%s6473_s3 + $0x118] sm:$0xff] }
 0x488   : > { %v1665_v19 = vpop.f32.mrf.mxu1 }
 0x489   : > { %v1779_v39 = vmul.f32 0.088388346, %v1665_v19  ;;  %v1842_v19 = vld [vmem:[%s6473_s3 + $0xf0] sm:$0xff] }
 0x48a   : > { %v1669_v51 = vpop.f32.mrf.mxu1 }
 0x48b   : > { %v1780_v15 = vmul.f32 0.088388346, %v1669_v51 }
 0x48c   : > { %v1671_v27 = vpop.f32.mrf.mxu1 }
 0x48d   : > { %v1781_v43 = vmul.f32 0.088388346, %v1671_v27  ;;  %v1844_v27 = vld [vmem:[%s6473_s3 + $0x100] sm:$0xff] }
 0x48e   : > { %v1673_v55 = vpop.f32.mrf.mxu1 }
 0x48f   : > { %v5796_v49 = vadd.f32 %v1845_v29, %v1781_v43  ;;  %v1782_v36 = vmul.f32 0.088388346, %v1673_v55  ;;  %v1846_v43 = vld [vmem:[%s6473_s3 + $0x110] sm:$0xff]  ;;  %v1848_v55 = vld [vmem:[%s6473_s3 + $0x120] sm:$0xff] }
 0x490   : > { %v1675_v31 = vpop.f32.mrf.mxu1 }
 0x491   : > { %6522 = vst [vmem:[#allocation19_spill] sm:$0xff] %v5796_v49 }
 0x492   : > { %v1679_v60 = vpop.f32.mrf.mxu1 }
 0x494   : > { %2468 = vrot.lane.b32.xlu1 %v5470_v24, %s4794_s10  ;;  %v1681_v46 = vpop.f32.mrf.mxu1 }
 0x495   : > { %v1785_v51 = vmul.f32 0.088388346, %v1681_v46 }
 0x496   : > { %v1683_v0 = vpop.f32.mrf.mxu1 }
 0x498   : > { %v1685_v9 = vpop.f32.mrf.mxu1 }
 0x499   : > { %v1787_v29 = vmul.f32 0.088388346, %v1685_v9  ;;  %v1853_v9 = vld [vmem:[%s6473_s3 + $0x148] sm:$0xff] }
 0x49a   : > { %v1689_v57 = vpop.f32.mrf.mxu1 }
 0x49c   : > { %v1691_v34 = vpop.f32.mrf.mxu1 }
 0x49d   : > { %2454 = vrot.lane.b32.xlu0 %v5410_v45, %s4794_s10  ;;  %v1841_v45 = vld [vmem:[%s6473_s3 + $0xe8] sm:$0xff] }
 0x49e   : > { %v5752_v13 = vpop.f32.mrf.mxu1  ;;  %v5774_v14 = vadd.f32 %v1841_v45, %v1777_v21  ;;  %v1783_v21 = vmul.f32 0.088388346, %v1675_v31  ;;  %v5794_v45 = vadd.f32 %v1843_v42, %v1779_v39  ;;  %v5808_v31 = vadd.f32 %v1842_v19, %v1778_v50  ;;  %v1851_v50 = vld [vmem:[%s6473_s3 + $0x138] sm:$0xff] }
 0x49f   : > { %v5810_v39 = vadd.f32 %v1844_v27, %v1780_v15  ;;  %v1784_v42 = vmul.f32 0.088388346, %v1679_v60  ;;  %v1789_v15 = vmul.f32 0.088388346, %v1691_v34  ;;  %v5829_v27 = vadd.f32 %v1846_v43, %v1782_v36  ;;  %v1850_v34 = vld [vmem:[%s6473_s3 + $0x130] sm:$0xff] }
 0x4a0   : > { %v1695_v32 = vpop.f32.mrf.mxu1  ;;  %6521 = vst [vmem:[#allocation18_spill] sm:$0xff] %v5774_v14  ;;  %v1982_v25 = vmax.f32 %v5784_v20, %v5774_v14  ;;  %v5815_v46 = vadd.f32 %v1847_v10, %v1783_v21  ;;  %v5820_v14 = vadd.f32 %v1849_v16, %v1785_v51  ;;  %v1985_v19 = vmax.f32 %v5808_v31, %v5794_v45 }
 0x4a1   : > { %6523 = vst [vmem:[#allocation20_spill] sm:$0xff] %v5810_v39  ;;  %v1988_v60 = vmax.f32 %v5810_v39, %v5796_v49  ;;  %v1786_v21 = vmul.f32 0.088388346, %v1683_v0  ;;  %v5834_v10 = vadd.f32 %v1848_v55, %v1784_v42  ;;  %v1788_v51 = vmul.f32 0.088388346, %v1689_v57  ;;  %v1852_v0 = vld [vmem:[%s6473_s3 + $0x140] sm:$0xff] }
 0x4a2   : > { %v5754_v61 = vpop.f32.mrf.mxu1  ;;  %v1991_v36 = vmax.f32 %v5829_v27, %v5815_v46  ;;  %v5846_v43 = vadd.f32 %v1853_v9, %v1789_v15  ;;  %v1791_v42 = vmul.f32 0.088388346, %v1695_v32  ;;  %v1855_v57 = vld [vmem:[%s6473_s3 + $0x158] sm:$0xff]  ;;  %v1790_v15 = vmul.f32 0.088388346, %v5752_v13 }
 0x4a3   : > { %v1994_v49 = vmax.f32 %v5834_v10, %v5820_v14  ;;  %v5850_v39 = vadd.f32 %v1850_v34, %v1786_v21  ;;  %v1792_v32 = vmul.f32 0.088388346, %v5754_v61 }
 0x4a4   : > { %v1701_v62 = vpop.f32.mrf.mxu1  ;;  %6524 = vst [vmem:[#allocation21_spill] sm:$0xff] %v5846_v43  ;;  %v5871_v34 = vadd.f32 %v1855_v57, %v1791_v42  ;;  %v1858_v57 = vld [vmem:[%s6473_s3 + $0x170] sm:$0xff] }
 0x4a5   : > { %v1793_v55 = vmul.f32 0.088388346, %v1701_v62  ;;  %v1854_v62 = vld [vmem:[%s6473_s3 + $0x150] sm:$0xff] }
 0x4a6   : > { %v5756_v33 = vpop.f32.mrf.mxu1  ;;  %v5885_v42 = vadd.f32 %v1854_v62, %v1790_v15 }
 0x4a8   : > { %v5758_v1 = vpop.f32.mrf.mxu1 }
 0x4a9   : > { %v1795_v21 = vmul.f32 0.088388346, %v5758_v1  ;;  %v1861_v1 = vld [vmem:[%s6473_s3 + $0x188] sm:$0xff] }
 0x4aa   : > { %v5760_v23 = vpop.f32.mrf.mxu1 }
 0x4ac   : > { %v5762_v24 = vpop.f32.mrf.mxu1 }
 0x4ad   : > { %v1797_v61 = vmul.f32 0.088388346, %v5762_v24  ;;  %v1796_v24 = vmul.f32 0.088388346, %v5760_v23  ;;  %v2003_v23 = vmax.f32 %v5885_v42, %v5871_v34 }
 0x4ae   : > { %v5764_v7 = vpop.f32.mrf.mxu1 }
 0x4af   : > { %v5899_v15 = vadd.f32 %v1861_v1, %v1797_v61 }
 0x4b0   : > { %v5769_v2 = vpop.f32.mrf.mxu1 }
 0x4b2   : > { %v5776_v26 = vpop.f32.mrf.mxu1 }
 0x4b4   : > { %v5786_v6 = vpop.f32.mrf.mxu1 }
 0x4b5   : > { %v1801_v62 = vmul.f32 0.088388346, %v5786_v6  ;;  %v1862_v6 = vld [vmem:[%s6473_s3 + $0x190] sm:$0xff] }
 0x4b6   : > { %v5806_v3 = vpop.f32.mrf.mxu1 }
 0x4b8   : > { %1983 = vmax.xlane.f32.xlu1 %v1982_v25  ;;  %v1725_v16 = vpop.f32.mrf.mxu1  ;;  %v5839_v25 = vadd.f32 %v1851_v50, %v1787_v29  ;;  %v1857_v29 = vld [vmem:[%s6473_s3 + $0x168] sm:$0xff] }
 0x4b9   : > { %v5873_v13 = vadd.f32 %v1857_v29, %v1793_v55 }
 0x4ba   : > { %v1729_v50 = vpop.f32.mrf.mxu1  ;;  %v1997_v9 = vmax.f32 %v5850_v39, %v5839_v25 }
 0x4bb   : > { %6525 = vst [vmem:[#allocation22_spill] sm:$0xff] %v5873_v13 }
 0x4bc   : > { %1986 = vmax.xlane.f32.xlu0 %v1985_v19  ;;  %1989 = vmax.xlane.f32.xlu1 %v1988_v60  ;;  %v5858_v19 = vadd.f32 %v1852_v0, %v1788_v51  ;;  %v1856_v60 = vld [vmem:[%s6473_s3 + $0x160] sm:$0xff]  ;;  %v1794_v0 = vmul.f32 0.088388346, %v5756_v33 }
 0x4bd   : > { %v5887_v55 = vadd.f32 %v1856_v60, %v1792_v32  ;;  %v1860_v33 = vld [vmem:[%s6473_s3 + $0x180] sm:$0xff]  ;;  %v1863_v32 = vld [vmem:[%s6473_s3 + $0x198] sm:$0xff] }
 0x4be   : > { %v2000_v51 = vmax.f32 %v5858_v19, %v5846_v43  ;;  %v1799_v43 = vmul.f32 0.088388346, %v5769_v2  ;;  %v1865_v2 = vld [vmem:[%s6473_s3 + $0x1a8] sm:$0xff]  ;;  %v5915_v61 = vadd.f32 %v1860_v33, %v1796_v24  ;;  %v1803_v24 = vmul.f32 0.088388346, %v1725_v16 }
 0x4bf   : > { %6526 = vst [vmem:[#allocation23_spill] sm:$0xff] %v5887_v55  ;;  %v2006_v60 = vmax.f32 %v5887_v55, %v5873_v13  ;;  %v1804_v16 = vmul.f32 0.088388346, %v1729_v50  ;;  %v1871_v50 = vld [vmem:[%s6473_s3 + $0x1d8] sm:$0xff] }
 0x4c0   : > { %1992 = vmax.xlane.f32.xlu0 %v1991_v36  ;;  %1995 = vmax.xlane.f32.xlu1 %v1994_v49  ;;  %v1859_v49 = vld [vmem:[%s6473_s3 + $0x178] sm:$0xff]  ;;  %v1731_v36 = vpop.f32.mrf.mxu1  ;;  %v5921_v1 = vadd.f32 %v1863_v32, %v1799_v43  ;;  %v2012_v13 = vmax.f32 %v5915_v61, %v5899_v15  ;;  %v1869_v43 = vld [vmem:[%s6473_s3 + $0x1c8] sm:$0xff] }
 0x4c1   : > { %v5893_v29 = vadd.f32 %v1859_v49, %v1795_v21  ;;  %v5909_v21 = vadd.f32 %v1858_v57, %v1794_v0  ;;  %v5928_v57 = vadd.f32 %v1865_v2, %v1801_v62  ;;  %v1805_v33 = vmul.f32 0.088388346, %v1731_v36  ;;  %v1866_v36 = vld [vmem:[%s6473_s3 + $0x1b0] sm:$0xff] }
 0x4c2   : > { %v1733_v49 = vpop.f32.mrf.mxu1  ;;  %v1802_v62 = vmul.f32 0.088388346, %v5806_v3 }
 0x4c3   : > { %v2009_v0 = vmax.f32 %v5909_v21, %v5893_v29 }
 0x4c4   : > { %1998 = vmax.xlane.f32.xlu0 %v1997_v9  ;;  %2001 = vmax.xlane.f32.xlu1 %v2000_v51  ;;  %v1798_v9 = vmul.f32 0.088388346, %v5764_v7  ;;  %v1800_v51 = vmul.f32 0.088388346, %v5776_v26  ;;  %v1864_v7 = vld [vmem:[%s6473_s3 + $0x1a0] sm:$0xff]  ;;  %v1867_v26 = vld [vmem:[%s6473_s3 + $0x1b8] sm:$0xff]  ;;  %v1735_v32 = vpop.f32.mrf.mxu1 }
 0x4c5   : > { %v5951_v2 = vadd.f32 %v1867_v26, %v1803_v24  ;;  %v1870_v24 = vld [vmem:[%s6473_s3 + $0x1d0] sm:$0xff] }
 0x4c6   : > { %v5932_v55 = vadd.f32 %v1862_v6, %v1798_v9  ;;  %v5953_v6 = vadd.f32 %v1869_v43, %v1805_v33 }
 0x4c8   : > { %2004 = vmax.xlane.f32.xlu0 %v2003_v23  ;;  %2007 = vmax.xlane.f32.xlu1 %v2006_v60  ;;  %v5940_v23 = vadd.f32 %v1864_v7, %v1800_v51  ;;  %v1868_v60 = vld [vmem:[%s6473_s3 + $0x1c0] sm:$0xff]  ;;  %v2015_v9 = vmax.f32 %v5932_v55, %v5921_v1  ;;  %v1807_v51 = vmul.f32 0.088388346, %v1735_v32 }
 0x4c9   : > { %v5962_v7 = vadd.f32 %v1868_v60, %v1804_v16 }
 0x4ca   : > { %v2018_v3 = vmax.f32 %v5940_v23, %v5928_v57  ;;  %v5967_v33 = vadd.f32 %v1871_v50, %v1807_v51 }
 0x4cb   : > { %v2024_v43 = vmax.f32 %v5962_v7, %v5953_v6 }
 0x4cc   : > { %2010 = vmax.xlane.f32.xlu0 %v2009_v0  ;;  %2013 = vmax.xlane.f32.xlu1 %v2012_v13  ;;  %v5960_v13 = vadd.f32 %v1866_v36, %v1802_v62  ;;  %v1806_v0 = vmul.f32 0.088388346, %v1733_v49 }
 0x4ce   : > { %v2021_v26 = vmax.f32 %v5960_v13, %v5951_v2  ;;  %v5973_v32 = vadd.f32 %v1870_v24, %v1806_v0 }
 0x4d0   : > { %2016 = vmax.xlane.f32.xlu0 %v2015_v9  ;;  %2019 = vmax.xlane.f32.xlu1 %v2018_v3  ;;  %v2027_v49 = vmax.f32 %v5973_v32, %v5967_v33 }
 0x4d4   : > { %2022 = vmax.xlane.f32.xlu0 %v2021_v26  ;;  %2025 = vmax.xlane.f32.xlu1 %v2024_v43 }
 0x4d8   : > { %2028 = vmax.xlane.f32.xlu0 %v2027_v49 }
 0x4dc   : > { %v1942_v62 = vpop.xlane.xlu0 %1941 }
 0x4dd   : > { %v2036_v16 = vsub.f32 %v5586_v40, %v1942_v62  ;;  %v2037_v36 = vsub.f32 %v5588_v12, %v1942_v62 }
 0x4df   : > { %v2100_v60 = vmul.f32 1.442695, %v2036_v16  ;;  %v2102_v9 = vmul.f32 1.442695, %v2037_v36 }
 0x4e0   : > { %v1945_v51 = vpop.xlane.xlu1 %1944 }
 0x4e1   : > { %4471 = vpow2.f32 %v2100_v60  ;;  %v2038_v3 = vsub.f32 %v5598_v59, %v1945_v51  ;;  %v2039_v50 = vsub.f32 %v5600_v4, %v1945_v51 }
 0x4e2   : > { %4473 = vpow2.f32 %v2102_v9 }
 0x4e3   : > { %v2104_v0 = vmul.f32 1.442695, %v2038_v3  ;;  %v2106_v24 = vmul.f32 1.442695, %v2039_v50 }
 0x4e4   : > { %v1948_v26 = vpop.xlane.xlu0 %1947 }
 0x4e5   : > { %4475 = vpow2.f32 %v2104_v0  ;;  %v2040_v43 = vsub.f32 %v5610_v28, %v1948_v26  ;;  %v2041_v49 = vsub.f32 %v5612_v41, %v1948_v26  ;;  %2452 = vrot.lane.b32.xlu1 %v5412_v56, %s4794_s10 }
 0x4e6   : > { %4477 = vpow2.f32 %v2106_v24 }
 0x4e7   : > { %v2108_v40 = vmul.f32 1.442695, %v2040_v43  ;;  %v2110_v12 = vmul.f32 1.442695, %v2041_v49 }
 0x4e8   : > { %v1951_v62 = vpop.xlane.xlu0 %1950 }
 0x4e9   : > { %4479 = vpow2.f32 %v2108_v40  ;;  %v2042_v59 = vsub.f32 %v5622_v54, %v1951_v62  ;;  %v2043_v4 = vsub.f32 %v5624_v44, %v1951_v62 }
 0x4ea   : > { %4481 = vpow2.f32 %v2110_v12 }
 0x4eb   : > { %v2112_v16 = vmul.f32 1.442695, %v2042_v59  ;;  %v2114_v36 = vmul.f32 1.442695, %v2043_v4  ;;  %v1739_v4 = vpop.f32.mrf.mxu1 }
 0x4ec   : > { %v1954_v60 = vpop.xlane.xlu1 %1953 }
 0x4ed   : > { %4483 = vpow2.f32 %v2112_v16  ;;  %v2044_v28 = vsub.f32 %v5634_v47, %v1954_v60  ;;  %v2045_v41 = vsub.f32 %v5636_v18, %v1954_v60 }
 0x4ee   : > { %v5989_v9 = vpop.eup %4471  ;;  %4485 = vpow2.f32 %v2114_v36 }
 0x4ef   : > { %v5991_v56 = vpop.eup %4473  ;;  %v2116_v51 = vmul.f32 1.442695, %v2044_v28  ;;  %v2118_v3 = vmul.f32 1.442695, %v2045_v41 }
 0x4f0   : > { %v1957_v50 = vpop.xlane.xlu0 %1956  ;;  %v2228_v54 = vadd.f32 %v5991_v56, %v5989_v9 }
 0x4f1   : > { %4487 = vpow2.f32 %v2116_v51  ;;  %v2046_v44 = vsub.f32 %v5646_v58, %v1957_v50  ;;  %v2047_v0 = vsub.f32 %v5648_v52, %v1957_v50 }
 0x4f2   : > { %v5997_v24 = vpop.eup %4475  ;;  %4489 = vpow2.f32 %v2118_v3  ;;  %2229 = vadd.xlane.f32.xlu0 %v2228_v54  ;;  %v1741_v3 = vpop.f32.mrf.mxu1 }
 0x4f3   : > { %v5999_v47 = vpop.eup %4477  ;;  %v2120_v18 = vmul.f32 1.442695, %v2046_v44  ;;  %v2122_v26 = vmul.f32 1.442695, %v2047_v0 }
 0x4f4   : > { %v1960_v43 = vpop.xlane.xlu1 %1959  ;;  %v2231_v49 = vadd.f32 %v5999_v47, %v5997_v24 }
 0x4f5   : > { %4491 = vpow2.f32 %v2120_v18  ;;  %v2048_v40 = vsub.f32 %v5658_v11, %v1960_v43  ;;  %v2049_v12 = vsub.f32 %v5660_v35, %v1960_v43  ;;  %v1809_v18 = vmul.f32 0.088388346, %v1741_v3 }
 0x4f6   : > { %v6005_v58 = vpop.eup %4479  ;;  %4493 = vpow2.f32 %v2122_v26  ;;  %2232 = vadd.xlane.f32.xlu0 %v2231_v49  ;;  %v1873_v49 = vld [vmem:[%s6473_s3 + $0x1e8] sm:$0xff] }
 0x4f7   : > { %v6007_v52 = vpop.eup %4481  ;;  %v2124_v62 = vmul.f32 1.442695, %v2048_v40  ;;  %v2126_v59 = vmul.f32 1.442695, %v2049_v12 }
 0x4f8   : > { %v1963_v16 = vpop.xlane.xlu0 %1962  ;;  %v2234_v36 = vadd.f32 %v6007_v52, %v6005_v58 }
 0x4f9   : > { %4495 = vpow2.f32 %v2124_v62  ;;  %v2050_v60 = vsub.f32 %v5670_v48, %v1963_v16  ;;  %v2051_v11 = vsub.f32 %v5672_v38, %v1963_v16  ;;  %v1743_v62 = vpop.f32.mrf.mxu1 }
 0x4fa   : > { %v6013_v28 = vpop.eup %4483  ;;  %4497 = vpow2.f32 %v2126_v59  ;;  %2235 = vadd.xlane.f32.xlu0 %v2234_v36  ;;  %v1872_v36 = vld [vmem:[%s6473_s3 + $0x1e0] sm:$0xff] }
 0x4fb   : > { %v6015_v35 = vpop.eup %4485  ;;  %v2128_v41 = vmul.f32 1.442695, %v2050_v60  ;;  %v2130_v51 = vmul.f32 1.442695, %v2051_v11  ;;  %v6039_v11 = vadd.f32 %v1873_v49, %v1809_v18 }
 0x4fc   : > { %v1966_v50 = vpop.xlane.xlu1 %1965  ;;  %v2237_v54 = vadd.f32 %v6015_v35, %v6013_v28 }
 0x4fd   : > { %4499 = vpow2.f32 %v2128_v41  ;;  %v2052_v44 = vsub.f32 %v5682_v53, %v1966_v50  ;;  %v2053_v48 = vsub.f32 %v5684_v5, %v1966_v50  ;;  %v1808_v53 = vmul.f32 0.088388346, %v1739_v4 }
 0x4fe   : > { %v6021_v0 = vpop.eup %4487  ;;  %4501 = vpow2.f32 %v2130_v51  ;;  %2238 = vadd.xlane.f32.xlu0 %v2237_v54 }
 0x4ff   : > { %v6023_v38 = vpop.eup %4489  ;;  %v2132_v26 = vmul.f32 1.442695, %v2052_v44  ;;  %v2134_v43 = vmul.f32 1.442695, %v2053_v48  ;;  %v6043_v3 = vadd.f32 %v1872_v36, %v1808_v53 }
 0x500   : > { %v1969_v40 = vpop.xlane.xlu0 %1968  ;;  %v2240_v12 = vadd.f32 %v6023_v38, %v6021_v0 }
 0x501   : > { %4503 = vpow2.f32 %v2132_v26  ;;  %v2054_v5 = vsub.f32 %v5694_v17, %v1969_v40  ;;  %v2055_v59 = vsub.f32 %v5696_v8, %v1969_v40  ;;  %v1745_v8 = vpop.f32.mrf.mxu1 }
 0x502   : > { %v6032_v16 = vpop.eup %4491  ;;  %4505 = vpow2.f32 %v2134_v43  ;;  %2241 = vadd.xlane.f32.xlu0 %v2240_v12  ;;  %v2030_v43 = vmax.f32 %v6043_v3, %v6039_v11  ;;  %v1811_v49 = vmul.f32 0.088388346, %v1745_v8 }
 0x503   : > { %v6037_v60 = vpop.eup %4493  ;;  %v2136_v41 = vmul.f32 1.442695, %v2054_v5  ;;  %v2138_v4 = vmul.f32 1.442695, %v2055_v59  ;;  %v1810_v59 = vmul.f32 0.088388346, %v1743_v62 }
 0x504   : > { %v1972_v51 = vpop.xlane.xlu1 %1971  ;;  %v2243_v17 = vadd.f32 %v6037_v60, %v6032_v16  ;;  %v6528_v62 = vld [vmem:[#allocation15_spill] sm:$0xff] }
 0x505   : > { %4507 = vpow2.f32 %v2136_v41  ;;  %v2056_v50 = vsub.f32 %v5706_v22, %v1972_v51  ;;  %v2057_v54 = vsub.f32 %v5708_v30, %v1972_v51  ;;  %v1875_v22 = vld [vmem:[%s6473_s3 + $0x1f8] sm:$0xff]  ;;  %v1874_v41 = vld [vmem:[%s6473_s3 + $0x1f0] sm:$0xff] }
 0x506   : > { %v6047_v44 = vpop.eup %4495  ;;  %4509 = vpow2.f32 %v2138_v4  ;;  %2244 = vadd.xlane.f32.xlu0 %v2243_v17  ;;  %v6067_v17 = vadd.f32 %v1875_v22, %v1811_v49 }
 0x507   : > { %v6049_v48 = vpop.eup %4497  ;;  %v2140_v18 = vmul.f32 1.442695, %v2056_v50  ;;  %v2142_v26 = vmul.f32 1.442695, %v2057_v54 }
 0x508   : > { %v1975_v40 = vpop.xlane.xlu0 %1974  ;;  %v2246_v12 = vadd.f32 %v6049_v48, %v6047_v44 }
 0x509   : > { %4511 = vpow2.f32 %v2140_v18  ;;  %v2058_v30 = vsub.f32 %v5718_v37, %v1975_v40  ;;  %v2059_v53 = vsub.f32 %v5720_v63, %v1975_v40  ;;  %2031 = vmax.xlane.f32.xlu1 %v2030_v43  ;;  %v6527_v63 = vld [vmem:[#allocation14_spill] sm:$0xff] }
 0x50a   : > { %v6060_v5 = vpop.eup %4499  ;;  %4513 = vpow2.f32 %v2142_v26  ;;  %2247 = vadd.xlane.f32.xlu0 %v2246_v12  ;;  %v6075_v26 = vadd.f32 %v1874_v41, %v1810_v59 }
 0x50b   : > { %v6062_v36 = vpop.eup %4501  ;;  %v2144_v4 = vmul.f32 1.442695, %v2058_v30  ;;  %v2146_v51 = vmul.f32 1.442695, %v2059_v53  ;;  %v6531_v53 = vld [vmem:[#allocation16_spill] sm:$0xff] }
 0x50c   : > { %v1978_v8 = vpop.xlane.xlu1 %1977  ;;  %v2249_v37 = vadd.f32 %v6062_v36, %v6060_v5  ;;  %v2033_v22 = vmax.f32 %v6075_v26, %v6067_v17 }
 0x50d   : > { %4515 = vpow2.f32 %v2144_v4  ;;  %v2060_v50 = vsub.f32 %v6527_v63, %v1978_v8  ;;  %v2061_v54 = vsub.f32 %v6528_v62, %v1978_v8  ;;  %v6532_v8 = vld [vmem:[#allocation17_spill] sm:$0xff] }
 0x50e   : > { %v6073_v18 = vpop.eup %4503  ;;  %4517 = vpow2.f32 %v2146_v51  ;;  %2250 = vadd.xlane.f32.xlu0 %v2249_v37 }
 0x50f   : > { %6529 = vst [vmem:[#allocation14_spill] sm:$0xff] %v6073_v18  ;;  %v6077_v43 = vpop.eup %4505  ;;  %v2148_v40 = vmul.f32 1.442695, %v2060_v50  ;;  %v2150_v49 = vmul.f32 1.442695, %v2061_v54 }
 0x510   : > { %6530 = vst [vmem:[#allocation15_spill] sm:$0xff] %v6077_v43  ;;  %v1981_v12 = vpop.xlane.xlu0 %1980  ;;  %v2252_v30 = vadd.f32 %v6077_v43, %v6073_v18  ;;  %v2469_v54 = vpop.permute.xlu1 %2468  ;;  %v6545_v18 = vld [vmem:[#allocation19_spill] sm:$0xff] }
 0x511   : > { %4519 = vpow2.f32 %v2148_v40  ;;  %v2062_v4 = vsub.f32 %v6531_v53, %v1981_v12  ;;  %v2063_v63 = vsub.f32 %v6532_v8, %v1981_v12 }
 0x512   : > { %v6085_v59 = vpop.eup %4507  ;;  %4521 = vpow2.f32 %v2150_v49  ;;  %2034 = vmax.xlane.f32.xlu0 %v2033_v22  ;;  %2253 = vadd.xlane.f32.xlu1 %v2252_v30 }
 0x513   : > { %6533 = vst [vmem:[#allocation16_spill] sm:$0xff] %v6085_v59  ;;  %v6087_v41 = vpop.eup %4509  ;;  %v2152_v51 = vmul.f32 1.442695, %v2062_v4  ;;  %v2154_v37 = vmul.f32 1.442695, %v2063_v63 }
 0x514   : > { %6534 = vst [vmem:[#allocation17_spill] sm:$0xff] %v6087_v41  ;;  %v2455_v50 = vpop.permute.xlu0 %2454  ;;  %v2255_v62 = vadd.f32 %v6087_v41, %v6085_v59 }
 0x515   : > { %4523 = vpow2.f32 %v2152_v51  ;;  %4089 = vmatpush3.bf16.msra.mxu0 %v2455_v50 }
 0x516   : > { %v6091_v40 = vpop.eup %4511  ;;  %4525 = vpow2.f32 %v2154_v37  ;;  %2256 = vadd.xlane.f32.xlu0 %v2255_v62  ;;  %4090 = vmatprep.subr.bf16.mxu0 %v2469_v54 }
 0x517   : > { %6535 = vst [vmem:[#allocation24_spill] sm:$0xff] %v6091_v40  ;;  %v6093_v12 = vpop.eup %4513 }
 0x518   : > { %6536 = vst [vmem:[#allocation25_spill] sm:$0xff] %v6093_v12  ;;  %v2258_v49 = vadd.f32 %v6093_v12, %v6091_v40 }
 0x51a   : > { %v6097_v22 = vpop.eup %4515  ;;  %2259 = vadd.xlane.f32.xlu1 %v2258_v49  ;;  %v6543_v49 = vld [vmem:[#allocation18_spill] sm:$0xff] }
 0x51b   : > { %6537 = vst [vmem:[#allocation26_spill] sm:$0xff] %v6097_v22  ;;  %v6099_v30 = vpop.eup %4517 }
 0x51c   : > { %6538 = vst [vmem:[#allocation27_spill] sm:$0xff] %v6099_v30  ;;  %v2261_v53 = vadd.f32 %v6099_v30, %v6097_v22 }
 0x51e   : > { %v6103_v4 = vpop.eup %4519  ;;  %2262 = vadd.xlane.f32.xlu0 %v2261_v53 }
 0x51f   : > { %6539 = vst [vmem:[#allocation28_spill] sm:$0xff] %v6103_v4  ;;  %v6105_v8 = vpop.eup %4521 }
 0x520   : > { %6540 = vst [vmem:[#allocation29_spill] sm:$0xff] %v6105_v8  ;;  %v2264_v63 = vadd.f32 %v6105_v8, %v6103_v4  ;;  %v6544_v8 = vld [vmem:[#allocation20_spill] sm:$0xff] }
 0x522   : > { %v6109_v51 = vpop.eup %4523  ;;  %2265 = vadd.xlane.f32.xlu1 %v2264_v63 }
 0x523   : > { %6541 = vst [vmem:[#allocation30_spill] sm:$0xff] %v6109_v51  ;;  %v6111_v37 = vpop.eup %4525 }
 0x524   : > { %6542 = vst [vmem:[#allocation31_spill] sm:$0xff] %v6111_v37  ;;  %v2267_v50 = vadd.f32 %v6111_v37, %v6109_v51 }
 0x526   : > { %2268 = vadd.xlane.f32.xlu0 %v2267_v50 }
 0x541   : > { %v1984_v62 = vpop.xlane.xlu1 %1983 }
 0x542   : > { %v2064_v54 = vsub.f32 %v5784_v20, %v1984_v62  ;;  %v2065_v40 = vsub.f32 %v6543_v49, %v1984_v62 }
 0x544   : > { %v2156_v53 = vmul.f32 1.442695, %v2064_v54  ;;  %v2158_v22 = vmul.f32 1.442695, %v2065_v40 }
 0x545   : > { %v1987_v30 = vpop.xlane.xlu0 %1986  ;;  %v1990_v12 = vpop.xlane.xlu1 %1989 }
 0x546   : > { %4527 = vpow2.f32 %v2156_v53  ;;  %v2066_v4 = vsub.f32 %v5808_v31, %v1987_v30  ;;  %v2067_v63 = vsub.f32 %v5794_v45, %v1987_v30  ;;  %v2068_v59 = vsub.f32 %v6544_v8, %v1990_v12 }
 0x547   : > { %4529 = vpow2.f32 %v2158_v22  ;;  %v2069_v51 = vsub.f32 %v6545_v18, %v1990_v12 }
 0x548   : > { %v2160_v50 = vmul.f32 1.442695, %v2066_v4  ;;  %v2162_v37 = vmul.f32 1.442695, %v2067_v63  ;;  %v2164_v41 = vmul.f32 1.442695, %v2068_v59 }
 0x549   : > { %v2166_v20 = vmul.f32 1.442695, %v2069_v51  ;;  %v1993_v43 = vpop.xlane.xlu0 %1992  ;;  %v1996_v62 = vpop.xlane.xlu1 %1995 }
 0x54a   : > { %4531 = vpow2.f32 %v2160_v50  ;;  %v2070_v40 = vsub.f32 %v5829_v27, %v1993_v43  ;;  %v2071_v54 = vsub.f32 %v5815_v46, %v1993_v43  ;;  %v2072_v31 = vsub.f32 %v5834_v10, %v1996_v62  ;;  %v6546_v10 = vld [vmem:[#allocation21_spill] sm:$0xff]  ;;  %v6547_v50 = vld [vmem:[#allocation23_spill] sm:$0xff] }
 0x54b   : > { %4533 = vpow2.f32 %v2162_v37  ;;  %v2073_v45 = vsub.f32 %v5820_v14, %v1996_v62 }
 0x54c   : > { %4535 = vpow2.f32 %v2164_v41  ;;  %v2168_v22 = vmul.f32 1.442695, %v2070_v40  ;;  %v2170_v30 = vmul.f32 1.442695, %v2071_v54  ;;  %v2172_v18 = vmul.f32 1.442695, %v2072_v31 }
 0x54d   : > { %4537 = vpow2.f32 %v2166_v20  ;;  %v2174_v12 = vmul.f32 1.442695, %v2073_v45  ;;  %v1999_v59 = vpop.xlane.xlu0 %1998  ;;  %v2002_v4 = vpop.xlane.xlu1 %2001 }
 0x54e   : > { %4539 = vpow2.f32 %v2168_v22  ;;  %v2074_v8 = vsub.f32 %v5850_v39, %v1999_v59  ;;  %v2075_v27 = vsub.f32 %v5839_v25, %v1999_v59  ;;  %v2076_v46 = vsub.f32 %v5858_v19, %v2002_v4  ;;  %v6548_v19 = vld [vmem:[#allocation22_spill] sm:$0xff] }
 0x54f   : > { %4541 = vpow2.f32 %v2170_v30  ;;  %v2077_v43 = vsub.f32 %v6546_v10, %v2002_v4 }
 0x550   : > { %4543 = vpow2.f32 %v2172_v18  ;;  %v2176_v14 = vmul.f32 1.442695, %v2074_v8  ;;  %v2178_v41 = vmul.f32 1.442695, %v2075_v27  ;;  %v2180_v51 = vmul.f32 1.442695, %v2076_v46 }
 0x551   : > { %4545 = vpow2.f32 %v2174_v12  ;;  %v2182_v37 = vmul.f32 1.442695, %v2077_v43  ;;  %v2005_v49 = vpop.xlane.xlu0 %2004  ;;  %v2008_v53 = vpop.xlane.xlu1 %2007 }
 0x552   : > { %4547 = vpow2.f32 %v2176_v14  ;;  %v2078_v63 = vsub.f32 %v5885_v42, %v2005_v49  ;;  %v2079_v39 = vsub.f32 %v5871_v34, %v2005_v49  ;;  %v2080_v25 = vsub.f32 %v6547_v50, %v2008_v53 }
 0x553   : > { %v6132_v20 = vpop.eup %4527  ;;  %4549 = vpow2.f32 %v2178_v41  ;;  %v2081_v62 = vsub.f32 %v6548_v19, %v2008_v53 }
 0x554   : > { %v6135_v40 = vpop.eup %4529  ;;  %4551 = vpow2.f32 %v2180_v51  ;;  %v2184_v54 = vmul.f32 1.442695, %v2078_v63  ;;  %v2186_v31 = vmul.f32 1.442695, %v2079_v39  ;;  %v2188_v45 = vmul.f32 1.442695, %v2080_v25 }
 0x555   : > { %4553 = vpow2.f32 %v2182_v37  ;;  %v2190_v22 = vmul.f32 1.442695, %v2081_v62  ;;  %v2011_v30 = vpop.xlane.xlu0 %2010  ;;  %v2014_v18 = vpop.xlane.xlu1 %2013  ;;  %v2270_v34 = vadd.f32 %v6135_v40, %v6132_v20 }
 0x556   : > { %4555 = vpow2.f32 %v2184_v54  ;;  %v2082_v42 = vsub.f32 %v5909_v21, %v2011_v30  ;;  %v2083_v12 = vsub.f32 %v5893_v29, %v2011_v30  ;;  %v2084_v59 = vsub.f32 %v5915_v61, %v2014_v18 }
 0x557   : > { %v6142_v4 = vpop.eup %4531  ;;  %4557 = vpow2.f32 %v2186_v31  ;;  %v2085_v8 = vsub.f32 %v5899_v15, %v2014_v18  ;;  %2271 = vadd.xlane.f32.xlu1 %v2270_v34 }
 0x558   : > { %v6145_v27 = vpop.eup %4533  ;;  %4559 = vpow2.f32 %v2188_v45  ;;  %v2192_v46 = vmul.f32 1.442695, %v2082_v42  ;;  %v2194_v10 = vmul.f32 1.442695, %v2083_v12  ;;  %v2196_v43 = vmul.f32 1.442695, %v2084_v59 }
 0x559   : > { %v6147_v14 = vpop.eup %4535  ;;  %4561 = vpow2.f32 %v2190_v22  ;;  %v2198_v21 = vmul.f32 1.442695, %v2085_v8  ;;  %v2017_v41 = vpop.xlane.xlu0 %2016  ;;  %v2273_v61 = vadd.f32 %v6145_v27, %v6142_v4 }
 0x55a   : > { %v2020_v29 = vpop.xlane.xlu1 %2019  ;;  %v6151_v51 = vpop.eup %4537  ;;  %4563 = vpow2.f32 %v2192_v46  ;;  %v2086_v15 = vsub.f32 %v5932_v55, %v2017_v41  ;;  %v2087_v37 = vsub.f32 %v5921_v1, %v2017_v41 }
 0x55b   : > { %v2088_v49 = vsub.f32 %v5940_v23, %v2020_v29  ;;  %v6156_v53 = vpop.eup %4539  ;;  %4565 = vpow2.f32 %v2194_v10  ;;  %v2089_v63 = vsub.f32 %v5928_v57, %v2020_v29  ;;  %2274 = vadd.xlane.f32.xlu0 %v2273_v61  ;;  %v2276_v39 = vadd.f32 %v6151_v51, %v6147_v14 }
 0x55c   : > { %v6161_v50 = vpop.eup %4541  ;;  %4567 = vpow2.f32 %v2196_v43  ;;  %v2200_v25 = vmul.f32 1.442695, %v2086_v15  ;;  %v2202_v19 = vmul.f32 1.442695, %v2087_v37 }
 0x55d   : > { %v2204_v62 = vmul.f32 1.442695, %v2088_v49  ;;  %v6163_v55 = vpop.eup %4543  ;;  %4569 = vpow2.f32 %v2198_v21  ;;  %v2206_v1 = vmul.f32 1.442695, %v2089_v63  ;;  %2277 = vadd.xlane.f32.xlu1 %v2276_v39  ;;  %v2023_v23 = vpop.xlane.xlu0 %2022  ;;  %v2279_v57 = vadd.f32 %v6161_v50, %v6156_v53 }
 0x55e   : > { %v2026_v54 = vpop.xlane.xlu1 %2025  ;;  %v6167_v31 = vpop.eup %4545  ;;  %4571 = vpow2.f32 %v2200_v25  ;;  %v2090_v45 = vsub.f32 %v5960_v13, %v2023_v23  ;;  %v2091_v22 = vsub.f32 %v5951_v2, %v2023_v23 }
 0x55f   : > { %v2092_v30 = vsub.f32 %v5962_v7, %v2026_v54  ;;  %v6172_v18 = vpop.eup %4547  ;;  %4573 = vpow2.f32 %v2202_v19  ;;  %v2093_v34 = vsub.f32 %v5953_v6, %v2026_v54  ;;  %2280 = vadd.xlane.f32.xlu0 %v2279_v57  ;;  %v2282_v42 = vadd.f32 %v6167_v31, %v6163_v55 }
 0x560   : > { %v6177_v12 = vpop.eup %4549  ;;  %4575 = vpow2.f32 %v2204_v62  ;;  %v2208_v59 = vmul.f32 1.442695, %v2090_v45  ;;  %v2210_v8 = vmul.f32 1.442695, %v2091_v22 }
 0x561   : > { %v2212_v46 = vmul.f32 1.442695, %v2092_v30  ;;  %v6179_v13 = vpop.eup %4551  ;;  %4577 = vpow2.f32 %v2206_v1  ;;  %v2214_v2 = vmul.f32 1.442695, %v2093_v34  ;;  %2283 = vadd.xlane.f32.xlu1 %v2282_v42  ;;  %v2029_v7 = vpop.xlane.xlu0 %2028  ;;  %v2285_v6 = vadd.f32 %v6177_v12, %v6172_v18 }
 0x562   : > { %v2453_v10 = vpop.permute.xlu1 %2452  ;;  %v6183_v43 = vpop.eup %4553  ;;  %4579 = vpow2.f32 %v2208_v59  ;;  %v2094_v21 = vsub.f32 %v5973_v32, %v2029_v7  ;;  %v2095_v41 = vsub.f32 %v5967_v33, %v2029_v7 }
 0x563   : > { %4091 = vmatpush3.bf16.msra.mxu0 %v2453_v10  ;;  %v6187_v29 = vpop.eup %4555  ;;  %4581 = vpow2.f32 %v2210_v8  ;;  %2286 = vadd.xlane.f32.xlu0 %v2285_v6  ;;  %v2288_v61 = vadd.f32 %v6183_v43, %v6179_v13 }
 0x564   : > { %v6191_v15 = vpop.eup %4557  ;;  %4583 = vpow2.f32 %v2212_v46  ;;  %v2216_v37 = vmul.f32 1.442695, %v2094_v21  ;;  %v2218_v49 = vmul.f32 1.442695, %v2095_v41 }
 0x565   : > { %v6193_v63 = vpop.eup %4559  ;;  %4585 = vpow2.f32 %v2214_v2  ;;  %2289 = vadd.xlane.f32.xlu1 %v2288_v61  ;;  %v2291_v33 = vadd.f32 %v6191_v15, %v6187_v29 }
 0x566   : > { %v6197_v32 = vpop.eup %4561  ;;  %4587 = vpow2.f32 %v2216_v37 }
 0x567   : > { %v6199_v39 = vpop.eup %4563  ;;  %4589 = vpow2.f32 %v2218_v49  ;;  %2292 = vadd.xlane.f32.xlu0 %v2291_v33  ;;  %v2294_v25 = vadd.f32 %v6197_v32, %v6193_v63 }
 0x568   : > { %v6203_v19 = vpop.eup %4565 }
 0x569   : > { %v6205_v62 = vpop.eup %4567  ;;  %2295 = vadd.xlane.f32.xlu1 %v2294_v25  ;;  %v2297_v1 = vadd.f32 %v6203_v19, %v6199_v39 }
 0x56a   : > { %v6209_v23 = vpop.eup %4569 }
 0x56b   : > { %v6211_v54 = vpop.eup %4571  ;;  %2298 = vadd.xlane.f32.xlu0 %v2297_v1  ;;  %v2300_v57 = vadd.f32 %v6209_v23, %v6205_v62 }
 0x56c   : > { %v6215_v45 = vpop.eup %4573 }
 0x56d   : > { %v6217_v22 = vpop.eup %4575  ;;  %2301 = vadd.xlane.f32.xlu1 %v2300_v57  ;;  %v2303_v30 = vadd.f32 %v6215_v45, %v6211_v54 }
 0x56e   : > { %v6221_v34 = vpop.eup %4577 }
 0x56f   : > { %v6223_v42 = vpop.eup %4579  ;;  %2304 = vadd.xlane.f32.xlu0 %v2303_v30  ;;  %v2306_v59 = vadd.f32 %v6221_v34, %v6217_v22 }
 0x570   : > { %v6227_v8 = vpop.eup %4581 }
 0x571   : > { %v6229_v46 = vpop.eup %4583  ;;  %2307 = vadd.xlane.f32.xlu1 %v2306_v59  ;;  %v2309_v2 = vadd.f32 %v6227_v8, %v6223_v42 }
 0x572   : > { %6549 = vst [vmem:[#allocation18_spill] sm:$0xff] %v6229_v46  ;;  %v6233_v7 = vpop.eup %4585 }
 0x573   : > { %6550 = vst [vmem:[#allocation20_spill] sm:$0xff] %v6233_v7  ;;  %v6235_v10 = vpop.eup %4587  ;;  %2310 = vadd.xlane.f32.xlu0 %v2309_v2  ;;  %v2312_v6 = vadd.f32 %v6233_v7, %v6229_v46 }
 0x574   : > { %6551 = vst [vmem:[#allocation19_spill] sm:$0xff] %v6235_v10  ;;  %v6239_v21 = vpop.eup %4589 }
 0x575   : > { %2313 = vadd.xlane.f32.xlu1 %v2312_v6  ;;  %v2315_v41 = vadd.f32 %v6239_v21, %v6235_v10 }
 0x577   : > { %2316 = vadd.xlane.f32.xlu0 %v2315_v41 }
 0x57b   : > { %v2230_v61 = vpop.xlane.xlu0 %2229 }
 0x57c   : > { %4591 = vrcp.f32 %v2230_v61 }
 0x57f   : > { %v2233_v37 = vpop.xlane.xlu0 %2232 }
 0x580   : > { %4593 = vrcp.f32 %v2233_v37 }
 0x583   : > { %v2236_v49 = vpop.xlane.xlu0 %2235 }
 0x584   : > { %4595 = vrcp.f32 %v2236_v49 }
 0x587   : > { %v2239_v33 = vpop.xlane.xlu0 %2238 }
 0x588   : > { %4597 = vrcp.f32 %v2239_v33 }
 0x589   : > { %v4592_v25 = vpop.eup %4591 }
 0x58a   : > { %v2357_v30 = vmul.f32 %v4592_v25, %v5991_v56  ;;  %v2356_v2 = vmul.f32 %v4592_v25, %v5989_v9 }
 0x58b   : > { %v2242_v1 = vpop.xlane.xlu0 %2241 }
 0x58c   : > { %4599 = vrcp.f32 %v2242_v1 }
 0x58d   : > { %v4594_v57 = vpop.eup %4593 }
 0x58e   : > { %v2359_v59 = vmul.f32 %v4594_v57, %v5999_v47  ;;  %v2358_v6 = vmul.f32 %v4594_v57, %v5997_v24 }
 0x58f   : > { %v2245_v41 = vpop.xlane.xlu0 %2244 }
 0x590   : > { %4601 = vrcp.f32 %v2245_v41  ;;  %v2421_v61 = vpack.c.bf16 %v2359_v59, %v2357_v30  ;;  %v2420_v37 = vpack.c.bf16 %v2358_v6, %v2356_v2 }
 0x591   : > { %v4596_v46 = vpop.eup %4595 }
 0x592   : > { %2532 = vmatprep.mubr.bf16.mxu0 %v2421_v61  ;;  %v2032_v49 = vpop.xlane.xlu1 %2031  ;;  %v2361_v9 = vmul.f32 %v4596_v46, %v6007_v52  ;;  %v2360_v25 = vmul.f32 %v4596_v46, %v6005_v58 }
 0x593   : > { %v2248_v33 = vpop.xlane.xlu0 %2247  ;;  %2533 = vmatmul.mubr.bf16.vlgmr.msra.gmra.mxu0 %v2420_v37  ;;  %v2096_v10 = vsub.f32 %v6043_v3, %v2032_v49  ;;  %v2097_v1 = vsub.f32 %v6039_v11, %v2032_v49 }
 0x594   : > { %4603 = vrcp.f32 %v2248_v33 }
 0x595   : > { %v4598_v56 = vpop.eup %4597  ;;  %v2220_v7 = vmul.f32 1.442695, %v2096_v10  ;;  %v2222_v47 = vmul.f32 1.442695, %v2097_v1 }
 0x596   : > { %v2363_v24 = vmul.f32 %v4598_v56, %v6015_v35  ;;  %v2362_v57 = vmul.f32 %v4598_v56, %v6013_v28 }
 0x597   : > { %4605 = vpow2.f32 %v2220_v7  ;;  %v2251_v30 = vpop.xlane.xlu0 %2250 }
 0x598   : > { %4607 = vpow2.f32 %v2222_v47  ;;  %v2423_v59 = vpack.c.bf16 %v2363_v24, %v2361_v9  ;;  %v2422_v2 = vpack.c.bf16 %v2362_v57, %v2360_v25 }
 0x599   : > { %4609 = vrcp.f32 %v2251_v30  ;;  %v4600_v3 = vpop.eup %4599 }
 0x59a   : > { %2540 = vmatprep.mubr.bf16.mxu0 %v2423_v59  ;;  %v2365_v58 = vmul.f32 %v4600_v3, %v6023_v38  ;;  %v2364_v28 = vmul.f32 %v4600_v3, %v6021_v0 }
 0x59b   : > { %v2035_v11 = vpop.xlane.xlu0 %2034  ;;  %2541 = vmatmul.mubr.bf16.gmra.mxu0 %v2422_v2  ;;  %v2254_v6 = vpop.xlane.xlu1 %2253 }
 0x59c   : > { %v2098_v10 = vsub.f32 %v6075_v26, %v2035_v11  ;;  %v2099_v52 = vsub.f32 %v6067_v17, %v2035_v11  ;;  %4611 = vrcp.f32 %v2254_v6  ;;  %v6554_v6 = vld [vmem:[#allocation14_spill] sm:$0xff] }
 0x59d   : > { %v4602_v35 = vpop.eup %4601 }
 0x59e   : > { %v2224_v46 = vmul.f32 1.442695, %v2098_v10  ;;  %v2226_v7 = vmul.f32 1.442695, %v2099_v52  ;;  %v2367_v41 = vmul.f32 %v4602_v35, %v6037_v60  ;;  %v2366_v61 = vmul.f32 %v4602_v35, %v6032_v16  ;;  %v6553_v10 = vld [vmem:[#allocation17_spill] sm:$0xff] }
 0x59f   : > { %v2257_v37 = vpop.xlane.xlu0 %2256 }
 0x5a0   : > { %4613 = vpow2.f32 %v2224_v46  ;;  %v2425_v49 = vpack.c.bf16 %v2367_v41, %v2365_v58  ;;  %v2424_v33 = vpack.c.bf16 %v2366_v61, %v2364_v28  ;;  %v6555_v58 = vld [vmem:[#allocation16_spill] sm:$0xff] }
 0x5a1   : > { %4615 = vpow2.f32 %v2226_v7  ;;  %v4604_v17 = vpop.eup %4603 }
 0x5a2   : > { %4617 = vrcp.f32 %v2257_v37  ;;  %2548 = vmatprep.mubr.bf16.mxu0 %v2425_v49  ;;  %v2369_v56 = vmul.f32 %v4604_v17, %v6049_v48  ;;  %v2368_v9 = vmul.f32 %v4604_v17, %v6047_v44  ;;  %v6556_v37 = vld [vmem:[#allocation25_spill] sm:$0xff] }
 0x5a3   : > { %2549 = vmatmul.mubr.bf16.gmra.mxu0 %v2424_v33  ;;  %v2260_v26 = vpop.xlane.xlu1 %2259  ;;  %v6557_v33 = vld [vmem:[#allocation27_spill] sm:$0xff] }
 0x5a4   : > { %v6259_v38 = vpop.eup %4605  ;;  %4619 = vrcp.f32 %v2260_v26  ;;  %v6558_v26 = vld [vmem:[#allocation26_spill] sm:$0xff] }
 0x5a5   : > { %v6261_v0 = vpop.eup %4607 }
 0x5a6   : > { %v4610_v1 = vpop.eup %4609  ;;  %v2318_v16 = vadd.f32 %v6261_v0, %v6259_v38 }
 0x5a7   : > { %v2263_v60 = vpop.xlane.xlu0 %2262  ;;  %v2371_v47 = vmul.f32 %v4610_v1, %v6062_v36  ;;  %v2370_v24 = vmul.f32 %v4610_v1, %v6060_v5  ;;  %v6552_v36 = vld [vmem:[#allocation15_spill] sm:$0xff] }
 0x5a8   : > { %4621 = vrcp.f32 %v2263_v60  ;;  %2319 = vadd.xlane.f32.xlu1 %v2318_v16  ;;  %v6559_v16 = vld [vmem:[#allocation24_spill] sm:$0xff] }
 0x5a9   : > { %v2427_v25 = vpack.c.bf16 %v2371_v47, %v2369_v56  ;;  %v2426_v57 = vpack.c.bf16 %v2370_v24, %v2368_v9  ;;  %v4612_v59 = vpop.eup %4611 }
 0x5aa   : > { %v2373_v5 = vmul.f32 %v4612_v59, %v6552_v36  ;;  %v2372_v35 = vmul.f32 %v4612_v59, %v6554_v6  ;;  %v4470_v6 = vld [vmem:[%s4955_s14] sm:$0xff]  }
 0x5ab   : > { %2556 = vmatprep.mubr.bf16.mxu0 %v2427_v25  ;;  %v2266_v30 = vpop.xlane.xlu1 %2265  ;;  %v6560_v25 = vld [vmem:[#allocation29_spill] sm:$0xff]  ;;  %4253 = vmatprep.subr.bf16.mxu0 %v4470_v6 }
 0x5ac   : > { %2557 = vmatmul.mubr.bf16.gmra.mxu0 %v2426_v57  ;;  %4623 = vrcp.f32 %v2266_v30  ;;  %v6561_v30 = vld [vmem:[#allocation31_spill] sm:$0xff]  ;;  %4287 = vmatprep.subr.bf16.mxu1 %v4470_v6 }
 0x5ad   : > { %v6269_v2 = vpop.eup %4613  ;;  %4254 = vmatpush3.bf16.msra.mxu0 %v4470_v6  ;;  %4288 = vmatpush3.bf16.msra.mxu1 %v4470_v6 }
 0x5ae   : > { %v6271_v3 = vpop.eup %4615 }
 0x5af   : > { %v4618_v48 = vpop.eup %4617  ;;  %v2269_v11 = vpop.xlane.xlu0 %2268  ;;  %v2321_v44 = vadd.f32 %v6271_v3, %v6269_v2 }
 0x5b0   : > { %4625 = vrcp.f32 %v2269_v11  ;;  %v2375_v52 = vmul.f32 %v4618_v48, %v6553_v10  ;;  %v2374_v28 = vmul.f32 %v4618_v48, %v6555_v58  ;;  %v6562_v48 = vld [vmem:[#allocation30_spill] sm:$0xff] }
 0x5b1   : > { %2322 = vadd.xlane.f32.xlu0 %v2321_v44  ;;  %v4620_v41 = vpop.eup %4619  ;;  %v6563_v44 = vld [vmem:[#allocation28_spill] sm:$0xff] }
 0x5b2   : > { %v2429_v46 = vpack.c.bf16 %v2375_v52, %v2373_v5  ;;  %v2428_v7 = vpack.c.bf16 %v2374_v28, %v2372_v35  ;;  %v2377_v49 = vmul.f32 %v4620_v41, %v6556_v37  ;;  %v2376_v60 = vmul.f32 %v4620_v41, %v6559_v16 }
 0x5b4   : > { %2564 = vmatprep.mubr.bf16.mxu0 %v2429_v46 }
 0x5b5   : > { %v4622_v61 = vpop.eup %4621  ;;  %2565 = vmatmul.mubr.bf16.gmra.mxu0 %v2428_v7 }
 0x5b6   : > { %v2379_v17 = vmul.f32 %v4622_v61, %v6557_v33  ;;  %v2378_v1 = vmul.f32 %v4622_v61, %v6558_v26 }
 0x5b8   : > { %v2431_v56 = vpack.c.bf16 %v2379_v17, %v2377_v49  ;;  %v2430_v47 = vpack.c.bf16 %v2378_v1, %v2376_v60 }
 0x5b9   : > { %v4624_v9 = vpop.eup %4623 }
 0x5ba   : > { %2572 = vmatprep.mubr.bf16.mxu0 %v2431_v56  ;;  %v2381_v57 = vmul.f32 %v4624_v9, %v6560_v25  ;;  %v2380_v36 = vmul.f32 %v4624_v9, %v6563_v44 }
 0x5bd   : > { %v4626_v24 = vpop.eup %4625  ;;  %2573 = vmatmul.mubr.bf16.gmra.mxu0 %v2430_v47 }
 0x5be   : > { %v2383_v59 = vmul.f32 %v4626_v24, %v6561_v30  ;;  %v2382_v11 = vmul.f32 %v4626_v24, %v6562_v48 }
 0x5c0   : > { %v2433_v5 = vpack.c.bf16 %v2383_v59, %v2381_v57  ;;  %v2432_v10 = vpack.c.bf16 %v2382_v11, %v2380_v36 }
 0x5c2   : > { %2580 = vmatprep.mubr.bf16.mxu0 %v2433_v5 }
 0x5c5   : > { %2581 = vmatmul.mubr.bf16.gmra.mxu0 %v2432_v10 }
 0x5e0   : > { %v2272_v52 = vpop.xlane.xlu1 %2271 }
 0x5e1   : > { %4627 = vrcp.f32 %v2272_v52 }
 0x5e4   : > { %v2275_v35 = vpop.xlane.xlu0 %2274 }
 0x5e5   : > { %4629 = vrcp.f32 %v2275_v35 }
 0x5e6   : > { %v2278_v58 = vpop.xlane.xlu1 %2277 }
 0x5e7   : > { %4631 = vrcp.f32 %v2278_v58 }
 0x5e8   : > { %v2281_v28 = vpop.xlane.xlu0 %2280 }
 0x5e9   : > { %4633 = vrcp.f32 %v2281_v28 }
 0x5ea   : > { %v2284_v46 = vpop.xlane.xlu1 %2283 }
 0x5eb   : > { %4635 = vrcp.f32 %v2284_v46 }
 0x5ec   : > { %v2287_v7 = vpop.xlane.xlu0 %2286 }
 0x5ed   : > { %4637 = vrcp.f32 %v2287_v7 }
 0x5ee   : > { %v4628_v41 = vpop.eup %4627  ;;  %v2290_v49 = vpop.xlane.xlu1 %2289 }
 0x5ef   : > { %v2385_v33 = vmul.f32 %v4628_v41, %v6135_v40  ;;  %v2384_v26 = vmul.f32 %v4628_v41, %v6132_v20 }
 0x5f0   : > { %v2293_v61 = vpop.xlane.xlu0 %2292 }
 0x5f1   : > { %4639 = vrcp.f32 %v2293_v61 }
 0x5f2   : > { %v4630_v37 = vpop.eup %4629  ;;  %4641 = vrcp.f32 %v2290_v49 }
 0x5f3   : > { %v2387_v17 = vmul.f32 %v4630_v37, %v6145_v27  ;;  %v2386_v1 = vmul.f32 %v4630_v37, %v6142_v4  ;;  %v2296_v27 = vpop.xlane.xlu1 %2295 }
 0x5f4   : > { %v4632_v16 = vpop.eup %4631  ;;  %v2299_v25 = vpop.xlane.xlu0 %2298 }
 0x5f5   : > { %v2435_v60 = vpack.c.bf16 %v2387_v17, %v2385_v33  ;;  %v2434_v56 = vpack.c.bf16 %v2386_v1, %v2384_v26  ;;  %v2389_v9 = vmul.f32 %v4632_v16, %v6151_v51  ;;  %4643 = vrcp.f32 %v2299_v25 }
 0x5f6   : > { %v4634_v47 = vpop.eup %4633  ;;  %v2388_v59 = vmul.f32 %v4632_v16, %v6147_v14  ;;  %4645 = vrcp.f32 %v2296_v27 }
 0x5f7   : > { %2588 = vmatprep.mubr.bf16.mxu0 %v2435_v60  ;;  %v2391_v24 = vmul.f32 %v4634_v47, %v6161_v50  ;;  %v2390_v20 = vmul.f32 %v4634_v47, %v6156_v53  ;;  %v2302_v5 = vpop.xlane.xlu1 %2301 }
 0x5f8   : > { %2589 = vmatmul.mubr.bf16.gmra.mxu0 %v2434_v56  ;;  %v4636_v40 = vpop.eup %4635  ;;  %v2305_v44 = vpop.xlane.xlu0 %2304 }
 0x5f9   : > { %v2437_v57 = vpack.c.bf16 %v2391_v24, %v2389_v9  ;;  %v2393_v48 = vmul.f32 %v4636_v40, %v6167_v31  ;;  %v2436_v51 = vpack.c.bf16 %v2390_v20, %v2388_v59  ;;  %4647 = vrcp.f32 %v2305_v44 }
 0x5fa   : > { %v4638_v30 = vpop.eup %4637  ;;  %4649 = vrcp.f32 %v2302_v5 }
 0x5fb   : > { %2596 = vmatprep.mubr.bf16.mxu0 %v2437_v57  ;;  %v2395_v4 = vmul.f32 %v4638_v30, %v6177_v12  ;;  %v2394_v10 = vmul.f32 %v4638_v30, %v6172_v18  ;;  %v2392_v12 = vmul.f32 %v4636_v40, %v6163_v55  ;;  %v2308_v28 = vpop.xlane.xlu1 %2307  ;;  %v6564_v40 = vld [vmem:[#allocation20_spill] sm:$0xff]  ;;  %v6566_v30 = vld [vmem:[#allocation18_spill] sm:$0xff] }
 0x5fc   : > { %v2311_v35 = vpop.xlane.xlu0 %2310 }
 0x5fd   : > { %v2439_v11 = vpack.c.bf16 %v2395_v4, %v2393_v48  ;;  %v2438_v52 = vpack.c.bf16 %v2394_v10, %v2392_v12  ;;  %4651 = vrcp.f32 %v2311_v35 }
 0x5fe   : > { %v4640_v50 = vpop.eup %4639  ;;  %4653 = vrcp.f32 %v2308_v28 }
 0x5ff   : > { %v4642_v36 = vpop.eup %4641  ;;  %v2399_v53 = vmul.f32 %v4640_v50, %v6191_v15  ;;  %v2398_v46 = vmul.f32 %v4640_v50, %v6187_v29  ;;  %v2314_v49 = vpop.xlane.xlu1 %2313 }
 0x600   : > { %2597 = vmatmul.mubr.bf16.gmra.mxu0 %v2436_v51  ;;  %v2397_v14 = vmul.f32 %v4642_v36, %v6183_v43  ;;  %v2396_v15 = vmul.f32 %v4642_v36, %v6179_v13  ;;  %v2317_v61 = vpop.xlane.xlu0 %2316 }
 0x601   : > { %2604 = vmatprep.mubr.bf16.mxu0 %v2439_v11  ;;  %4655 = vrcp.f32 %v2317_v61 }
 0x602   : > { %v2441_v31 = vpack.c.bf16 %v2399_v53, %v2397_v14  ;;  %v4644_v6 = vpop.eup %4643  ;;  %v2440_v7 = vpack.c.bf16 %v2398_v46, %v2396_v15  ;;  %4657 = vrcp.f32 %v2314_v49 }
 0x603   : > { %v4646_v58 = vpop.eup %4645  ;;  %v2403_v18 = vmul.f32 %v4644_v6, %v6203_v19  ;;  %v2402_v33 = vmul.f32 %v4644_v6, %v6199_v39 }
 0x604   : > { %v2401_v55 = vmul.f32 %v4646_v58, %v6197_v32  ;;  %v2400_v19 = vmul.f32 %v4646_v58, %v6193_v63 }
 0x606   : > { %v2443_v43 = vpack.c.bf16 %v2403_v18, %v2401_v55  ;;  %v4648_v41 = vpop.eup %4647  ;;  %v2442_v17 = vpack.c.bf16 %v2402_v33, %v2400_v19 }
 0x607   : > { %v4650_v37 = vpop.eup %4649  ;;  %v2407_v29 = vmul.f32 %v4648_v41, %v6215_v45  ;;  %v2406_v16 = vmul.f32 %v4648_v41, %v6211_v54 }
 0x608   : > { %2605 = vmatmul.mubr.bf16.gmra.mxu0 %v2438_v52  ;;  %v2405_v13 = vmul.f32 %v4650_v37, %v6209_v23  ;;  %v2404_v39 = vmul.f32 %v4650_v37, %v6205_v62  ;;  %v6565_v62 = vld [vmem:[#allocation19_spill] sm:$0xff] }
 0x609   : > { %2612 = vmatprep.mubr.bf16.mxu0 %v2441_v31 }
 0x60a   : > { %v2445_v32 = vpack.c.bf16 %v2407_v29, %v2405_v13  ;;  %v4652_v26 = vpop.eup %4651  ;;  %v2444_v45 = vpack.c.bf16 %v2406_v16, %v2404_v39 }
 0x60b   : > { %v4654_v1 = vpop.eup %4653  ;;  %v2411_v60 = vmul.f32 %v4652_v26, %v6227_v8  ;;  %v2410_v9 = vmul.f32 %v4652_v26, %v6223_v42 }
 0x60c   : > { %v2409_v56 = vmul.f32 %v4654_v1, %v6221_v34  ;;  %v2408_v25 = vmul.f32 %v4654_v1, %v6217_v22 }
 0x60e   : > { %v2447_v47 = vpack.c.bf16 %v2411_v60, %v2409_v56  ;;  %v4656_v63 = vpop.eup %4655  ;;  %v2446_v57 = vpack.c.bf16 %v2410_v9, %v2408_v25 }
 0x60f   : > { %v4658_v23 = vpop.eup %4657  ;;  %v2415_v24 = vmul.f32 %v4656_v63, %v6239_v21  ;;  %v2414_v34 = vmul.f32 %v4656_v63, %v6565_v62 }
 0x610   : > { %2613 = vmatmul.mubr.bf16.gmra.mxu0 %v2440_v7  ;;  %v2413_v54 = vmul.f32 %v4658_v23, %v6564_v40  ;;  %v2412_v27 = vmul.f32 %v4658_v23, %v6566_v30 }
 0x611   : > { %2620 = vmatprep.mubr.bf16.mxu0 %v2443_v43 }
 0x612   : > { %v2449_v8 = vpack.c.bf16 %v2415_v24, %v2413_v54  ;;  %v2448_v20 = vpack.c.bf16 %v2414_v34, %v2412_v27 }
 0x618   : > { %2621 = vmatmul.mubr.bf16.gmra.mxu0 %v2442_v17 }
 0x619   : > { %2628 = vmatprep.mubr.bf16.mxu0 %v2445_v32 }
 0x620   : > { %2629 = vmatmul.mubr.bf16.gmra.mxu0 %v2444_v45 }
 0x621   : > { %2636 = vmatprep.mubr.bf16.mxu0 %v2447_v47 }
 0x628   : > { %2637 = vmatmul.mubr.bf16.gmra.mxu0 %v2446_v57 }
 0x629   : > { %2644 = vmatprep.mubr.bf16.mxu0 %v2449_v8 }
 0x630   : > { %2645 = vmatmul.mubr.bf16.gmra.mxu0 %v2448_v20 }
 0x631   : > { %v2320_v4 = vpop.xlane.xlu1 %2319 }
 0x632   : > { %4659 = vrcp.f32 %v2320_v4 }
 0x63a   : > { %v2323_v59 = vpop.xlane.xlu0 %2322 }
 0x63b   : > { %4661 = vrcp.f32 %v2323_v59 }
 0x63f   : > { %v4660_v42 = vpop.eup %4659 }
 0x640   : > { %v2417_v22 = vmul.f32 %v4660_v42, %v6261_v0  ;;  %v2416_v51 = vmul.f32 %v4660_v42, %v6259_v38 }
 0x648   : > { %v4662_v21 = vpop.eup %4661 }
 0x649   : > { %v2419_v48 = vmul.f32 %v4662_v21, %v6271_v3  ;;  %v2418_v11 = vmul.f32 %v4662_v21, %v6269_v2 }
 0x64b   : > { %v2451_v50 = vpack.c.bf16 %v2419_v48, %v2417_v22  ;;  %v2450_v44 = vpack.c.bf16 %v2418_v11, %v2416_v51 }
 0x64d   : > { %2652 = vmatprep.mubr.bf16.mxu0 %v2451_v50 }
 0x64e   : > { %2653 = vmatmul.mubr.bf16.gmra.mxu0 %v2450_v44 }
 0x653   : > { %v4092_v36 = vpop.f32.mrf.mxu0 }
 0x655   : > { %v4093_v5 = vpop.f32.mrf.mxu0 }
 0x656   : > { %v4094_v12 = vadd.f32 %v4093_v5, %v4092_v36 }
 0x657   : > { %v4095_v10 = vpop.f32.mrf.mxu0 }
 0x659   : > { %v4096_v53 = vpop.f32.mrf.mxu0 }
 0x65a   : > { %v4097_v14 = vadd.f32 %v4096_v53, %v4095_v10 }
 0x65b   : > { %v4098_v52 = vpop.f32.mrf.mxu0 }
 0x65c   : > { %v2693_v31 = vpack.c.bf16 %v4097_v14, %v4094_v12 }
 0x65d   : > { %v4099_v6 = vpop.f32.mrf.mxu0 }
 0x65e   : > { %4255 = vmatprep.mubr.msk.bf16.mxu0 %vm1458_vm0, %v2693_v31  ;;  %v4100_v38 = vadd.f32 %v4099_v6, %v4098_v52 }
 0x65f   : > { %v4101_v0 = vpop.f32.mrf.mxu0 }
 0x661   : > { %v4102_v3 = vpop.f32.mrf.mxu0 }
 0x662   : > { %v4103_v35 = vadd.f32 %v4102_v3, %v4101_v0 }
 0x663   : > { %v4104_v2 = vpop.f32.mrf.mxu0 }
 0x664   : > { %v2694_v58 = vpack.c.bf16 %v4103_v35, %v4100_v38 }
 0x665   : > { %v4105_v28 = vpop.f32.mrf.mxu0 }
 0x666   : > { %4256 = vmatmul.mubr.msk.bf16.vlgmr.msra.gmra.mxu0 %vm1458_vm0, %v2694_v58  ;;  %v4106_v15 = vadd.f32 %v4105_v28, %v4104_v2 }
 0x667   : > { %v4107_v46 = vpop.f32.mrf.mxu0 }
 0x669   : > { %v4108_v18 = vpop.f32.mrf.mxu0 }
 0x66a   : > { %v4109_v55 = vadd.f32 %v4108_v18, %v4107_v46 }
 0x66c   : > { %v2695_v7 = vpack.c.bf16 %v4109_v55, %v4106_v15  ;;  %v4110_v43 = vpop.f32.mrf.mxu0 }
 0x66e   : > { %v4111_v41 = vpop.f32.mrf.mxu0  ;;  %4259 = vmatprep.mubr.msk.bf16.mxu0 %vm1458_vm0, %v2695_v7 }
 0x66f   : > { %v4112_v49 = vadd.f32 %v4111_v41, %v4110_v43 }
 0x670   : > { %v4113_v61 = vpop.f32.mrf.mxu0 }
 0x672   : > { %v4114_v37 = vpop.f32.mrf.mxu0 }
 0x673   : > { %v4115_v33 = vadd.f32 %v4114_v37, %v4113_v61 }
 0x675   : > { %v2696_v29 = vpack.c.bf16 %v4115_v33, %v4112_v49  ;;  %v4116_v19 = vpop.f32.mrf.mxu0 }
 0x677   : > { %v4117_v13 = vpop.f32.mrf.mxu0  ;;  %4260 = vmatmul.mubr.msk.bf16.gmra.mxu0 %vm1458_vm0, %v2696_v29 }
 0x678   : > { %v4118_v26 = vadd.f32 %v4117_v13, %v4116_v19 }
 0x679   : > { %v4119_v17 = vpop.f32.mrf.mxu0 }
 0x67b   : > { %v4120_v32 = vpop.f32.mrf.mxu0 }
 0x67c   : > { %v4121_v1 = vadd.f32 %v4120_v32, %v4119_v17 }
 0x67d   : > { %v4122_v16 = vpop.f32.mrf.mxu0 }
 0x67e   : > { %v2697_v60 = vpack.c.bf16 %v4121_v1, %v4118_v26 }
 0x67f   : > { %v4123_v39 = vpop.f32.mrf.mxu0 }
 0x680   : > { %4263 = vmatprep.mubr.msk.bf16.mxu1 %vm1458_vm0, %v2697_v60  ;;  %v4124_v47 = vadd.f32 %v4123_v39, %v4122_v16 }
 0x681   : > { %v4125_v56 = vpop.f32.mrf.mxu0 }
 0x683   : > { %v4126_v45 = vpop.f32.mrf.mxu0 }
 0x684   : > { %v4127_v63 = vadd.f32 %v4126_v45, %v4125_v56 }
 0x685   : > { %v4128_v23 = vpop.f32.mrf.mxu0 }
 0x686   : > { %v2698_v9 = vpack.c.bf16 %v4127_v63, %v4124_v47 }
 0x687   : > { %v4129_v24 = vpop.f32.mrf.mxu0 }
 0x688   : > { %4264 = vmatmul.mubr.msk.bf16.vlgmr.msra.gmra.mxu1 %vm1458_vm0, %v2698_v9  ;;  %v4130_v54 = vadd.f32 %v4129_v24, %v4128_v23 }
 0x689   : > { %v4131_v25 = vpop.f32.mrf.mxu0 }
 0x68b   : > { %v4132_v40 = vpop.f32.mrf.mxu0 }
 0x68c   : > { %v4133_v57 = vadd.f32 %v4132_v40, %v4131_v25 }
 0x68e   : > { %v2699_v8 = vpack.c.bf16 %v4133_v57, %v4130_v54 }
 0x690   : > { %4267 = vmatprep.mubr.msk.bf16.mxu1 %vm1458_vm0, %v2699_v8  ;;  %v2663_v8 = vld [vmem:[#allocation2 + $0xd8] sm:$0xff] }
 0x6b8   : > { %v4134_v62 = vpop.f32.mrf.mxu0 }
 0x6ba   : > { %v4135_v34 = vpop.f32.mrf.mxu0 }
 0x6bb   : > { %v4136_v20 = vadd.f32 %v4135_v34, %v4134_v62  ;;  %v2661_v34 = vld [vmem:[#allocation2 + $0xb0] sm:$0xff] }
 0x6bc   : > { %v4137_v30 = vpop.f32.mrf.mxu0 }
 0x6be   : > { %v4138_v27 = vpop.f32.mrf.mxu0 }
 0x6bf   : > { %v4139_v4 = vadd.f32 %v4138_v27, %v4137_v30 }
 0x6c0   : > { %v4140_v59 = vpop.f32.mrf.mxu0 }
 0x6c1   : > { %v2700_v42 = vpack.c.bf16 %v4139_v4, %v4136_v20  ;;  %v2664_v20 = vld [vmem:[#allocation2 + $0x18] sm:$0xff] }
 0x6c2   : > { %v4141_v21 = vpop.f32.mrf.mxu0 }
 0x6c3   : > { %4268 = vmatmul.mubr.msk.bf16.gmra.mxu1 %vm1458_vm0, %v2700_v42  ;;  %v4142_v51 = vadd.f32 %v4141_v21, %v4140_v59  ;;  %v2662_v42 = vld [vmem:[#allocation2] sm:$0xff] }
 0x6c4   : > { %v4143_v22 = vpop.f32.mrf.mxu0 }
 0x6c6   : > { %v4144_v48 = vpop.f32.mrf.mxu0 }
 0x6c7   : > { %v4145_v11 = vadd.f32 %v4144_v48, %v4143_v22 }
 0x6c8   : > { %v4146_v50 = vpop.f32.mrf.mxu0 }
 0x6c9   : > { %v2701_v44 = vpack.c.bf16 %v4145_v11, %v4142_v51  ;;  %v2667_v51 = vld [vmem:[#allocation2 + $0x30] sm:$0xff] }
 0x6ca   : > { %v4147_v36 = vpop.f32.mrf.mxu0 }
 0x6cb   : > { %4271 = vmatprep.mubr.msk.bf16.mxu1 %vm1458_vm0, %v2701_v44  ;;  %v4148_v53 = vadd.f32 %v4147_v36, %v4146_v50  ;;  %v2665_v50 = vld [vmem:[#allocation2 + $0x50] sm:$0xff] }
 0x6cc   : > { %v4149_v5 = vpop.f32.mrf.mxu0 }
 0x6ce   : > { %v4150_v10 = vpop.f32.mrf.mxu0 }
 0x6cf   : > { %v4151_v12 = vadd.f32 %v4150_v10, %v4149_v5  ;;  %v2668_v5 = vld [vmem:[#allocation2 + $0x48] sm:$0xff] }
 0x6d0   : > { %v4152_v14 = vpop.f32.mrf.mxu0 }
 0x6d1   : > { %v2702_v52 = vpack.c.bf16 %v4151_v12, %v4148_v53  ;;  %v2666_v12 = vld [vmem:[#allocation2 + $0x68] sm:$0xff] }
 0x6d2   : > { %v4153_v31 = vpop.f32.mrf.mxu0 }
 0x6d3   : > { %4272 = vmatmul.mubr.msk.bf16.gmra.mxu1 %vm1458_vm0, %v2702_v52  ;;  %v4154_v3 = vadd.f32 %v4153_v31, %v4152_v14 }
 0x6d4   : > { %v4155_v6 = vpop.f32.mrf.mxu0 }
 0x6d6   : > { %v4156_v0 = vpop.f32.mrf.mxu0 }
 0x6d7   : > { %v4157_v38 = vadd.f32 %v4156_v0, %v4155_v6  ;;  %v2671_v6 = vld [vmem:[#allocation2 + $0xe8] sm:$0xff] }
 0x6d8   : > { %v4158_v35 = vpop.f32.mrf.mxu0 }
 0x6d9   : > { %v2703_v2 = vpack.c.bf16 %v4157_v38, %v4154_v3  ;;  %v2669_v3 = vld [vmem:[#allocation2 + $0x80] sm:$0xff] }
 0x6da   : > { %v4159_v58 = vpop.f32.mrf.mxu0 }
 0x6db   : > { %4275 = vmatprep.mubr.msk.bf16.mxu1 %vm1458_vm0, %v2703_v2  ;;  %v4160_v18 = vadd.f32 %v4159_v58, %v4158_v35  ;;  %v2672_v2 = vld [vmem:[#allocation2 + $0xb8] sm:$0xff] }
 0x6dc   : > { %v4161_v28 = vpop.f32.mrf.mxu0 }
 0x6de   : > { %v4162_v46 = vpop.f32.mrf.mxu0 }
 0x6df   : > { %v4163_v15 = vadd.f32 %v4162_v46, %v4161_v28  ;;  %v2670_v46 = vld [vmem:[#allocation2 + $0x88] sm:$0xff] }
 0x6e0   : > { %v4164_v55 = vpop.f32.mrf.mxu0 }
 0x6e1   : > { %v2704_v7 = vpack.c.bf16 %v4163_v15, %v4160_v18 }
 0x6e2   : > { %v4165_v43 = vpop.f32.mrf.mxu0 }
 0x6e3   : > { %4276 = vmatmul.mubr.msk.bf16.gmra.mxu1 %vm1458_vm0, %v2704_v7  ;;  %v4166_v37 = vadd.f32 %v4165_v43, %v4164_v55  ;;  %v2675_v7 = vld [vmem:[#allocation2 + $0x8] sm:$0xff] }
 0x6e4   : > { %v4167_v41 = vpop.f32.mrf.mxu0 }
 0x6e6   : > { %v4168_v61 = vpop.f32.mrf.mxu0 }
 0x6e7   : > { %v4169_v49 = vadd.f32 %v4168_v61, %v4167_v41  ;;  %v2673_v41 = vld [vmem:[#allocation2 + $0x60] sm:$0xff] }
 0x6e8   : > { %v4170_v33 = vpop.f32.mrf.mxu0 }
 0x6e9   : > { %v2705_v29 = vpack.c.bf16 %v4169_v49, %v4166_v37  ;;  %v2676_v49 = vld [vmem:[#allocation2 + $0x78] sm:$0xff] }
 0x6ea   : > { %v4171_v19 = vpop.f32.mrf.mxu0 }
 0x6eb   : > { %4279 = vmatprep.mubr.msk.bf16.mxu1 %vm1458_vm0, %v2705_v29  ;;  %v4172_v32 = vadd.f32 %v4171_v19, %v4170_v33  ;;  %v2674_v19 = vld [vmem:[#allocation2 + $0xf0] sm:$0xff] }
 0x6ec   : > { %v4173_v13 = vpop.f32.mrf.mxu0 }
 0x6ee   : > { %v4174_v17 = vpop.f32.mrf.mxu0 }
 0x6ef   : > { %v4175_v26 = vadd.f32 %v4174_v17, %v4173_v13 }
 0x6f0   : > { %v4176_v1 = vpop.f32.mrf.mxu0 }
 0x6f1   : > { %v2706_v16 = vpack.c.bf16 %v4175_v26, %v4172_v32  ;;  %v2679_v26 = vld [vmem:[#allocation2 + $0x40] sm:$0xff] }
 0x6f2   : > { %v4177_v60 = vpop.f32.mrf.mxu0 }
 0x6f3   : > { %4280 = vmatmul.mubr.msk.bf16.gmra.mxu1 %vm1458_vm0, %v2706_v16  ;;  %v4178_v45 = vadd.f32 %v4177_v60, %v4176_v1  ;;  %v2677_v16 = vld [vmem:[#allocation2 + $0x38] sm:$0xff] }
 0x6f4   : > { %v4179_v39 = vpop.f32.mrf.mxu0 }
 0x6f6   : > { %v4180_v56 = vpop.f32.mrf.mxu0 }
 0x6f7   : > { %v4181_v47 = vadd.f32 %v4180_v56, %v4179_v39  ;;  %v2680_v56 = vld [vmem:[#allocation2 + $0xc8] sm:$0xff] }
 0x6f9   : > { %v2707_v63 = vpack.c.bf16 %v4181_v47, %v4178_v45 }
 0x6fb   : > { %4283 = vmatprep.mubr.msk.bf16.mxu1 %vm1458_vm0, %v2707_v63  ;;  %v2678_v63 = vld [vmem:[#allocation2 + $0x58] sm:$0xff] }
 0x70e   : > { %v4182_v23 = vpop.f32.mrf.mxu0 }
 0x710   : > { %v4183_v9 = vpop.f32.mrf.mxu0 }
 0x711   : > { %v4184_v40 = vadd.f32 %v4183_v9, %v4182_v23 }
 0x712   : > { %v4185_v24 = vpop.f32.mrf.mxu0 }
 0x714   : > { %v4186_v25 = vpop.f32.mrf.mxu0 }
 0x715   : > { %v4187_v54 = vadd.f32 %v4186_v25, %v4185_v24  ;;  %v2683_v25 = vld [vmem:[#allocation2 + $0x70] sm:$0xff] }
 0x717   : > { %v2708_v57 = vpack.c.bf16 %v4187_v54, %v4184_v40  ;;  %v2681_v54 = vld [vmem:[#allocation2 + $0xe0] sm:$0xff] }
 0x719   : > { %4284 = vmatmul.mubr.msk.bf16.gmra.mxu1 %vm1458_vm0, %v2708_v57 }
 0x726   : > { %v4257_v62 = vpop.f32.mrf.mxu0 }
 0x727   : > { %v2928_v30 = vadd.f32 %v4257_v62, %v2663_v8  ;;  %v2684_v62 = vld [vmem:[#allocation2 + $0xc0] sm:$0xff] }
 0x728   : > { %v2799_v27 = vpop.f32.mrf.mxu0 }
 0x729   : > { %2960 = vst [vmem:[#allocation2 + $0xd8] sm:$0xff] %v2928_v30  ;;  %v2926_v4 = vadd.f32 %v2799_v27, %v2661_v34  ;;  %v2682_v27 = vld [vmem:[#allocation2 + $0x90] sm:$0xff] }
 0x72a   : > { %v4258_v59 = vpop.f32.mrf.mxu0 }
 0x72b   : > { %2958 = vst [vmem:[#allocation2 + $0xb0] sm:$0xff] %v2926_v4  ;;  %v2929_v21 = vadd.f32 %v4258_v59, %v2664_v20 }
 0x72c   : > { %v2802_v22 = vpop.f32.mrf.mxu0 }
 0x72d   : > { %2961 = vst [vmem:[#allocation2 + $0x18] sm:$0xff] %v2929_v21  ;;  %v2927_v48 = vadd.f32 %v2802_v22, %v2662_v42  ;;  %v2687_v42 = vld [vmem:[#allocation2 + $0x10] sm:$0xff]  ;;  %v2685_v22 = vld [vmem:[#allocation2 + $0xa8] sm:$0xff] }
 0x72f   : > { %2959 = vst [vmem:[#allocation2] sm:$0xff] %v2927_v48 }
 0x737   : > { %v4261_v11 = vpop.f32.mrf.mxu0 }
 0x738   : > { %v2932_v44 = vadd.f32 %v4261_v11, %v2667_v51  ;;  %v2688_v11 = vld [vmem:[#allocation2 + $0x28] sm:$0xff] }
 0x739   : > { %v2815_v36 = vpop.f32.mrf.mxu0 }
 0x73a   : > { %2964 = vst [vmem:[#allocation2 + $0x30] sm:$0xff] %v2932_v44  ;;  %v2930_v10 = vadd.f32 %v2815_v36, %v2665_v50  ;;  %v2686_v36 = vld [vmem:[#allocation2 + $0xd0] sm:$0xff] }
 0x73b   : > { %v4262_v53 = vpop.f32.mrf.mxu0 }
 0x73c   : > { %2962 = vst [vmem:[#allocation2 + $0x50] sm:$0xff] %v2930_v10  ;;  %v2933_v14 = vadd.f32 %v4262_v53, %v2668_v5 }
 0x73d   : > { %v2818_v52 = vpop.f32.mrf.mxu0 }
 0x73e   : > { %2965 = vst [vmem:[#allocation2 + $0x48] sm:$0xff] %v2933_v14  ;;  %v2931_v31 = vadd.f32 %v2818_v52, %v2666_v12  ;;  %v2691_v12 = vld [vmem:[#allocation2 + $0x20] sm:$0xff] }
 0x73f   : > { %v2689_v52 = vld [vmem:[#allocation2 + $0xa0] sm:$0xff] }
 0x740   : > { %2963 = vst [vmem:[#allocation2 + $0x68] sm:$0xff] %v2931_v31 }
 0x748   : > { %v4265_v0 = vpop.f32.mrf.mxu1 }
 0x749   : > { %v2936_v38 = vadd.f32 %v4265_v0, %v2671_v6  ;;  %v2692_v0 = vld [vmem:[#allocation2 + $0x98] sm:$0xff] }
 0x74a   : > { %v2831_v35 = vpop.f32.mrf.mxu1 }
 0x74b   : > { %2968 = vst [vmem:[#allocation2 + $0xe8] sm:$0xff] %v2936_v38  ;;  %v2934_v58 = vadd.f32 %v2831_v35, %v2669_v3  ;;  %v2690_v35 = vld [vmem:[#allocation2 + $0xf8] sm:$0xff] }
 0x74c   : > { %v4266_v28 = vpop.f32.mrf.mxu1 }
 0x74d   : > { %2966 = vst [vmem:[#allocation2 + $0x80] sm:$0xff] %v2934_v58  ;;  %v2937_v18 = vadd.f32 %v4266_v28, %v2672_v2 }
 0x74e   : > { %v2834_v15 = vpop.f32.mrf.mxu1 }
 0x74f   : > { %2969 = vst [vmem:[#allocation2 + $0xb8] sm:$0xff] %v2937_v18  ;;  %v2935_v55 = vadd.f32 %v2834_v15, %v2670_v46 }
 0x751   : > { %2967 = vst [vmem:[#allocation2 + $0x88] sm:$0xff] %v2935_v55 }
 0x783   : > { %v4269_v43 = vpop.f32.mrf.mxu1 }
 0x784   : > { %v2940_v61 = vadd.f32 %v4269_v43, %v2675_v7 }
 0x785   : > { %v2847_v37 = vpop.f32.mrf.mxu1 }
 0x786   : > { %2972 = vst [vmem:[#allocation2 + $0x8] sm:$0xff] %v2940_v61  ;;  %v2938_v33 = vadd.f32 %v2847_v37, %v2673_v41 }
 0x787   : > { %v4270_v29 = vpop.f32.mrf.mxu1 }
 0x788   : > { %2970 = vst [vmem:[#allocation2 + $0x60] sm:$0xff] %v2938_v33  ;;  %v2941_v13 = vadd.f32 %v4270_v29, %v2676_v49 }
 0x789   : > { %v2850_v17 = vpop.f32.mrf.mxu1 }
 0x78a   : > { %2973 = vst [vmem:[#allocation2 + $0x78] sm:$0xff] %v2941_v13  ;;  %v2939_v32 = vadd.f32 %v2850_v17, %v2674_v19 }
 0x78c   : > { %2971 = vst [vmem:[#allocation2 + $0xf0] sm:$0xff] %v2939_v32 }
 0x793   : > { %v4273_v1 = vpop.f32.mrf.mxu1 }
 0x794   : > { %v2944_v60 = vadd.f32 %v4273_v1, %v2679_v26 }
 0x795   : > { %v2863_v39 = vpop.f32.mrf.mxu1 }
 0x796   : > { %2976 = vst [vmem:[#allocation2 + $0x40] sm:$0xff] %v2944_v60  ;;  %v2942_v45 = vadd.f32 %v2863_v39, %v2677_v16 }
 0x797   : > { %v4274_v47 = vpop.f32.mrf.mxu1 }
 0x798   : > { %2974 = vst [vmem:[#allocation2 + $0x38] sm:$0xff] %v2942_v45  ;;  %v2945_v23 = vadd.f32 %v4274_v47, %v2680_v56 }
 0x799   : > { %v2866_v9 = vpop.f32.mrf.mxu1 }
 0x79a   : > { %2977 = vst [vmem:[#allocation2 + $0xc8] sm:$0xff] %v2945_v23  ;;  %v2943_v24 = vadd.f32 %v2866_v9, %v2678_v63 }
 0x79c   : > { %2975 = vst [vmem:[#allocation2 + $0x58] sm:$0xff] %v2943_v24 }
 0x7a3   : > { %v4277_v40 = vpop.f32.mrf.mxu1 }
 0x7a4   : > { %v2948_v57 = vadd.f32 %v4277_v40, %v2683_v25 }
 0x7a5   : > { %v2879_v8 = vpop.f32.mrf.mxu1 }
 0x7a6   : > { %2980 = vst [vmem:[#allocation2 + $0x70] sm:$0xff] %v2948_v57  ;;  %v2946_v34 = vadd.f32 %v2879_v8, %v2681_v54 }
 0x7a7   : > { %v4278_v30 = vpop.f32.mrf.mxu1 }
 0x7a8   : > { %2978 = vst [vmem:[#allocation2 + $0xe0] sm:$0xff] %v2946_v34  ;;  %v2949_v20 = vadd.f32 %v4278_v30, %v2684_v62 }
 0x7a9   : > { %v2882_v4 = vpop.f32.mrf.mxu1 }
 0x7aa   : > { %2981 = vst [vmem:[#allocation2 + $0xc0] sm:$0xff] %v2949_v20  ;;  %v2947_v59 = vadd.f32 %v2882_v4, %v2682_v27 }
 0x7ac   : > { %2979 = vst [vmem:[#allocation2 + $0x90] sm:$0xff] %v2947_v59 }
 0x7b3   : > { %v4281_v21 = vpop.f32.mrf.mxu1 }
 0x7b4   : > { %v2952_v48 = vadd.f32 %v4281_v21, %v2687_v42 }
 0x7b5   : > { %v2895_v51 = vpop.f32.mrf.mxu1 }
 0x7b6   : > { %2984 = vst [vmem:[#allocation2 + $0x10] sm:$0xff] %v2952_v48  ;;  %v2950_v50 = vadd.f32 %v2895_v51, %v2685_v22 }
 0x7b7   : > { %v4282_v44 = vpop.f32.mrf.mxu1 }
 0x7b8   : > { %2982 = vst [vmem:[#allocation2 + $0xa8] sm:$0xff] %v2950_v50  ;;  %v2953_v5 = vadd.f32 %v4282_v44, %v2688_v11 }
 0x7b9   : > { %v2898_v10 = vpop.f32.mrf.mxu1 }
 0x7ba   : > { %2985 = vst [vmem:[#allocation2 + $0x28] sm:$0xff] %v2953_v5  ;;  %v2951_v53 = vadd.f32 %v2898_v10, %v2686_v36 }
 0x7bc   : > { %2983 = vst [vmem:[#allocation2 + $0xd0] sm:$0xff] %v2951_v53 }
 0x7d9   : > { %v4285_v14 = vpop.f32.mrf.mxu1 }
 0x7da   : > { %v2956_v31 = vadd.f32 %v4285_v14, %v2691_v12 }
 0x7db   : > { %v2911_v6 = vpop.f32.mrf.mxu1 }
 0x7dc   : > { %2988 = vst [vmem:[#allocation2 + $0x20] sm:$0xff] %v2956_v31  ;;  %v2954_v3 = vadd.f32 %v2911_v6, %v2689_v52 }
 0x7dd   : > { %v4286_v38 = vpop.f32.mrf.mxu1 }
 0x7de   : > { %2986 = vst [vmem:[#allocation2 + $0xa0] sm:$0xff] %v2954_v3  ;;  %v2957_v2 = vadd.f32 %v4286_v38, %v2692_v0  ;;  %2993 = sbr.rel (%p3549_p1) target bundleno = 2054 (0x806), region = 60 }
 0x7df   : > { %v2914_v58 = vpop.f32.mrf.mxu1 }
 0x7e0   : > { %2989 = vst [vmem:[#allocation2 + $0x98] sm:$0xff] %v2957_v2  ;;  %v2955_v28 = vadd.f32 %v2914_v58, %v2690_v35 }
 0x7e2   : > { %2987 = vst [vmem:[#allocation2 + $0xf8] sm:$0xff] %v2955_v28 }
 0x7e3   : > { %v3801_v46 = vld [vmem:[%s4939_s9] sm:$0xff]   ;;  %v3058_v18 = vld [vmem:[#allocation2 + $0xb0] sm:$0xff]  ;;  %v3974_v41 = vld [vmem:[%s4939_s9 + $0x8] sm:$0xff]  }
 0x7e4   : > { %v3059_v15 = vld [vmem:[#allocation2] sm:$0xff]  ;;  %v3802_v55 = vunpack.c.l.bf16 %v3801_v46  ;;  %v3803_v7 = vunpack.c.h.bf16 %v3801_v46  ;;  %v3060_v61 = vld [vmem:[#allocation2 + $0xd8] sm:$0xff]  ;;  %v3806_v37 = vunpack.c.l.bf16 %v3974_v41  ;;  %v3807_v49 = vunpack.c.h.bf16 %v3974_v41  ;;  %v3975_v29 = vld [vmem:[%s4939_s9 + $0x10] sm:$0xff]  }
 0x7e5   : > { %v6345_v43 = vld [vmem:[%s6476_s6] ss:$0 sm:$0xff]  ;;  %v3061_v33 = vld [vmem:[#allocation2 + $0x18] sm:$0xff]  ;;  %v3062_v19 = vld [vmem:[#allocation2 + $0x50] sm:$0xff]  ;;  %v3810_v32 = vunpack.c.l.bf16 %v3975_v29  ;;  %v3811_v26 = vunpack.c.h.bf16 %v3975_v29 }
 0x7e6   : > { %v3090_v13 = vadd.f32 %v3802_v55, %v3058_v18  ;;  %v3091_v17 = vadd.f32 %v3803_v7, %v3059_v15  ;;  %v3063_v1 = vld [vmem:[#allocation2 + $0x68] sm:$0xff]  ;;  %v3976_v16 = vld [vmem:[%s4939_s9 + $0x18] sm:$0xff]   ;;  %v3064_v60 = vld [vmem:[#allocation2 + $0x30] sm:$0xff]  ;;  %v3092_v39 = vadd.f32 %v3806_v37, %v3060_v61  ;;  %v3093_v56 = vadd.f32 %v3807_v49, %v3061_v33 }
 0x7e7   : > { %v3814_v45 = vunpack.c.l.bf16 %v3976_v16  ;;  %v3815_v47 = vunpack.c.h.bf16 %v3976_v16  ;;  %v3065_v63 = vld [vmem:[#allocation2 + $0x48] sm:$0xff]  ;;  %v3977_v23 = vld [vmem:[%s4939_s9 + $0x20] sm:$0xff]   ;;  %v3094_v25 = vadd.f32 %v3810_v32, %v3062_v19  ;;  %v3095_v40 = vadd.f32 %v3811_v26, %v3063_v1  ;;  %v3979_v21 = vld [vmem:[%s4939_s9 + $0x30] sm:$0xff]  }
 0x7e8   : > { %v3129_v9 = vadd.f32 %v6345_v43, %v3090_v13  ;;  %v3130_v24 = vadd.f32 %v6345_v43, %v3091_v17  ;;  %v3131_v54 = vadd.f32 %v6345_v43, %v3092_v39  ;;  %v3132_v57 = vadd.f32 %v6345_v43, %v3093_v56  ;;  %v3066_v34 = vld [vmem:[#allocation2 + $0x80] sm:$0xff]  ;;  %v3978_v30 = vld [vmem:[%s4939_s9 + $0x28] sm:$0xff]   ;;  %v3069_v44 = vld [vmem:[#allocation2 + $0xb8] sm:$0xff] }
 0x7e9   : > { %v3096_v8 = vadd.f32 %v3814_v45, %v3064_v60  ;;  %v3097_v62 = vadd.f32 %v3815_v47, %v3065_v63  ;;  %v3133_v20 = vadd.f32 %v6345_v43, %v3094_v25  ;;  %v3134_v4 = vadd.f32 %v6345_v43, %v3095_v40  ;;  %v3067_v42 = vld [vmem:[#allocation2 + $0x88] sm:$0xff]  ;;  %v3980_v36 = vld [vmem:[%s4939_s9 + $0x38] sm:$0xff]   ;;  %v3070_v14 = vld [vmem:[#allocation2 + $0x60] sm:$0xff] }
 0x7ea   : > { %v3867_v27 = vpack.c.bf16 %v3130_v24, %v3129_v9  ;;  %v3818_v59 = vunpack.c.l.bf16 %v3977_v23  ;;  %v3872_v22 = vpack.c.bf16 %v3132_v57, %v3131_v54  ;;  %v3819_v11 = vunpack.c.h.bf16 %v3977_v23  ;;  %v3068_v50 = vld [vmem:[#allocation2 + $0xe8] sm:$0xff]  ;;  %v3071_v52 = vld [vmem:[#allocation2 + $0xf0] sm:$0xff]  ;;  %v3981_v35 = vld [vmem:[%s4939_s9 + $0x40] sm:$0xff]  }
 0x7eb   : > { %v3135_v48 = vadd.f32 %v6345_v43, %v3096_v8  ;;  %v3136_v51 = vadd.f32 %v6345_v43, %v3097_v62  ;;  %v3877_v5 = vpack.c.bf16 %v3134_v4, %v3133_v20  ;;  %v3822_v53 = vunpack.c.l.bf16 %v3978_v30  ;;  %v3072_v38 = vld [vmem:[#allocation2 + $0x8] sm:$0xff]  ;;  %v3073_v18 = vld [vmem:[#allocation2 + $0x78] sm:$0xff]  ;;  %v3983_v16 = vld [vmem:[%s4939_s9 + $0x50] sm:$0xff]  }
 0x7ec   : > { %3868 = vst [vmem:[%s4957_s0] sm:$0xff] %v3867_v27   ;;  %v3098_v10 = vadd.f32 %v3818_v59, %v3066_v34  ;;  %v3823_v12 = vunpack.c.h.bf16 %v3978_v30  ;;  %3989 = vst [vmem:[%s4957_s0 + $0x8] sm:$0xff] %v3872_v22   ;;  %v3099_v6 = vadd.f32 %v3819_v11, %v3067_v42  ;;  %v3826_v0 = vunpack.c.l.bf16 %v3979_v21  ;;  %v3074_v61 = vld [vmem:[#allocation2 + $0x38] sm:$0xff]  ;;  %v3982_v19 = vld [vmem:[%s4939_s9 + $0x48] sm:$0xff]  }
 0x7ed   : > { %v3882_v31 = vpack.c.bf16 %v3136_v51, %v3135_v48  ;;  %v3827_v3 = vunpack.c.h.bf16 %v3979_v21  ;;  %3990 = vst [vmem:[%s4957_s0 + $0x10] sm:$0xff] %v3877_v5   ;;  %v3100_v58 = vadd.f32 %v3822_v53, %v3068_v50  ;;  %v3830_v46 = vunpack.c.l.bf16 %v3980_v36  ;;  %v3075_v1 = vld [vmem:[#allocation2 + $0x58] sm:$0xff]  ;;  %v3076_v47 = vld [vmem:[#allocation2 + $0x40] sm:$0xff]  ;;  %v3077_v63 = vld [vmem:[#allocation2 + $0xc8] sm:$0xff] }
 0x7ee   : > { %v3137_v2 = vadd.f32 %v6345_v43, %v3098_v10  ;;  %v3101_v28 = vadd.f32 %v3823_v12, %v3069_v44  ;;  %v3138_v15 = vadd.f32 %v6345_v43, %v3099_v6  ;;  %v3102_v55 = vadd.f32 %v3826_v0, %v3070_v14  ;;  %v3984_v23 = vld [vmem:[%s4939_s9 + $0x58] sm:$0xff]   ;;  %v3078_v54 = vld [vmem:[#allocation2 + $0xe0] sm:$0xff]  ;;  %v3079_v57 = vld [vmem:[#allocation2 + $0x90] sm:$0xff] }
 0x7ef   : > { %3991 = vst [vmem:[%s4957_s0 + $0x18] sm:$0xff] %v3882_v31   ;;  %v3103_v7 = vadd.f32 %v3827_v3, %v3071_v52  ;;  %v3831_v41 = vunpack.c.h.bf16 %v3980_v36  ;;  %v3139_v37 = vadd.f32 %v6345_v43, %v3100_v58  ;;  %v3104_v33 = vadd.f32 %v3830_v46, %v3072_v38  ;;  %v3080_v27 = vld [vmem:[#allocation2 + $0x70] sm:$0xff]  ;;  %v3985_v20 = vld [vmem:[%s4939_s9 + $0x60] sm:$0xff]   ;;  %v3082_v44 = vld [vmem:[#allocation2 + $0xa8] sm:$0xff] }
 0x7f0   : > { %v3140_v49 = vadd.f32 %v6345_v43, %v3101_v28  ;;  %v3834_v29 = vunpack.c.l.bf16 %v3981_v35  ;;  %v3887_v13 = vpack.c.bf16 %v3138_v15, %v3137_v2  ;;  %v3141_v17 = vadd.f32 %v6345_v43, %v3102_v55  ;;  %v3081_v22 = vld [vmem:[#allocation2 + $0xc0] sm:$0xff]  ;;  %v3986_v12 = vld [vmem:[%s4939_s9 + $0x68] sm:$0xff]   ;;  %v3083_v0 = vld [vmem:[#allocation2 + $0xd0] sm:$0xff] }
 0x7f1   : > { %v3142_v32 = vadd.f32 %v6345_v43, %v3103_v7  ;;  %v3105_v26 = vadd.f32 %v3831_v41, %v3073_v18  ;;  %v3143_v39 = vadd.f32 %v6345_v43, %v3104_v33  ;;  %v3835_v56 = vunpack.c.h.bf16 %v3981_v35  ;;  %v3987_v3 = vld [vmem:[%s4939_s9 + $0x70] sm:$0xff]   ;;  %v3085_v46 = vld [vmem:[#allocation2 + $0x28] sm:$0xff]  ;;  %v3988_v18 = vld [vmem:[%s4939_s9 + $0x78] sm:$0xff]  }
 0x7f2   : > { %v3892_v60 = vpack.c.bf16 %v3140_v49, %v3139_v37  ;;  %v3106_v45 = vadd.f32 %v3834_v29, %v3074_v61  ;;  %3992 = vst [vmem:[%s4957_s0 + $0x20] sm:$0xff] %v3887_v13   ;;  %v3838_v25 = vunpack.c.l.bf16 %v3982_v19  ;;  %v3839_v40 = vunpack.c.h.bf16 %v3982_v19  ;;  %v3084_v28 = vld [vmem:[#allocation2 + $0x10] sm:$0xff]  ;;  %v3086_v61 = vld [vmem:[#allocation2 + $0xa0] sm:$0xff]  ;;  %v3087_v37 = vld [vmem:[#allocation2 + $0xf8] sm:$0xff] }
 0x7f3   : > { %v3897_v9 = vpack.c.bf16 %v3142_v32, %v3141_v17  ;;  %v3144_v24 = vadd.f32 %v6345_v43, %v3105_v26  ;;  %v3107_v8 = vadd.f32 %v3835_v56, %v3075_v1  ;;  %v3842_v34 = vunpack.c.l.bf16 %v3983_v16  ;;  %v3088_v13 = vld [vmem:[#allocation2 + $0x20] sm:$0xff] }
 0x7f4   : > { %3993 = vst [vmem:[%s4957_s0 + $0x28] sm:$0xff] %v3892_v60   ;;  %v3145_v62 = vadd.f32 %v6345_v43, %v3106_v45  ;;  %v3843_v30 = vunpack.c.h.bf16 %v3983_v16  ;;  %v3108_v59 = vadd.f32 %v3838_v25, %v3076_v47  ;;  %v3109_v42 = vadd.f32 %v3839_v40, %v3077_v63  ;;  %v3089_v16 = vld [vmem:[#allocation2 + $0x98] sm:$0xff] }
 0x7f5   : > { %3994 = vst [vmem:[%s4957_s0 + $0x30] sm:$0xff] %v3897_v9   ;;  %v3902_v4 = vpack.c.bf16 %v3144_v24, %v3143_v39  ;;  %v3846_v21 = vunpack.c.l.bf16 %v3984_v23  ;;  %v3146_v48 = vadd.f32 %v6345_v43, %v3107_v8  ;;  %v3110_v51 = vadd.f32 %v3842_v34, %v3078_v54 }
 0x7f6   : > { %v3111_v11 = vadd.f32 %v3843_v30, %v3079_v57  ;;  %v3847_v50 = vunpack.c.h.bf16 %v3984_v23  ;;  %v3147_v36 = vadd.f32 %v6345_v43, %v3108_v59  ;;  %v3148_v5 = vadd.f32 %v6345_v43, %v3109_v42 }
 0x7f7   : > { %3995 = vst [vmem:[%s4957_s0 + $0x38] sm:$0xff] %v3902_v4   ;;  %v3112_v10 = vadd.f32 %v3846_v21, %v3080_v27  ;;  %v3850_v53 = vunpack.c.l.bf16 %v3985_v20  ;;  %v3907_v14 = vpack.c.bf16 %v3146_v48, %v3145_v62  ;;  %v3149_v52 = vadd.f32 %v6345_v43, %v3110_v51 }
 0x7f8   : > { %v3150_v31 = vadd.f32 %v6345_v43, %v3111_v11  ;;  %v3113_v6 = vadd.f32 %v3847_v50, %v3081_v22  ;;  %v3912_v38 = vpack.c.bf16 %v3148_v5, %v3147_v36  ;;  %v3851_v2 = vunpack.c.h.bf16 %v3985_v20 }
 0x7f9   : > { %v3151_v35 = vadd.f32 %v6345_v43, %v3112_v10  ;;  %v3114_v58 = vadd.f32 %v3850_v53, %v3082_v44  ;;  %3996 = vst [vmem:[%s4957_s0 + $0x40] sm:$0xff] %v3907_v14   ;;  %v3854_v7 = vunpack.c.l.bf16 %v3986_v12  ;;  %v3855_v41 = vunpack.c.h.bf16 %v3986_v12 }
 0x7fa   : > { %v3917_v15 = vpack.c.bf16 %v3150_v31, %v3149_v52  ;;  %v3152_v55 = vadd.f32 %v6345_v43, %v3113_v6  ;;  %3997 = vst [vmem:[%s4957_s0 + $0x48] sm:$0xff] %v3912_v38   ;;  %v3115_v49 = vadd.f32 %v3851_v2, %v3083_v0  ;;  %v3858_v29 = vunpack.c.l.bf16 %v3987_v3 }
 0x7fb   : > { %v3153_v33 = vadd.f32 %v6345_v43, %v3114_v58  ;;  %v3859_v19 = vunpack.c.h.bf16 %v3987_v3  ;;  %v3116_v32 = vadd.f32 %v3854_v7, %v3084_v28  ;;  %v3117_v26 = vadd.f32 %v3855_v41, %v3085_v46 }
 0x7fc   : > { %3998 = vst [vmem:[%s4957_s0 + $0x50] sm:$0xff] %v3917_v15   ;;  %v3922_v17 = vpack.c.bf16 %v3152_v55, %v3151_v35  ;;  %v3862_v1 = vunpack.c.l.bf16 %v3988_v18  ;;  %v3154_v60 = vadd.f32 %v6345_v43, %v3115_v49  ;;  %v3118_v39 = vadd.f32 %v3858_v29, %v3086_v61 }
 0x7fd   : > { %v3119_v56 = vadd.f32 %v3859_v19, %v3087_v37  ;;  %v3863_v45 = vunpack.c.h.bf16 %v3988_v18  ;;  %v3155_v47 = vadd.f32 %v6345_v43, %v3116_v32  ;;  %v3156_v63 = vadd.f32 %v6345_v43, %v3117_v26 }
 0x7fe   : > { %3999 = vst [vmem:[%s4957_s0 + $0x58] sm:$0xff] %v3922_v17   ;;  %v3120_v23 = vadd.f32 %v3862_v1, %v3088_v13  ;;  %v3927_v9 = vpack.c.bf16 %v3154_v60, %v3153_v33  ;;  %v3157_v24 = vadd.f32 %v6345_v43, %v3118_v39 }
 0x7ff   : > { %v3158_v25 = vadd.f32 %v6345_v43, %v3119_v56  ;;  %v3121_v40 = vadd.f32 %v3863_v45, %v3089_v16  ;;  %v3932_v54 = vpack.c.bf16 %v3156_v63, %v3155_v47 }
 0x800   : > { %v3159_v57 = vadd.f32 %v6345_v43, %v3120_v23  ;;  %4000 = vst [vmem:[%s4957_s0 + $0x60] sm:$0xff] %v3927_v9  }
 0x801   : > { %v3937_v8 = vpack.c.bf16 %v3158_v25, %v3157_v24  ;;  %v3160_v62 = vadd.f32 %v6345_v43, %v3121_v40  ;;  %4001 = vst [vmem:[%s4957_s0 + $0x68] sm:$0xff] %v3932_v54  }
 0x803   : > { %4002 = vst [vmem:[%s4957_s0 + $0x70] sm:$0xff] %v3937_v8   ;;  %v3942_v34 = vpack.c.bf16 %v3160_v62, %v3159_v57 }
 0x805   : > { %4003 = vst [vmem:[%s4957_s0 + $0x78] sm:$0xff] %v3942_v34  }
 0x806 PF: > { %s3655_s27 = sshll.u32 %s4775_s28, 11  ;;  %s3335_s10 = sshll.u32 %s4957_s0, 4  ;;  %s6417_s10 = int_to_ptr.vmem [resolvable:$true] %s3335_s10 }
 0x807   : > { %s6414_s12 = scalar_lea.hbm %s6477_s7, %s3655_s27  ;;  %s3322_s17 = scalar_lea.sflag [#allocation6], %s4935_s30 }
 0x808   : > { %s4691_s13 = scalar_lea.vmem %s6417_s10, 2048  ;;  %s4795_s23 = smov [#allocation7]  }
 0x809   : > { %p4692_p4 = scmp.ne.s32.totalorder %s6417_s10, %s4691_s13  ;;  %s4695_s21 = sshll.u32 %s4795_s23, 4  ;;  %s4696_s21 = int_to_ptr.vmem [resolvable:$false] %s4695_s21 }
 0x80a   : > { %s4697_s28 = scalar_lea.vmem %s4696_s21, 4096  ;;  %p4698_p7 = scmp.lt.s32.totalorder %s6417_s10, %s4696_s21 }
 0x80b   : > { %p4693_p5 = pnand %p4692_p4, %p4901_p10  ;;  %p4699_p8 = scmp.lt.s32.totalorder %s4697_s28, %s4691_s13 }
 0x80d   : > { %p4694_p6 = pneg %p4693_p5  ;;  %p4700_p12 = por %p4699_p8, %p4698_p7 }
 0x80f   : > { %p4701_p3 = pnand %p4700_p12, %p4694_p6 }
 0x811   : > { %4704 = shalt.err (!%p4701_p3)
}
 0x812   : > { %s4705_s0 = scalar_lea.hbm %s6414_s12, 2048  ;;  %s4709_s19 = scalar_lea.hbm %s6477_s7, 4096 }
 0x813   : > { %p4706_p13 = scmp.ne.s32.totalorder %s6414_s12, %s4705_s0  ;;  %p4710_p9 = scmp.lt.s32.totalorder %s6414_s12, %s6477_s7 }
 0x814   : > { %p4711_p1 = scmp.lt.s32.totalorder %s4709_s19, %s4705_s0 }
 0x815   : > { %p4707_p2 = pnand %p4706_p13, %p4901_p10 }
 0x816   : > { %p4712_p4 = por %p4711_p1, %p4710_p9 }
 0x817   : > { %p4708_p0 = pneg %p4707_p2 }
 0x819   : > { %p4713_p5 = pnand %p4712_p4, %p4708_p0 }
 0x81b   : > { %4716 = shalt.err (!%p4713_p5)
}
 0x81c   : > { %s4796_s27 = smov 64   ;;  %s4797_s9 = smov 4  }
 0x81d   : > { %4299 = dma.vmem_to_hbm [thread:$0]  (%p4901_p10), %s6417_s10, 2048, %s6414_s12, %s3322_s17, %s4796_s27, %s4796_s27, %s4797_s9  }
 0x81e PF: > { %p4310_p6 = scmp.ge.s32.totalorder %s4787_s8, 2  ;;  %s3350_s29 = sand.u32 1, %s4759_s24  }
 0x81f   : > { %s3351_s13 = scalar_lea.sflag [#allocation6], %s3350_s29 }
 0x820   : > { %p4306_p7 = pnand %p4310_p6, %p4907_p11 }
 0x822   : > { %p4307_p8 = pneg %p4306_p7 }
 0x824   : > { %4754 = dma.done.wait (%p4307_p8), %s3351_s13, 2048  }
 0x825   : > { %4756 = vsyncadd (%p4307_p8), %s3351_s13, 4294965248  ;;  %s23_s8 = sadd.s32 1, %s4787_s8   ;;  %s6567_s27 = sld [smem:[#allocation10_spill]] }
 0x826   : > { %p20_p12 = scmp.ge.s32.totalorder %s23_s8, 18   ;;  %s6568_s28 = sld [smem:[#allocation11_spill]] }
 0x827   : > { %s6569_s29 = sld [smem:[#allocation12_spill]]  ;;  %s6571_s24 = smov %s4763_s25 }
 0x828   : > { %s6570_s30 = sld [smem:[#allocation13_spill]]  ;;  %s6572_s25 = smov %s4767_s26 }
 0x829   : > { %s6573_s26 = smov %s4914_s20  ;;  %22 = sbr.rel (!%p20_p12) target bundleno = 9 (0x9), region = 107 }
 0x82e   :  { %3356 = vsyncpa [#allocation5], 1 }
 0x82f   :  { %3358 = vsyncpa [#allocation5 + $0x1], 1 }
 0x830   :  { %3359 = vsyncpa [#allocation6], 1 }
 0x831   :  { %3361 = vsyncpa [#allocation6 + $0x1], 1 }

</bundles_post_ra>
